<compile_context>
chip_gen: v6e
topology: v6e:2x2x1
jax: 0.10.0
libtpu: 0.0.40
codegen_flags: <defaults>
</compile_context>

<pallas_src>
import numpy as np

import jax
import jax.numpy as jnp
from jax.experimental import pallas as pl
from jax.experimental.pallas import tpu as pltpu

# ----------------------------- config (small) -------------------------------
IMG_SIZE = 64          # encoder input size (real MobileSAM: 1024)
PATCH = 8              # patch size (real: 16)
GP = IMG_SIZE // PATCH # 8 patches per side
TOKENS = GP * GP       # 64
FEAT = 3 * PATCH * PATCH
EMBED_DIM = 32         # real: 768 / TinyViT dims
NUM_HEADS = 2
HEAD_DIM = EMBED_DIM // NUM_HEADS
MLP_DIM = 4 * EMBED_DIM
OUT_CHANS = 32         # real SAM neck: 256

PIXEL_MEAN = (123.675, 116.28, 103.53)
PIXEL_STD = (58.395, 57.12, 57.375)

DOT_DT = jnp.bfloat16  # MXU-input dtype (f32 accumulate); elementwise math stays f32

# packed-constants row indices (each row padded to 128 lanes)
ROW_BQKV, ROW_LN1G, ROW_LN1B, ROW_BPROJ = 0, 1, 2, 3
ROW_LN2G, ROW_LN2B, ROW_BFC1, ROW_BFC2 = 4, 5, 6, 7
ROW_N1G, ROW_N1B, ROW_N2G, ROW_N2B = 8, 9, 10, 11
PACKED_ROWS = 16

_VMEM = pl.BlockSpec(memory_space=pltpu.MemorySpace.VMEM)
_SMEM = pl.BlockSpec(memory_space=pltpu.MemorySpace.SMEM)


# ------------------------------ fused kernel ---------------------------------
def _layernorm(v, g, b, eps):
    mu = jnp.mean(v, axis=-1, keepdims=True)
    var = jnp.mean((v - mu) ** 2, axis=-1, keepdims=True)
    return (v - mu) * jax.lax.rsqrt(var + eps) * g + b


def msam_fused_kernel(hw_ref, patches_ref, pyx_ref, mean_ref,
                      pe_w_ref, posb_ref, packed_ref,
                      wqkv_ref, wproj_ref, w1_ref, w2_ref,
                      nw1_ref, nw2_ref, nmask_ref,
                      o_ref):
    E = EMBED_DIM

    def rowvec(i, width):
        # static slice of the packed bias/gain slab -> (1, width)
        return packed_ref[i:i + 1, :width]

    # ---- preprocess folded into patch embed --------------------------------
    # pe_w already carries the 1/std factor (folded in the wrapper); per-channel
    # mean is subtracted only on the valid (h, w) region so the zero-padded
    # border stays exactly zero, matching sam.preprocess.  py/px/mean are
    # precomputed constants passed from the wrapper.
    h = hw_ref[0]
    w = hw_ref[1]
    valid = (pyx_ref[0] < h) & (pyx_ref[1] < w)
    patches = jnp.where(valid, patches_ref[...] - mean_ref[...], 0.0)

    # f32 matmul for the pixel-scale input (accuracy; tiny MXU cost).
    x = jnp.dot(patches, pe_w_ref[...],
                preferred_element_type=jnp.float32) + posb_ref[...]

    # ---- transformer block: pre-LN MHA (fused QKV, per-head attention) -----
    xn = _layernorm(x, rowvec(ROW_LN1G, E), rowvec(ROW_LN1B, E), 1e-5)
    qkv = (jnp.dot(xn.astype(DOT_DT), wqkv_ref[...],
                   preferred_element_type=jnp.float32)
           + rowvec(ROW_BQKV, 3 * E))                 # (T, 3E) f32
    qkv_b = qkv.astype(DOT_DT)                        # single bf16 copy
    scale = HEAD_DIM ** -0.5
    proj = jnp.zeros((TOKENS, E), jnp.float32)
    for hd in range(NUM_HEADS):                       # tiny static head loop
        lo = hd * HEAD_DIM
        qh = qkv_b[:, lo:lo + HEAD_DIM]
        kh = qkv_b[:, E + lo:E + lo + HEAD_DIM]
        vh = qkv_b[:, 2 * E + lo:2 * E + lo + HEAD_DIM]
        s = jax.lax.dot_general(
            qh, kh, (((1,), (1,)), ((), ())),          # q @ k^T without .T
            preferred_element_type=jnp.float32) * scale
        s = s - jnp.max(s, axis=-1, keepdims=True)
        e = jnp.exp(s)
        p = e * pl.reciprocal(jnp.sum(e, axis=-1, keepdims=True), approx=True)
        oh = jnp.dot(p.astype(DOT_DT), vh, preferred_element_type=jnp.float32)
        # accumulate the output projection per head -> no concat needed
        proj = proj + jnp.dot(oh.astype(DOT_DT), wproj_ref[hd],
                              preferred_element_type=jnp.float32)
    x = x + proj + rowvec(ROW_BPROJ, E)

    # ---- transformer block: MLP --------------------------------------------
    xn2 = _layernorm(x, rowvec(ROW_LN2G, E), rowvec(ROW_LN2B, E), 1e-5)
    hid = (jnp.dot(xn2.astype(DOT_DT), w1_ref[...],
                   preferred_element_type=jnp.float32)
           + rowvec(ROW_BFC1, MLP_DIM))
    # TODO(synk): PyTorch nn.GELU uses exact erf; tanh approximation kept here
    # (erf has no guaranteed Mosaic lowering at this JAX version).
    hid = jax.nn.gelu(hid)
    x = x + (jnp.dot(hid.astype(DOT_DT), w2_ref[...],
                     preferred_element_type=jnp.float32)
             + rowvec(ROW_BFC2, E))

    # ---- neck: 1x1 conv (no bias) + LayerNorm2d (channels last here) -------
    y1 = jnp.dot(x.astype(DOT_DT), nw1_ref[...], preferred_element_type=jnp.float32)
    y1 = _layernorm(y1, rowvec(ROW_N1G, OUT_CHANS), rowvec(ROW_N1B, OUT_CHANS), 1e-6)

    # ---- neck: 3x3 conv, pad=1, as 9 rolled matmuls + precomputed row masks.
    # token t = y*GP + x; neighbour (y+dy, x+dx) is token t + dy*GP + dx.
    # Border masking is applied AFTER the matmul (row-scale commutes with a
    # right matmul) so the mask multiply stays f32 (v5e has no bf16 VPU).
    acc = jnp.zeros((TOKENS, OUT_CHANS), jnp.float32)
    for tap in range(9):
        dy, dx = tap // 3 - 1, tap % 3 - 1
        off = dy * GP + dx
        shifted = pltpu.roll(y1, (-off) % TOKENS, 0) if off != 0 else y1
        tap_out = jnp.dot(shifted.astype(DOT_DT), nw2_ref[tap],
                          preferred_element_type=jnp.float32)
        acc = acc + nmask_ref[tap] * tap_out
    # TODO(synk): output is 32-lane wide; a lane-dense (16,128) store would
    # need an in-kernel (64,32)->(16,128) relayout (skipped: modest win,
    # lowering risk).
    o_ref[...] = _layernorm(acc, rowvec(ROW_N2G, OUT_CHANS),
                            rowvec(ROW_N2B, OUT_CHANS), 1e-6)


# ------------------------------ glue (plain JAX) -----------------------------
def resize_longest_side(img_hwc, target):
    # TODO(synk): torch ResizeLongestSide uses antialiased bilinear resize;
    # jax.image.resize bilinear (no antialias) is the closest clean equivalent.
    h, w = img_hwc.shape[:2]
    scale = target / max(h, w)
    newh, neww = int(h * scale + 0.5), int(w * scale + 0.5)
    out = jax.image.resize(img_hwc, (newh, neww, img_hwc.shape[2]), "bilinear")
    return out, newh, neww


def extract_patches(chw):
    # (3, S, S) raw pixels -> (tokens, 3*p*p), feature order (c, ph, pw).
    x = chw.reshape(3, GP, PATCH, GP, PATCH)
    x = x.transpose(1, 3, 0, 2, 4)
    return x.reshape(TOKENS, FEAT)


def init_params(key):
    ks = list(jax.random.split(key, 16))
    n = lambda k, shape, s=0.02: (jax.random.normal(k, shape) * s).astype(jnp.float32)
    return {
        "pe_w": n(ks[0], (FEAT, EMBED_DIM)),
        "pe_b": jnp.zeros((1, EMBED_DIM), jnp.float32),
        "pos": n(ks[1], (TOKENS, EMBED_DIM)),
        "block": {
            "ln1_g": jnp.ones((1, EMBED_DIM), jnp.float32),
            "ln1_b": jnp.zeros((1, EMBED_DIM), jnp.float32),
            "w_qkv": n(ks[2], (EMBED_DIM, 3 * EMBED_DIM)),
            "b_qkv": jnp.zeros((1, 3 * EMBED_DIM), jnp.float32),
            "w_proj": n(ks[3], (EMBED_DIM, EMBED_DIM)),
            "b_proj": jnp.zeros((1, EMBED_DIM), jnp.float32),
            "ln2_g": jnp.ones((1, EMBED_DIM), jnp.float32),
            "ln2_b": jnp.zeros((1, EMBED_DIM), jnp.float32),
            "w_fc1": n(ks[4], (EMBED_DIM, MLP_DIM)),
            "b_fc1": jnp.zeros((1, MLP_DIM), jnp.float32),
            "w_fc2": n(ks[5], (MLP_DIM, EMBED_DIM)),
            "b_fc2": jnp.zeros((1, EMBED_DIM), jnp.float32),
        },
        "neck_w1": n(ks[6], (EMBED_DIM, OUT_CHANS)),        # 1x1 conv (no bias)
        "neck_ln1_g": jnp.ones((1, OUT_CHANS), jnp.float32),
        "neck_ln1_b": jnp.zeros((1, OUT_CHANS), jnp.float32),
        "neck_w2": n(ks[7], (9 * OUT_CHANS, OUT_CHANS)),    # 3x3 conv, rows (kh,kw,c)
        "neck_ln2_g": jnp.ones((1, OUT_CHANS), jnp.float32),
        "neck_ln2_b": jnp.zeros((1, OUT_CHANS), jnp.float32),
    }


@jax.jit
def msam_forward(img_chw_padded, params, hw):
    # NOTE: real MobileSAM TinyViT has many blocks/stages; one representative
    # transformer block is run here (same as the reference toy config).
    patches = extract_patches(img_chw_padded)          # raw pixels, (T, FEAT)

    blk = params["block"]
    E, H, Dh = EMBED_DIM, NUM_HEADS, HEAD_DIM

    # Fold 1/std of the SAM preprocess into the patch-embed weight rows
    # (patch-embed matmul stays f32 for pixel-scale accuracy).
    std_f = jnp.repeat(jnp.asarray(PIXEL_STD, jnp.float32), PATCH * PATCH)
    pe_w = params["pe_w"] / std_f[:, None]
    posb = params["pos"] + params["pe_b"]               # fold pe_b into pos

    # --- constant index/mean maps (numpy -> XLA literals; no in-kernel iota) -
    f = np.arange(FEAT)
    t = np.arange(TOKENS)
    c = f // (PATCH * PATCH)                             # feature order (c,ph,pw)
    ph = (f // PATCH) % PATCH
    pw = f % PATCH
    py = (t[:, None] // GP) * PATCH + ph[None, :]        # abs pixel row per feat
    px = (t[:, None] % GP) * PATCH + pw[None, :]         # abs pixel col per feat
    pyx = jnp.asarray(np.stack([py, px]).astype(np.int32))        # (2, T, FEAT)
    mean_row = jnp.asarray(np.asarray(PIXEL_MEAN, np.float32)[c][None, :])  # (1, FEAT)

    # --- 3x3 neck-conv border validity masks, one per tap -------------------
    ty, tx = t // GP, t % GP
    nmask = jnp.asarray(np.stack([
        ((ty + dy >= 0) & (ty + dy < GP) & (tx + dx >= 0) & (tx + dx < GP))
        for dy in (-1, 0, 1) for dx in (-1, 0, 1)
    ]).astype(np.float32)[:, :, None])                   # (9, T, 1)

    # --- pack ALL tiny gain/bias vectors into one (16, 128) f32 slab --------
    def _pad128(v):
        v = jnp.reshape(v, (-1,)).astype(jnp.float32)
        return jnp.pad(v, (0, 128 - v.shape[0]))
    packed = jnp.stack([
        _pad128(blk["b_qkv"]),                           # ROW_BQKV
        _pad128(blk["ln1_g"]), _pad128(blk["ln1_b"]),    # ROW_LN1G/B
        _pad128(blk["b_proj"]),                          # ROW_BPROJ
        _pad128(blk["ln2_g"]), _pad128(blk["ln2_b"]),    # ROW_LN2G/B
        _pad128(blk["b_fc1"]), _pad128(blk["b_fc2"]),    # ROW_BFC1/2
        _pad128(params["neck_ln1_g"]), _pad128(params["neck_ln1_b"]),  # ROW_N1G/B
        _pad128(params["neck_ln2_g"]), _pad128(params["neck_ln2_b"]),  # ROW_N2G/B
    ])
    packed = jnp.pad(packed, ((0, PACKED_ROWS - packed.shape[0]), (0, 0)))

    # --- weights: fused qkv; proj pre-split per head; bf16 MXU inputs -------
    w_qkv = blk["w_qkv"].astype(DOT_DT)                  # (E, 3E), head-major per block
    w_proj = blk["w_proj"].reshape(H, Dh, E).astype(DOT_DT)
    nw2 = params["neck_w2"].reshape(9, OUT_CHANS, OUT_CHANS).astype(DOT_DT)

    out = pl.pallas_call(
        msam_fused_kernel,
        out_shape=jax.ShapeDtypeStruct((TOKENS, OUT_CHANS), jnp.float32),
        in_specs=[_SMEM] + [_VMEM] * 13,
        out_specs=_VMEM,
    )(hw, patches, pyx, mean_row,
      pe_w, posb, packed,
      w_qkv, w_proj,
      blk["w_fc1"].astype(DOT_DT), blk["w_fc2"].astype(DOT_DT),
      params["neck_w1"].astype(DOT_DT), nw2, nmask)

    # NCHW output like the PyTorch image encoder: (1, OUT_CHANS, GP, GP)
    return out.reshape(GP, GP, OUT_CHANS).transpose(2, 0, 1)[None]


if __name__ == "__main__":
    key = jax.random.PRNGKey(0)
    k_img, k_par = jax.random.split(key)

    # Synthetic "image": HWC float in [0, 255], non-square to exercise resize/pad.
    img = jax.random.uniform(k_img, (40, 56, 3), jnp.float32) * 255.0
    img_format = "RGB"
    if img_format != "RGB":
        img = img[..., ::-1]  # BGR -> RGB flip as in MSAM.transform

    # MSAM.transform: resize longest side to IMG_SIZE; sam.preprocess pad is
    # done here as raw zero-pad (normalization is folded into the kernel).
    resized, newh, neww = resize_longest_side(img, IMG_SIZE)
    chw = jnp.transpose(resized, (2, 0, 1))
    chw_padded = jnp.pad(chw, ((0, 0), (0, IMG_SIZE - newh), (0, IMG_SIZE - neww)))
    hw = jnp.array([newh, neww], jnp.int32)

    params = init_params(k_par)
    out = msam_forward(chw_padded, params, hw)
    out = jax.block_until_ready(out)
    assert out.shape == (1, OUT_CHANS, GP, GP), out.shape
    assert bool(jnp.all(jnp.isfinite(out)))
    print("KERNEL_OK")
</pallas_src>

<mosaic_0001>
module attributes {stable_mosaic.version = 11 : i64} {
  func.func @msam_fused_kernel(%arg0: memref<2xi32, #tpu.memory_space<smem>>, %arg1: memref<64x192xf32, #tpu.memory_space<vmem>>, %arg2: memref<2x64x192xi32, #tpu.memory_space<vmem>>, %arg3: memref<1x192xf32, #tpu.memory_space<vmem>>, %arg4: memref<192x32xf32, #tpu.memory_space<vmem>>, %arg5: memref<64x32xf32, #tpu.memory_space<vmem>>, %arg6: memref<16x128xf32, #tpu.memory_space<vmem>>, %arg7: memref<32x96xbf16, #tpu.memory_space<vmem>>, %arg8: memref<2x16x32xbf16, #tpu.memory_space<vmem>>, %arg9: memref<32x128xbf16, #tpu.memory_space<vmem>>, %arg10: memref<128x32xbf16, #tpu.memory_space<vmem>>, %arg11: memref<32x32xbf16, #tpu.memory_space<vmem>>, %arg12: memref<9x32x32xbf16, #tpu.memory_space<vmem>>, %arg13: memref<9x64x1xf32, #tpu.memory_space<vmem>>, %arg14: memref<64x32xf32, #tpu.memory_space<vmem>>) attributes {dimension_semantics = [], scalar_prefetch = 0 : i64, scratch_operands = 0 : i64, tpu.core_type = #tpu.core_type<tc>} {
    %c0 = arith.constant 0 : index
    %0 = memref.load %arg0[%c0] : memref<2xi32, #tpu.memory_space<smem>>
    %c1 = arith.constant 1 : index
    %1 = memref.load %arg0[%c1] : memref<2xi32, #tpu.memory_space<smem>>
    %c0_0 = arith.constant 0 : index
    %c0_1 = arith.constant 0 : index
    %c0_2 = arith.constant 0 : index
    %2 = vector.load %arg2[%c0_0, %c0_1, %c0_2] : memref<2x64x192xi32, #tpu.memory_space<vmem>>, vector<1x64x192xi32>
    %3 = vector.shape_cast %2 : vector<1x64x192xi32> to vector<64x192xi32>
    %4 = vector.broadcast %0 : i32 to vector<64x192xi32>
    %5 = arith.cmpi slt, %3, %4 : vector<64x192xi32>
    %c1_3 = arith.constant 1 : index
    %c0_4 = arith.constant 0 : index
    %c0_5 = arith.constant 0 : index
    %6 = vector.load %arg2[%c1_3, %c0_4, %c0_5] : memref<2x64x192xi32, #tpu.memory_space<vmem>>, vector<1x64x192xi32>
    %7 = vector.shape_cast %6 : vector<1x64x192xi32> to vector<64x192xi32>
    %8 = vector.broadcast %1 : i32 to vector<64x192xi32>
    %9 = arith.cmpi slt, %7, %8 : vector<64x192xi32>
    %10 = arith.andi %5, %9 : vector<64x192xi1>
    %c0_6 = arith.constant 0 : index
    %c0_7 = arith.constant 0 : index
    %11 = vector.load %arg1[%c0_6, %c0_7] : memref<64x192xf32, #tpu.memory_space<vmem>>, vector<64x192xf32>
    %c0_8 = arith.constant 0 : index
    %c0_9 = arith.constant 0 : index
    %12 = vector.load %arg3[%c0_8, %c0_9] : memref<1x192xf32, #tpu.memory_space<vmem>>, vector<1x192xf32>
    %13 = vector.broadcast %12 : vector<1x192xf32> to vector<64x192xf32>
    %14 = arith.subf %11, %13 : vector<64x192xf32>
    %cst = arith.constant 0.000000e+00 : f32
    %15 = vector.broadcast %cst : f32 to vector<64x192xf32>
    %16 = arith.select %10, %14, %15 : vector<64x192xi1>, vector<64x192xf32>
    %c0_10 = arith.constant 0 : index
    %c0_11 = arith.constant 0 : index
    %17 = vector.load %arg4[%c0_10, %c0_11] : memref<192x32xf32, #tpu.memory_space<vmem>>, vector<192x32xf32>
    %cst_12 = arith.constant dense<0.000000e+00> : vector<64x32xf32>
    %18 = tpu.matmul %16, %17, %cst_12 {dimension_numbers = #tpu.dot_dimension_numbers<[1], [0], [0], [1], [0, 0, 1, 1], [], []>} : vector<64x192xf32>, vector<192x32xf32>, vector<64x32xf32> -> vector<64x32xf32>
    %c0_13 = arith.constant 0 : index
    %c0_14 = arith.constant 0 : index
    %19 = vector.load %arg5[%c0_13, %c0_14] : memref<64x32xf32, #tpu.memory_space<vmem>>, vector<64x32xf32>
    %20 = arith.addf %18, %19 : vector<64x32xf32>
    %c1_15 = arith.constant 1 : index
    %c0_16 = arith.constant 0 : index
    %21 = vector.load %arg6[%c1_15, %c0_16] : memref<16x128xf32, #tpu.memory_space<vmem>>, vector<1x32xf32>
    %c2 = arith.constant 2 : index
    %c0_17 = arith.constant 0 : index
    %22 = vector.load %arg6[%c2, %c0_17] : memref<16x128xf32, #tpu.memory_space<vmem>>, vector<1x32xf32>
    %cst_18 = arith.constant dense<0.000000e+00> : vector<64xf32>
    %23 = vector.multi_reduction <add>, %20, %cst_18 [1] : vector<64x32xf32> to vector<64xf32>
    %24 = vector.shape_cast %23 : vector<64xf32> to vector<64x1xf32>
    %cst_19 = arith.constant 3.200000e+01 : f32
    %25 = vector.broadcast %cst_19 : f32 to vector<64x1xf32>
    %26 = arith.divf %24, %25 : vector<64x1xf32>
    %27 = vector.broadcast %26 : vector<64x1xf32> to vector<64x32xf32>
    %28 = arith.subf %20, %27 : vector<64x32xf32>
    %29 = arith.mulf %28, %28 : vector<64x32xf32>
    %cst_20 = arith.constant dense<0.000000e+00> : vector<64xf32>
    %30 = vector.multi_reduction <add>, %29, %cst_20 [1] : vector<64x32xf32> to vector<64xf32>
    %31 = vector.shape_cast %30 : vector<64xf32> to vector<64x1xf32>
    %cst_21 = arith.constant 3.200000e+01 : f32
    %32 = vector.broadcast %cst_21 : f32 to vector<64x1xf32>
    %33 = arith.divf %31, %32 : vector<64x1xf32>
    %34 = vector.broadcast %26 : vector<64x1xf32> to vector<64x32xf32>
    %35 = arith.subf %20, %34 : vector<64x32xf32>
    %cst_22 = arith.constant 9.99999974E-6 : f32
    %36 = vector.broadcast %cst_22 : f32 to vector<64x1xf32>
    %37 = arith.addf %33, %36 : vector<64x1xf32>
    %38 = math.rsqrt %37 : vector<64x1xf32>
    %39 = vector.broadcast %38 : vector<64x1xf32> to vector<64x32xf32>
    %40 = arith.mulf %35, %39 : vector<64x32xf32>
    %41 = vector.broadcast %21 : vector<1x32xf32> to vector<64x32xf32>
    %42 = arith.mulf %40, %41 : vector<64x32xf32>
    %43 = vector.broadcast %22 : vector<1x32xf32> to vector<64x32xf32>
    %44 = arith.addf %42, %43 : vector<64x32xf32>
    %45 = arith.truncf %44 : vector<64x32xf32> to vector<64x32xbf16>
    %c0_23 = arith.constant 0 : index
    %c0_24 = arith.constant 0 : index
    %46 = vector.load %arg7[%c0_23, %c0_24] : memref<32x96xbf16, #tpu.memory_space<vmem>>, vector<32x96xbf16>
    %cst_25 = arith.constant dense<0.000000e+00> : vector<64x96xf32>
    %47 = tpu.matmul %45, %46, %cst_25 {dimension_numbers = #tpu.dot_dimension_numbers<[1], [0], [0], [1], [0, 0, 1, 1], [], []>} : vector<64x32xbf16>, vector<32x96xbf16>, vector<64x96xf32> -> vector<64x96xf32>
    %c0_26 = arith.constant 0 : index
    %c0_27 = arith.constant 0 : index
    %48 = vector.load %arg6[%c0_26, %c0_27] : memref<16x128xf32, #tpu.memory_space<vmem>>, vector<1x96xf32>
    %49 = vector.broadcast %48 : vector<1x96xf32> to vector<64x96xf32>
    %50 = arith.addf %47, %49 : vector<64x96xf32>
    %51 = arith.truncf %50 : vector<64x96xf32> to vector<64x96xbf16>
    %cst_28 = arith.constant 0.000000e+00 : f32
    %52 = vector.broadcast %cst_28 : f32 to vector<64x32xf32>
    %53 = vector.extract_strided_slice %51 {offsets = [0, 0], sizes = [64, 16], strides = [1, 1]} : vector<64x96xbf16> to vector<64x16xbf16>
    %54 = vector.extract_strided_slice %51 {offsets = [0, 32], sizes = [64, 16], strides = [1, 1]} : vector<64x96xbf16> to vector<64x16xbf16>
    %55 = vector.extract_strided_slice %51 {offsets = [0, 64], sizes = [64, 16], strides = [1, 1]} : vector<64x96xbf16> to vector<64x16xbf16>
    %cst_29 = arith.constant dense<0.000000e+00> : vector<64x64xf32>
    %56 = tpu.matmul %53, %54, %cst_29 {dimension_numbers = #tpu.dot_dimension_numbers<[1], [1], [0], [0], [0, 0, 1, 0], [], []>} : vector<64x16xbf16>, vector<64x16xbf16>, vector<64x64xf32> -> vector<64x64xf32>
    %cst_30 = arith.constant 2.500000e-01 : f32
    %57 = vector.broadcast %cst_30 : f32 to vector<64x64xf32>
    %58 = arith.mulf %56, %57 : vector<64x64xf32>
    %cst_31 = arith.constant dense<0xFF800000> : vector<64xf32>
    %59 = vector.multi_reduction <maximumf>, %58, %cst_31 [1] : vector<64x64xf32> to vector<64xf32>
    %60 = vector.shape_cast %59 : vector<64xf32> to vector<64x1xf32>
    %61 = vector.broadcast %60 : vector<64x1xf32> to vector<64x64xf32>
    %62 = arith.subf %58, %61 : vector<64x64xf32>
    %63 = math.exp %62 : vector<64x64xf32>
    %cst_32 = arith.constant dense<0.000000e+00> : vector<64xf32>
    %64 = vector.multi_reduction <add>, %63, %cst_32 [1] : vector<64x64xf32> to vector<64xf32>
    %65 = vector.shape_cast %64 : vector<64xf32> to vector<64x1xf32>
    %66 = tpu.reciprocal %65 {approx = true} : vector<64x1xf32> -> vector<64x1xf32>
    %67 = vector.broadcast %66 : vector<64x1xf32> to vector<64x64xf32>
    %68 = arith.mulf %63, %67 : vector<64x64xf32>
    %69 = arith.truncf %68 : vector<64x64xf32> to vector<64x64xbf16>
    %cst_33 = arith.constant dense<0.000000e+00> : vector<64x16xf32>
    %70 = tpu.matmul %69, %55, %cst_33 {dimension_numbers = #tpu.dot_dimension_numbers<[1], [0], [0], [1], [0, 0, 1, 1], [], []>} : vector<64x64xbf16>, vector<64x16xbf16>, vector<64x16xf32> -> vector<64x16xf32>
    %71 = arith.truncf %70 : vector<64x16xf32> to vector<64x16xbf16>
    %c0_34 = arith.constant 0 : index
    %c0_35 = arith.constant 0 : index
    %c0_36 = arith.constant 0 : index
    %72 = vector.load %arg8[%c0_34, %c0_35, %c0_36] : memref<2x16x32xbf16, #tpu.memory_space<vmem>>, vector<1x16x32xbf16>
    %73 = vector.shape_cast %72 : vector<1x16x32xbf16> to vector<16x32xbf16>
    %cst_37 = arith.constant dense<0.000000e+00> : vector<64x32xf32>
    %74 = tpu.matmul %71, %73, %cst_37 {dimension_numbers = #tpu.dot_dimension_numbers<[1], [0], [0], [1], [0, 0, 1, 1], [], []>} : vector<64x16xbf16>, vector<16x32xbf16>, vector<64x32xf32> -> vector<64x32xf32>
    %75 = arith.addf %52, %74 : vector<64x32xf32>
    %76 = vector.extract_strided_slice %51 {offsets = [0, 16], sizes = [64, 16], strides = [1, 1]} : vector<64x96xbf16> to vector<64x16xbf16>
    %77 = vector.extract_strided_slice %51 {offsets = [0, 48], sizes = [64, 16], strides = [1, 1]} : vector<64x96xbf16> to vector<64x16xbf16>
    %78 = vector.extract_strided_slice %51 {offsets = [0, 80], sizes = [64, 16], strides = [1, 1]} : vector<64x96xbf16> to vector<64x16xbf16>
    %cst_38 = arith.constant dense<0.000000e+00> : vector<64x64xf32>
    %79 = tpu.matmul %76, %77, %cst_38 {dimension_numbers = #tpu.dot_dimension_numbers<[1], [1], [0], [0], [0, 0, 1, 0], [], []>} : vector<64x16xbf16>, vector<64x16xbf16>, vector<64x64xf32> -> vector<64x64xf32>
    %cst_39 = arith.constant 2.500000e-01 : f32
    %80 = vector.broadcast %cst_39 : f32 to vector<64x64xf32>
    %81 = arith.mulf %79, %80 : vector<64x64xf32>
    %cst_40 = arith.constant dense<0xFF800000> : vector<64xf32>
    %82 = vector.multi_reduction <maximumf>, %81, %cst_40 [1] : vector<64x64xf32> to vector<64xf32>
    %83 = vector.shape_cast %82 : vector<64xf32> to vector<64x1xf32>
    %84 = vector.broadcast %83 : vector<64x1xf32> to vector<64x64xf32>
    %85 = arith.subf %81, %84 : vector<64x64xf32>
    %86 = math.exp %85 : vector<64x64xf32>
    %cst_41 = arith.constant dense<0.000000e+00> : vector<64xf32>
    %87 = vector.multi_reduction <add>, %86, %cst_41 [1] : vector<64x64xf32> to vector<64xf32>
    %88 = vector.shape_cast %87 : vector<64xf32> to vector<64x1xf32>
    %89 = tpu.reciprocal %88 {approx = true} : vector<64x1xf32> -> vector<64x1xf32>
    %90 = vector.broadcast %89 : vector<64x1xf32> to vector<64x64xf32>
    %91 = arith.mulf %86, %90 : vector<64x64xf32>
    %92 = arith.truncf %91 : vector<64x64xf32> to vector<64x64xbf16>
    %cst_42 = arith.constant dense<0.000000e+00> : vector<64x16xf32>
    %93 = tpu.matmul %92, %78, %cst_42 {dimension_numbers = #tpu.dot_dimension_numbers<[1], [0], [0], [1], [0, 0, 1, 1], [], []>} : vector<64x64xbf16>, vector<64x16xbf16>, vector<64x16xf32> -> vector<64x16xf32>
    %94 = arith.truncf %93 : vector<64x16xf32> to vector<64x16xbf16>
    %c1_43 = arith.constant 1 : index
    %c0_44 = arith.constant 0 : index
    %c0_45 = arith.constant 0 : index
    %95 = vector.load %arg8[%c1_43, %c0_44, %c0_45] : memref<2x16x32xbf16, #tpu.memory_space<vmem>>, vector<1x16x32xbf16>
    %96 = vector.shape_cast %95 : vector<1x16x32xbf16> to vector<16x32xbf16>
    %cst_46 = arith.constant dense<0.000000e+00> : vector<64x32xf32>
    %97 = tpu.matmul %94, %96, %cst_46 {dimension_numbers = #tpu.dot_dimension_numbers<[1], [0], [0], [1], [0, 0, 1, 1], [], []>} : vector<64x16xbf16>, vector<16x32xbf16>, vector<64x32xf32> -> vector<64x32xf32>
    %98 = arith.addf %75, %97 : vector<64x32xf32>
    %99 = arith.addf %20, %98 : vector<64x32xf32>
    %c3 = arith.constant 3 : index
    %c0_47 = arith.constant 0 : index
    %100 = vector.load %arg6[%c3, %c0_47] : memref<16x128xf32, #tpu.memory_space<vmem>>, vector<1x32xf32>
    %101 = vector.broadcast %100 : vector<1x32xf32> to vector<64x32xf32>
    %102 = arith.addf %99, %101 : vector<64x32xf32>
    %c4 = arith.constant 4 : index
    %c0_48 = arith.constant 0 : index
    %103 = vector.load %arg6[%c4, %c0_48] : memref<16x128xf32, #tpu.memory_space<vmem>>, vector<1x32xf32>
    %c5 = arith.constant 5 : index
    %c0_49 = arith.constant 0 : index
    %104 = vector.load %arg6[%c5, %c0_49] : memref<16x128xf32, #tpu.memory_space<vmem>>, vector<1x32xf32>
    %cst_50 = arith.constant dense<0.000000e+00> : vector<64xf32>
    %105 = vector.multi_reduction <add>, %102, %cst_50 [1] : vector<64x32xf32> to vector<64xf32>
    %106 = vector.shape_cast %105 : vector<64xf32> to vector<64x1xf32>
    %cst_51 = arith.constant 3.200000e+01 : f32
    %107 = vector.broadcast %cst_51 : f32 to vector<64x1xf32>
    %108 = arith.divf %106, %107 : vector<64x1xf32>
    %109 = vector.broadcast %108 : vector<64x1xf32> to vector<64x32xf32>
    %110 = arith.subf %102, %109 : vector<64x32xf32>
    %111 = arith.mulf %110, %110 : vector<64x32xf32>
    %cst_52 = arith.constant dense<0.000000e+00> : vector<64xf32>
    %112 = vector.multi_reduction <add>, %111, %cst_52 [1] : vector<64x32xf32> to vector<64xf32>
    %113 = vector.shape_cast %112 : vector<64xf32> to vector<64x1xf32>
    %cst_53 = arith.constant 3.200000e+01 : f32
    %114 = vector.broadcast %cst_53 : f32 to vector<64x1xf32>
    %115 = arith.divf %113, %114 : vector<64x1xf32>
    %116 = vector.broadcast %108 : vector<64x1xf32> to vector<64x32xf32>
    %117 = arith.subf %102, %116 : vector<64x32xf32>
    %cst_54 = arith.constant 9.99999974E-6 : f32
    %118 = vector.broadcast %cst_54 : f32 to vector<64x1xf32>
    %119 = arith.addf %115, %118 : vector<64x1xf32>
    %120 = math.rsqrt %119 : vector<64x1xf32>
    %121 = vector.broadcast %120 : vector<64x1xf32> to vector<64x32xf32>
    %122 = arith.mulf %117, %121 : vector<64x32xf32>
    %123 = vector.broadcast %103 : vector<1x32xf32> to vector<64x32xf32>
    %124 = arith.mulf %122, %123 : vector<64x32xf32>
    %125 = vector.broadcast %104 : vector<1x32xf32> to vector<64x32xf32>
    %126 = arith.addf %124, %125 : vector<64x32xf32>
    %127 = arith.truncf %126 : vector<64x32xf32> to vector<64x32xbf16>
    %c0_55 = arith.constant 0 : index
    %c0_56 = arith.constant 0 : index
    %128 = vector.load %arg9[%c0_55, %c0_56] : memref<32x128xbf16, #tpu.memory_space<vmem>>, vector<32x128xbf16>
    %cst_57 = arith.constant dense<0.000000e+00> : vector<64x128xf32>
    %129 = tpu.matmul %127, %128, %cst_57 {dimension_numbers = #tpu.dot_dimension_numbers<[1], [0], [0], [1], [0, 0, 1, 1], [], []>} : vector<64x32xbf16>, vector<32x128xbf16>, vector<64x128xf32> -> vector<64x128xf32>
    %c6 = arith.constant 6 : index
    %c0_58 = arith.constant 0 : index
    %130 = vector.load %arg6[%c6, %c0_58] : memref<16x128xf32, #tpu.memory_space<vmem>>, vector<1x128xf32>
    %131 = vector.broadcast %130 : vector<1x128xf32> to vector<64x128xf32>
    %132 = arith.addf %129, %131 : vector<64x128xf32>
    %133 = arith.mulf %132, %132 : vector<64x128xf32>
    %134 = arith.mulf %132, %133 : vector<64x128xf32>
    %cst_59 = arith.constant 4.471500e-02 : f32
    %135 = vector.broadcast %cst_59 : f32 to vector<64x128xf32>
    %136 = arith.mulf %135, %134 : vector<64x128xf32>
    %137 = arith.addf %132, %136 : vector<64x128xf32>
    %cst_60 = arith.constant 0.797884583 : f32
    %138 = vector.broadcast %cst_60 : f32 to vector<64x128xf32>
    %139 = arith.mulf %138, %137 : vector<64x128xf32>
    %140 = math.tanh %139 : vector<64x128xf32>
    %cst_61 = arith.constant 1.000000e+00 : f32
    %141 = vector.broadcast %cst_61 : f32 to vector<64x128xf32>
    %142 = arith.addf %141, %140 : vector<64x128xf32>
    %cst_62 = arith.constant 5.000000e-01 : f32
    %143 = vector.broadcast %cst_62 : f32 to vector<64x128xf32>
    %144 = arith.mulf %143, %142 : vector<64x128xf32>
    %145 = arith.mulf %132, %144 : vector<64x128xf32>
    %146 = arith.truncf %145 : vector<64x128xf32> to vector<64x128xbf16>
    %c0_63 = arith.constant 0 : index
    %c0_64 = arith.constant 0 : index
    %147 = vector.load %arg10[%c0_63, %c0_64] : memref<128x32xbf16, #tpu.memory_space<vmem>>, vector<128x32xbf16>
    %cst_65 = arith.constant dense<0.000000e+00> : vector<64x32xf32>
    %148 = tpu.matmul %146, %147, %cst_65 {dimension_numbers = #tpu.dot_dimension_numbers<[1], [0], [0], [1], [0, 0, 1, 1], [], []>} : vector<64x128xbf16>, vector<128x32xbf16>, vector<64x32xf32> -> vector<64x32xf32>
    %c7 = arith.constant 7 : index
    %c0_66 = arith.constant 0 : index
    %149 = vector.load %arg6[%c7, %c0_66] : memref<16x128xf32, #tpu.memory_space<vmem>>, vector<1x32xf32>
    %150 = vector.broadcast %149 : vector<1x32xf32> to vector<64x32xf32>
    %151 = arith.addf %148, %150 : vector<64x32xf32>
    %152 = arith.addf %102, %151 : vector<64x32xf32>
    %153 = arith.truncf %152 : vector<64x32xf32> to vector<64x32xbf16>
    %c0_67 = arith.constant 0 : index
    %c0_68 = arith.constant 0 : index
    %154 = vector.load %arg11[%c0_67, %c0_68] : memref<32x32xbf16, #tpu.memory_space<vmem>>, vector<32x32xbf16>
    %cst_69 = arith.constant dense<0.000000e+00> : vector<64x32xf32>
    %155 = tpu.matmul %153, %154, %cst_69 {dimension_numbers = #tpu.dot_dimension_numbers<[1], [0], [0], [1], [0, 0, 1, 1], [], []>} : vector<64x32xbf16>, vector<32x32xbf16>, vector<64x32xf32> -> vector<64x32xf32>
    %c8 = arith.constant 8 : index
    %c0_70 = arith.constant 0 : index
    %156 = vector.load %arg6[%c8, %c0_70] : memref<16x128xf32, #tpu.memory_space<vmem>>, vector<1x32xf32>
    %c9 = arith.constant 9 : index
    %c0_71 = arith.constant 0 : index
    %157 = vector.load %arg6[%c9, %c0_71] : memref<16x128xf32, #tpu.memory_space<vmem>>, vector<1x32xf32>
    %cst_72 = arith.constant dense<0.000000e+00> : vector<64xf32>
    %158 = vector.multi_reduction <add>, %155, %cst_72 [1] : vector<64x32xf32> to vector<64xf32>
    %159 = vector.shape_cast %158 : vector<64xf32> to vector<64x1xf32>
    %cst_73 = arith.constant 3.200000e+01 : f32
    %160 = vector.broadcast %cst_73 : f32 to vector<64x1xf32>
    %161 = arith.divf %159, %160 : vector<64x1xf32>
    %162 = vector.broadcast %161 : vector<64x1xf32> to vector<64x32xf32>
    %163 = arith.subf %155, %162 : vector<64x32xf32>
    %164 = arith.mulf %163, %163 : vector<64x32xf32>
    %cst_74 = arith.constant dense<0.000000e+00> : vector<64xf32>
    %165 = vector.multi_reduction <add>, %164, %cst_74 [1] : vector<64x32xf32> to vector<64xf32>
    %166 = vector.shape_cast %165 : vector<64xf32> to vector<64x1xf32>
    %cst_75 = arith.constant 3.200000e+01 : f32
    %167 = vector.broadcast %cst_75 : f32 to vector<64x1xf32>
    %168 = arith.divf %166, %167 : vector<64x1xf32>
    %169 = vector.broadcast %161 : vector<64x1xf32> to vector<64x32xf32>
    %170 = arith.subf %155, %169 : vector<64x32xf32>
    %cst_76 = arith.constant 9.99999997E-7 : f32
    %171 = vector.broadcast %cst_76 : f32 to vector<64x1xf32>
    %172 = arith.addf %168, %171 : vector<64x1xf32>
    %173 = math.rsqrt %172 : vector<64x1xf32>
    %174 = vector.broadcast %173 : vector<64x1xf32> to vector<64x32xf32>
    %175 = arith.mulf %170, %174 : vector<64x32xf32>
    %176 = vector.broadcast %156 : vector<1x32xf32> to vector<64x32xf32>
    %177 = arith.mulf %175, %176 : vector<64x32xf32>
    %178 = vector.broadcast %157 : vector<1x32xf32> to vector<64x32xf32>
    %179 = arith.addf %177, %178 : vector<64x32xf32>
    %cst_77 = arith.constant 0.000000e+00 : f32
    %180 = vector.broadcast %cst_77 : f32 to vector<64x32xf32>
    %c9_i32 = arith.constant 9 : i32
    %181 = tpu.dynamic_rotate %179 by %c9_i32 dim 0 : vector<64x32xf32>, i32 -> vector<64x32xf32>
    %182 = arith.truncf %181 : vector<64x32xf32> to vector<64x32xbf16>
    %c0_78 = arith.constant 0 : index
    %c0_79 = arith.constant 0 : index
    %c0_80 = arith.constant 0 : index
    %183 = vector.load %arg12[%c0_78, %c0_79, %c0_80] : memref<9x32x32xbf16, #tpu.memory_space<vmem>>, vector<1x32x32xbf16>
    %184 = vector.shape_cast %183 : vector<1x32x32xbf16> to vector<32x32xbf16>
    %cst_81 = arith.constant dense<0.000000e+00> : vector<64x32xf32>
    %185 = tpu.matmul %182, %184, %cst_81 {dimension_numbers = #tpu.dot_dimension_numbers<[1], [0], [0], [1], [0, 0, 1, 1], [], []>} : vector<64x32xbf16>, vector<32x32xbf16>, vector<64x32xf32> -> vector<64x32xf32>
    %c0_82 = arith.constant 0 : index
    %c0_83 = arith.constant 0 : index
    %c0_84 = arith.constant 0 : index
    %186 = vector.load %arg13[%c0_82, %c0_83, %c0_84] : memref<9x64x1xf32, #tpu.memory_space<vmem>>, vector<1x64x1xf32>
    %187 = vector.shape_cast %186 : vector<1x64x1xf32> to vector<64x1xf32>
    %188 = vector.broadcast %187 : vector<64x1xf32> to vector<64x32xf32>
    %189 = arith.mulf %188, %185 : vector<64x32xf32>
    %190 = arith.addf %180, %189 : vector<64x32xf32>
    %c8_i32 = arith.constant 8 : i32
    %191 = tpu.dynamic_rotate %179 by %c8_i32 dim 0 : vector<64x32xf32>, i32 -> vector<64x32xf32>
    %192 = arith.truncf %191 : vector<64x32xf32> to vector<64x32xbf16>
    %c1_85 = arith.constant 1 : index
    %c0_86 = arith.constant 0 : index
    %c0_87 = arith.constant 0 : index
    %193 = vector.load %arg12[%c1_85, %c0_86, %c0_87] : memref<9x32x32xbf16, #tpu.memory_space<vmem>>, vector<1x32x32xbf16>
    %194 = vector.shape_cast %193 : vector<1x32x32xbf16> to vector<32x32xbf16>
    %cst_88 = arith.constant dense<0.000000e+00> : vector<64x32xf32>
    %195 = tpu.matmul %192, %194, %cst_88 {dimension_numbers = #tpu.dot_dimension_numbers<[1], [0], [0], [1], [0, 0, 1, 1], [], []>} : vector<64x32xbf16>, vector<32x32xbf16>, vector<64x32xf32> -> vector<64x32xf32>
    %c1_89 = arith.constant 1 : index
    %c0_90 = arith.constant 0 : index
    %c0_91 = arith.constant 0 : index
    %196 = vector.load %arg13[%c1_89, %c0_90, %c0_91] : memref<9x64x1xf32, #tpu.memory_space<vmem>>, vector<1x64x1xf32>
    %197 = vector.shape_cast %196 : vector<1x64x1xf32> to vector<64x1xf32>
    %198 = vector.broadcast %197 : vector<64x1xf32> to vector<64x32xf32>
    %199 = arith.mulf %198, %195 : vector<64x32xf32>
    %200 = arith.addf %190, %199 : vector<64x32xf32>
    %c7_i32 = arith.constant 7 : i32
    %201 = tpu.dynamic_rotate %179 by %c7_i32 dim 0 : vector<64x32xf32>, i32 -> vector<64x32xf32>
    %202 = arith.truncf %201 : vector<64x32xf32> to vector<64x32xbf16>
    %c2_92 = arith.constant 2 : index
    %c0_93 = arith.constant 0 : index
    %c0_94 = arith.constant 0 : index
    %203 = vector.load %arg12[%c2_92, %c0_93, %c0_94] : memref<9x32x32xbf16, #tpu.memory_space<vmem>>, vector<1x32x32xbf16>
    %204 = vector.shape_cast %203 : vector<1x32x32xbf16> to vector<32x32xbf16>
    %cst_95 = arith.constant dense<0.000000e+00> : vector<64x32xf32>
    %205 = tpu.matmul %202, %204, %cst_95 {dimension_numbers = #tpu.dot_dimension_numbers<[1], [0], [0], [1], [0, 0, 1, 1], [], []>} : vector<64x32xbf16>, vector<32x32xbf16>, vector<64x32xf32> -> vector<64x32xf32>
    %c2_96 = arith.constant 2 : index
    %c0_97 = arith.constant 0 : index
    %c0_98 = arith.constant 0 : index
    %206 = vector.load %arg13[%c2_96, %c0_97, %c0_98] : memref<9x64x1xf32, #tpu.memory_space<vmem>>, vector<1x64x1xf32>
    %207 = vector.shape_cast %206 : vector<1x64x1xf32> to vector<64x1xf32>
    %208 = vector.broadcast %207 : vector<64x1xf32> to vector<64x32xf32>
    %209 = arith.mulf %208, %205 : vector<64x32xf32>
    %210 = arith.addf %200, %209 : vector<64x32xf32>
    %c1_i32 = arith.constant 1 : i32
    %211 = tpu.dynamic_rotate %179 by %c1_i32 dim 0 : vector<64x32xf32>, i32 -> vector<64x32xf32>
    %212 = arith.truncf %211 : vector<64x32xf32> to vector<64x32xbf16>
    %c3_99 = arith.constant 3 : index
    %c0_100 = arith.constant 0 : index
    %c0_101 = arith.constant 0 : index
    %213 = vector.load %arg12[%c3_99, %c0_100, %c0_101] : memref<9x32x32xbf16, #tpu.memory_space<vmem>>, vector<1x32x32xbf16>
    %214 = vector.shape_cast %213 : vector<1x32x32xbf16> to vector<32x32xbf16>
    %cst_102 = arith.constant dense<0.000000e+00> : vector<64x32xf32>
    %215 = tpu.matmul %212, %214, %cst_102 {dimension_numbers = #tpu.dot_dimension_numbers<[1], [0], [0], [1], [0, 0, 1, 1], [], []>} : vector<64x32xbf16>, vector<32x32xbf16>, vector<64x32xf32> -> vector<64x32xf32>
    %c3_103 = arith.constant 3 : index
    %c0_104 = arith.constant 0 : index
    %c0_105 = arith.constant 0 : index
    %216 = vector.load %arg13[%c3_103, %c0_104, %c0_105] : memref<9x64x1xf32, #tpu.memory_space<vmem>>, vector<1x64x1xf32>
    %217 = vector.shape_cast %216 : vector<1x64x1xf32> to vector<64x1xf32>
    %218 = vector.broadcast %217 : vector<64x1xf32> to vector<64x32xf32>
    %219 = arith.mulf %218, %215 : vector<64x32xf32>
    %220 = arith.addf %210, %219 : vector<64x32xf32>
    %221 = arith.truncf %179 : vector<64x32xf32> to vector<64x32xbf16>
    %c4_106 = arith.constant 4 : index
    %c0_107 = arith.constant 0 : index
    %c0_108 = arith.constant 0 : index
    %222 = vector.load %arg12[%c4_106, %c0_107, %c0_108] : memref<9x32x32xbf16, #tpu.memory_space<vmem>>, vector<1x32x32xbf16>
    %223 = vector.shape_cast %222 : vector<1x32x32xbf16> to vector<32x32xbf16>
    %cst_109 = arith.constant dense<0.000000e+00> : vector<64x32xf32>
    %224 = tpu.matmul %221, %223, %cst_109 {dimension_numbers = #tpu.dot_dimension_numbers<[1], [0], [0], [1], [0, 0, 1, 1], [], []>} : vector<64x32xbf16>, vector<32x32xbf16>, vector<64x32xf32> -> vector<64x32xf32>
    %c4_110 = arith.constant 4 : index
    %c0_111 = arith.constant 0 : index
    %c0_112 = arith.constant 0 : index
    %225 = vector.load %arg13[%c4_110, %c0_111, %c0_112] : memref<9x64x1xf32, #tpu.memory_space<vmem>>, vector<1x64x1xf32>
    %226 = vector.shape_cast %225 : vector<1x64x1xf32> to vector<64x1xf32>
    %227 = vector.broadcast %226 : vector<64x1xf32> to vector<64x32xf32>
    %228 = arith.mulf %227, %224 : vector<64x32xf32>
    %229 = arith.addf %220, %228 : vector<64x32xf32>
    %c63_i32 = arith.constant 63 : i32
    %230 = tpu.dynamic_rotate %179 by %c63_i32 dim 0 : vector<64x32xf32>, i32 -> vector<64x32xf32>
    %231 = arith.truncf %230 : vector<64x32xf32> to vector<64x32xbf16>
    %c5_113 = arith.constant 5 : index
    %c0_114 = arith.constant 0 : index
    %c0_115 = arith.constant 0 : index
    %232 = vector.load %arg12[%c5_113, %c0_114, %c0_115] : memref<9x32x32xbf16, #tpu.memory_space<vmem>>, vector<1x32x32xbf16>
    %233 = vector.shape_cast %232 : vector<1x32x32xbf16> to vector<32x32xbf16>
    %cst_116 = arith.constant dense<0.000000e+00> : vector<64x32xf32>
    %234 = tpu.matmul %231, %233, %cst_116 {dimension_numbers = #tpu.dot_dimension_numbers<[1], [0], [0], [1], [0, 0, 1, 1], [], []>} : vector<64x32xbf16>, vector<32x32xbf16>, vector<64x32xf32> -> vector<64x32xf32>
    %c5_117 = arith.constant 5 : index
    %c0_118 = arith.constant 0 : index
    %c0_119 = arith.constant 0 : index
    %235 = vector.load %arg13[%c5_117, %c0_118, %c0_119] : memref<9x64x1xf32, #tpu.memory_space<vmem>>, vector<1x64x1xf32>
    %236 = vector.shape_cast %235 : vector<1x64x1xf32> to vector<64x1xf32>
    %237 = vector.broadcast %236 : vector<64x1xf32> to vector<64x32xf32>
    %238 = arith.mulf %237, %234 : vector<64x32xf32>
    %239 = arith.addf %229, %238 : vector<64x32xf32>
    %c57_i32 = arith.constant 57 : i32
    %240 = tpu.dynamic_rotate %179 by %c57_i32 dim 0 : vector<64x32xf32>, i32 -> vector<64x32xf32>
    %241 = arith.truncf %240 : vector<64x32xf32> to vector<64x32xbf16>
    %c6_120 = arith.constant 6 : index
    %c0_121 = arith.constant 0 : index
    %c0_122 = arith.constant 0 : index
    %242 = vector.load %arg12[%c6_120, %c0_121, %c0_122] : memref<9x32x32xbf16, #tpu.memory_space<vmem>>, vector<1x32x32xbf16>
    %243 = vector.shape_cast %242 : vector<1x32x32xbf16> to vector<32x32xbf16>
    %cst_123 = arith.constant dense<0.000000e+00> : vector<64x32xf32>
    %244 = tpu.matmul %241, %243, %cst_123 {dimension_numbers = #tpu.dot_dimension_numbers<[1], [0], [0], [1], [0, 0, 1, 1], [], []>} : vector<64x32xbf16>, vector<32x32xbf16>, vector<64x32xf32> -> vector<64x32xf32>
    %c6_124 = arith.constant 6 : index
    %c0_125 = arith.constant 0 : index
    %c0_126 = arith.constant 0 : index
    %245 = vector.load %arg13[%c6_124, %c0_125, %c0_126] : memref<9x64x1xf32, #tpu.memory_space<vmem>>, vector<1x64x1xf32>
    %246 = vector.shape_cast %245 : vector<1x64x1xf32> to vector<64x1xf32>
    %247 = vector.broadcast %246 : vector<64x1xf32> to vector<64x32xf32>
    %248 = arith.mulf %247, %244 : vector<64x32xf32>
    %249 = arith.addf %239, %248 : vector<64x32xf32>
    %c56_i32 = arith.constant 56 : i32
    %250 = tpu.dynamic_rotate %179 by %c56_i32 dim 0 : vector<64x32xf32>, i32 -> vector<64x32xf32>
    %251 = arith.truncf %250 : vector<64x32xf32> to vector<64x32xbf16>
    %c7_127 = arith.constant 7 : index
    %c0_128 = arith.constant 0 : index
    %c0_129 = arith.constant 0 : index
    %252 = vector.load %arg12[%c7_127, %c0_128, %c0_129] : memref<9x32x32xbf16, #tpu.memory_space<vmem>>, vector<1x32x32xbf16>
    %253 = vector.shape_cast %252 : vector<1x32x32xbf16> to vector<32x32xbf16>
    %cst_130 = arith.constant dense<0.000000e+00> : vector<64x32xf32>
    %254 = tpu.matmul %251, %253, %cst_130 {dimension_numbers = #tpu.dot_dimension_numbers<[1], [0], [0], [1], [0, 0, 1, 1], [], []>} : vector<64x32xbf16>, vector<32x32xbf16>, vector<64x32xf32> -> vector<64x32xf32>
    %c7_131 = arith.constant 7 : index
    %c0_132 = arith.constant 0 : index
    %c0_133 = arith.constant 0 : index
    %255 = vector.load %arg13[%c7_131, %c0_132, %c0_133] : memref<9x64x1xf32, #tpu.memory_space<vmem>>, vector<1x64x1xf32>
    %256 = vector.shape_cast %255 : vector<1x64x1xf32> to vector<64x1xf32>
    %257 = vector.broadcast %256 : vector<64x1xf32> to vector<64x32xf32>
    %258 = arith.mulf %257, %254 : vector<64x32xf32>
    %259 = arith.addf %249, %258 : vector<64x32xf32>
    %c55_i32 = arith.constant 55 : i32
    %260 = tpu.dynamic_rotate %179 by %c55_i32 dim 0 : vector<64x32xf32>, i32 -> vector<64x32xf32>
    %261 = arith.truncf %260 : vector<64x32xf32> to vector<64x32xbf16>
    %c8_134 = arith.constant 8 : index
    %c0_135 = arith.constant 0 : index
    %c0_136 = arith.constant 0 : index
    %262 = vector.load %arg12[%c8_134, %c0_135, %c0_136] : memref<9x32x32xbf16, #tpu.memory_space<vmem>>, vector<1x32x32xbf16>
    %263 = vector.shape_cast %262 : vector<1x32x32xbf16> to vector<32x32xbf16>
    %cst_137 = arith.constant dense<0.000000e+00> : vector<64x32xf32>
    %264 = tpu.matmul %261, %263, %cst_137 {dimension_numbers = #tpu.dot_dimension_numbers<[1], [0], [0], [1], [0, 0, 1, 1], [], []>} : vector<64x32xbf16>, vector<32x32xbf16>, vector<64x32xf32> -> vector<64x32xf32>
    %c8_138 = arith.constant 8 : index
    %c0_139 = arith.constant 0 : index
    %c0_140 = arith.constant 0 : index
    %265 = vector.load %arg13[%c8_138, %c0_139, %c0_140] : memref<9x64x1xf32, #tpu.memory_space<vmem>>, vector<1x64x1xf32>
    %266 = vector.shape_cast %265 : vector<1x64x1xf32> to vector<64x1xf32>
    %267 = vector.broadcast %266 : vector<64x1xf32> to vector<64x32xf32>
    %268 = arith.mulf %267, %264 : vector<64x32xf32>
    %269 = arith.addf %259, %268 : vector<64x32xf32>
    %c10 = arith.constant 10 : index
    %c0_141 = arith.constant 0 : index
    %270 = vector.load %arg6[%c10, %c0_141] : memref<16x128xf32, #tpu.memory_space<vmem>>, vector<1x32xf32>
    %c11 = arith.constant 11 : index
    %c0_142 = arith.constant 0 : index
    %271 = vector.load %arg6[%c11, %c0_142] : memref<16x128xf32, #tpu.memory_space<vmem>>, vector<1x32xf32>
    %cst_143 = arith.constant dense<0.000000e+00> : vector<64xf32>
    %272 = vector.multi_reduction <add>, %269, %cst_143 [1] : vector<64x32xf32> to vector<64xf32>
    %273 = vector.shape_cast %272 : vector<64xf32> to vector<64x1xf32>
    %cst_144 = arith.constant 3.200000e+01 : f32
    %274 = vector.broadcast %cst_144 : f32 to vector<64x1xf32>
    %275 = arith.divf %273, %274 : vector<64x1xf32>
    %276 = vector.broadcast %275 : vector<64x1xf32> to vector<64x32xf32>
    %277 = arith.subf %269, %276 : vector<64x32xf32>
    %278 = arith.mulf %277, %277 : vector<64x32xf32>
    %cst_145 = arith.constant dense<0.000000e+00> : vector<64xf32>
    %279 = vector.multi_reduction <add>, %278, %cst_145 [1] : vector<64x32xf32> to vector<64xf32>
    %280 = vector.shape_cast %279 : vector<64xf32> to vector<64x1xf32>
    %cst_146 = arith.constant 3.200000e+01 : f32
    %281 = vector.broadcast %cst_146 : f32 to vector<64x1xf32>
    %282 = arith.divf %280, %281 : vector<64x1xf32>
    %283 = vector.broadcast %275 : vector<64x1xf32> to vector<64x32xf32>
    %284 = arith.subf %269, %283 : vector<64x32xf32>
    %cst_147 = arith.constant 9.99999997E-7 : f32
    %285 = vector.broadcast %cst_147 : f32 to vector<64x1xf32>
    %286 = arith.addf %282, %285 : vector<64x1xf32>
    %287 = math.rsqrt %286 : vector<64x1xf32>
    %288 = vector.broadcast %287 : vector<64x1xf32> to vector<64x32xf32>
    %289 = arith.mulf %284, %288 : vector<64x32xf32>
    %290 = vector.broadcast %270 : vector<1x32xf32> to vector<64x32xf32>
    %291 = arith.mulf %289, %290 : vector<64x32xf32>
    %292 = vector.broadcast %271 : vector<1x32xf32> to vector<64x32xf32>
    %293 = arith.addf %291, %292 : vector<64x32xf32>
    %c0_148 = arith.constant 0 : index
    %c0_149 = arith.constant 0 : index
    %294 = vector.load %arg14[%c0_148, %c0_149] : memref<64x32xf32, #tpu.memory_space<vmem>>, vector<64x32xf32>
    tpu.vector_store %arg14[%c0_148, %c0_149], %293 {strides = array<i32>} : memref<64x32xf32, #tpu.memory_space<vmem>>, vector<64x32xf32>,
    return
  }
}

</mosaic_0001>

<bundles_post_ra>
// kernel: div.5
= control target key start
LH: loop header
LB: loop body
LE: loop exit
PB: predicated region body
PF: predicated region fallthrough
CT: control target
= control target key end

     0   :  { %vm9_vm0 = vcmask 523264   ;;  %s26_s8 = smov 64   ;;  %vm15_vm1 = vcmask 1048064   ;;  %s43_s0 = inlined_call_operand.vmem [shape: f32[3,64], index: 0, kind: input, shape index: {}]   ;;  %s44_s1 = inlined_call_operand.vmem [shape: f32[192], index: 1, kind: output, shape index: {}]  }
   0x1   :  { %v5_v0 = vld [vmem:[%s43_s0] sm:$0xf]  ;;  %s7_s0 = smov 3 }
   0x2   :  { %6 = vst [vmem:[#allocation1] sm:$0xf] %v5_v0 }
   0x9   :  { %v12_v1 = vld [vmem:[#allocation1 + $0x1] sm:$0x1]   ;;  %v8_v2 = vld [vmem:[#allocation1] ss:$2 sm:%s7_s0]  }
   0xa   :  { %13 = vrot.lane.b32.xlu0 %v12_v1, %s26_s8  ;;  %10 = vst.msk [vmem:[#allocation0] sm:$0x3] %vm9_vm0, %v8_v2  }
  0x7c   :  { %v14_v3 = vpop.permute.xlu0 %13  }
  0x7d   :  { %16 = vst.msk [vmem:[#allocation0] sm:$0x1] %vm15_vm1, %v14_v3  }
  0x84   :  { %v21_v4 = vld [vmem:[#allocation0] sm:$0x3] }
  0x85   :  { %24 = vst [vmem:[%s44_s1] sm:$0x3] %v21_v4 }

// kernel: msam_forward.1
= control target key start
LH: loop header
LB: loop body
LE: loop exit
PB: predicated region body
PF: predicated region fallthrough
CT: control target
= control target key end

     0   :  { %19 = vsyncpa [#allocation4], 0  ;;  %s6473_s0 = inlined_call_operand.vmem [shape: s32[2], index: 0, kind: input, shape index: {}]   ;;  %s6474_s1 = inlined_call_operand.vmem [shape: f32[64,192], index: 1, kind: input, shape index: {}]   ;;  %s6475_s2 = inlined_call_operand.vmem [shape: s32[2,64,192], index: 2, kind: input, shape index: {}]   ;;  %s6476_s3 = inlined_call_operand.vmem [shape: f32[1,192], index: 3, kind: input, shape index: {}]   ;;  %s6477_s4 = inlined_call_operand.vmem [shape: f32[192,32], index: 4, kind: input, shape index: {}]   ;;  %s6478_s5 = inlined_call_operand.vmem [shape: f32[64,32], index: 5, kind: input, shape index: {}]   ;;  %s6479_s6 = inlined_call_operand.vmem [shape: f32[16,128], index: 6, kind: input, shape index: {}]   ;;  %s6480_s7 = inlined_call_operand.vmem [shape: bf16[32,96], index: 7, kind: input, shape index: {}]   ;;  %s6481_s8 = inlined_call_operand.vmem [shape: bf16[2,16,32], index: 8, kind: input, shape index: {}]   ;;  %s6482_s9 = inlined_call_operand.vmem [shape: bf16[32,128], index: 9, kind: input, shape index: {}]   ;;  %s6483_s10 = inlined_call_operand.vmem [shape: bf16[128,32], index: 10, kind: input, shape index: {}]   ;;  %s6484_s11 = inlined_call_operand.vmem [shape: bf16[32,32], index: 11, kind: input, shape index: {}]   ;;  %s6485_s12 = inlined_call_operand.vmem [shape: bf16[9,32,32], index: 12, kind: input, shape index: {}]   ;;  %s6486_s13 = inlined_call_operand.vmem [shape: f32[9,64,1], index: 13, kind: input, shape index: {}]   ;;  %s6487_s14 = inlined_call_operand.hbm [shape: f32[64,32], index: 14, kind: output, shape index: {}]  }
   0x1   :  { %20 = vsyncpa [#allocation3], 0  ;;  %s27_s15 = sshll.u32 %s6473_s0, 4  ;;  %s28_s15 = int_to_ptr.vmem [resolvable:$true] %s27_s15 }
   0x2   :  { %s4503_s16 = scalar_lea.vmem %s28_s15, 16  ;;  %p4508_p1 = scmp.lt.s32.totalorder %s28_s15, %s28_s15 }
   0x3   :  { %p4504_p0 = scmp.ne.s32.totalorder %s28_s15, %s4503_s16  ;;  %p4509_p2 = scmp.lt.s32.totalorder %s4503_s16, %s4503_s16 }
   0x5   :  { %p4510_p3 = por %p4509_p2, %p4508_p1 }
   0x7   :  { %p4511_p4 = pnand %p4510_p3, %p4504_p0 }
   0x9   :  { %4514 = shalt.err (!%p4511_p4)
}
   0xa   :  { %s4539_s17 = smov [#allocation2]  }
   0xb   :  { %30 = dma.vmem_to_smem %s28_s15, 16, %s4539_s17, [#allocation4]  }
   0xc   :  { %4535 = dma.done.wait [#allocation4], 16  }
   0xd   :  { %4536 = vsyncadd [#allocation4], 4294967280 }
   0xe   :  { %60 = sfence }
   0xf   :  { %v222_v0 = vld [vmem:[%s6477_s4 + $0x78] sm:$0xff]  ;;  %s62_s20 = sld [smem:[#allocation2]]  ;;  %v165_v1 = vlaneseq  ;;  %v4540_v2 = vmov 0.0   ;;  %v221_v3 = vld [vmem:[%s6477_s4 + $0x70] sm:$0xff]  ;;  %v220_v5 = vld [vmem:[%s6477_s4 + $0x68] sm:$0xff]  ;;  %vm239_vm3 = vcmask 523264  }
  0x10   :  { %264 = vmatprep.subr.mxu0 %v4540_v2  ;;  %s3677_s22 = sld [smem:[#allocation2 + $0x1]]  ;;  %v219_v6 = vld [vmem:[%s6477_s4 + $0x60] sm:$0xff]  ;;  %v218_v9 = vld [vmem:[%s6477_s4 + $0x58] sm:$0xff]  ;;  %v65_v11 = vld [vmem:[%s6475_s2 + $0x8] sm:$0xff]  ;;  %s4542_s0 = smov 80  }
  0x11   :  { %265 = vmatpush1.msra.mxu0 %v222_v0  ;;  %v4635_v4 = vshrl.u32 %v165_v1, 7  ;;  %v3679_v12 = vld [vmem:[%s6475_s2 + $0x88] sm:$0xff]  ;;  %v217_v13 = vld [vmem:[%s6477_s4 + $0x50] sm:$0xff]  ;;  %v4672_v15 = vld [vmem:[%s6476_s3] sm:$0x3]  ;;  %s4543_s21 = smov 112  }
  0x12   :  { %266 = vmatprep.subr.mxu0 %v4540_v2  ;;  %v148_v14 = vld [vmem:[%s6474_s1 + $0x8] sm:$0xff]  ;;  %v215_v19 = vld [vmem:[%s6477_s4 + $0x40] sm:$0xff]  ;;  %v214_v21 = vld [vmem:[%s6477_s4 + $0x38] sm:$0xff]  ;;  %s4545_s23 = smov 48  }
  0x13   :  { %267 = vmatpush1.msra.mxu0 %v221_v3  ;;  %v171_v8 = vsub.s32 1, %v4635_v4  ;;  %v216_v17 = vld [vmem:[%s6477_s4 + $0x48] sm:$0xff]  ;;  %v213_v22 = vld [vmem:[%s6477_s4 + $0x30] sm:$0xff]  ;;  %v67_v24 = vld [vmem:[%s6475_s2 + $0x18] sm:$0xff]  ;;  %v167_v38 = vsub.s32 0, %v4635_v4 }
  0x14   :  { %268 = vmatprep.subr.mxu0 %v4540_v2  ;;  %v212_v23 = vld [vmem:[%s6477_s4 + $0x28] sm:$0xff]  ;;  %v3681_v25 = vld [vmem:[%s6475_s2 + $0x98] sm:$0xff]  ;;  %v211_v26 = vld [vmem:[%s6477_s4 + $0x20] sm:$0xff] }
  0x15   :  { %269 = vmatpush1.msra.mxu0 %v220_v5  ;;  %v4645_v7 = vstv %s62_s20  ;;  %v4675_v16 = vrot.slane %v4672_v15, %v171_v8  ;;  %v69_v27 = vld [vmem:[%s6475_s2 + $0x28] sm:$0xff]  ;;  %v210_v29 = vld [vmem:[%s6477_s4 + $0x18] sm:$0xff]  ;;  %v209_v32 = vld [vmem:[%s6477_s4 + $0x10] sm:$0xff]  ;;  %v4803_v55 = vrot.slane %v4672_v15, %v167_v38  ;;  %s4541_s20 = smov 96  }
  0x16   :  { %270 = vmatprep.subr.mxu0 %v4540_v2  ;;  %v4652_v10 = vstv %s3677_s22  ;;  %vm82_vm0 = vcmp.lt.s32.totalorder %v65_v11, %v4645_v7  ;;  %v3683_v28 = vld [vmem:[%s6475_s2 + $0xa8] sm:$0xff]  ;;  %vm84_vm4 = vcmp.lt.s32.totalorder %v67_v24, %v4645_v7  ;;  %v150_v30 = vld [vmem:[%s6474_s1 + $0x18] sm:$0xff]  ;;  %vm86_vm6 = vcmp.lt.s32.totalorder %v69_v27, %v4645_v7  ;;  %v207_v36 = vld [vmem:[%s6477_s4] sm:$0xff]  ;;  %s4544_s22 = smov 64  }
  0x17   :  { %271 = vmatpush1.msra.mxu0 %v219_v6  ;;  %vm116_vm1 = vcmp.lt.s32.totalorder %v3679_v12, %v4652_v10  ;;  %v176_v18 = vsub.f32 %v148_v14, %v4675_v16  ;;  %vm118_vm5 = vcmp.lt.s32.totalorder %v3681_v25, %v4652_v10  ;;  %v152_v31 = vld [vmem:[%s6474_s1 + $0x28] sm:$0xff]  ;;  %vm120_vm7 = vcmp.lt.s32.totalorder %v3683_v28, %v4652_v10  ;;  %v230_v37 = vld [vmem:[%s6477_s4 + $0xb8] sm:$0xff]  ;;  %v64_v39 = vld [vmem:[%s6475_s2] sm:$0xff] }
  0x18   :  { %272 = vmatprep.subr.mxu0 %v4540_v2  ;;  %vm132_vm2 = vmand %vm82_vm0, %vm116_vm1  ;;  %v178_v33 = vsub.f32 %v150_v30, %v4675_v16  ;;  %v180_v34 = vsub.f32 %v152_v31, %v4675_v16  ;;  %v208_v35 = vld [vmem:[%s6477_s4 + $0x8] sm:$0xff]  ;;  %v3678_v40 = vld [vmem:[%s6475_s2 + $0x80] sm:$0xff]  ;;  %vm81_vm10 = vcmp.lt.s32.totalorder %v64_v39, %v4645_v7 }
  0x19   :  { %273 = vmatpush1.msra.mxu0 %v218_v9  ;;  %v192_v20 = vsel %vm132_vm2, %v176_v18, 0.0  ;;  %vm134_vm8 = vmand %vm84_vm4, %vm118_vm5  ;;  %v229_v43 = vld [vmem:[%s6477_s4 + $0xb0] sm:$0xff]  ;;  %v228_v44 = vld [vmem:[%s6477_s4 + $0xa8] sm:$0xff]  ;;  %vm115_vm11 = vcmp.lt.s32.totalorder %v3678_v40, %v4652_v10 }
  0x1a   :  { %274 = vmatprep.subr.mxu0 %v4540_v2  ;;  %3694 = vmatprep.mubr.msk.f32.mxu0 %vm239_vm3, %v192_v20  ;;  %vm136_vm9 = vmand %vm86_vm6, %vm120_vm7  ;;  %v194_v41 = vsel %vm134_vm8, %v178_v33, 0.0  ;;  %v66_v45 = vld [vmem:[%s6475_s2 + $0x10] sm:$0xff]  ;;  %v227_v47 = vld [vmem:[%s6477_s4 + $0xa0] sm:$0xff] }
  0x1b   :  { %275 = vmatpush1.msra.mxu0 %v217_v13  ;;  %v4753_v42 = vsel %vm136_vm9, %v180_v34, 0.0  ;;  %v3680_v46 = vld [vmem:[%s6475_s2 + $0x90] sm:$0xff]  ;;  %v71_v48 = vld [vmem:[%s6475_s2 + $0x38] sm:$0xff]  ;;  %vm4785_vm12 = vmand %vm81_vm10, %vm115_vm11  ;;  %vm83_vm13 = vcmp.lt.s32.totalorder %v66_v45, %v4645_v7 }
  0x1c   :  { %276 = vmatprep.subr.mxu0 %v4540_v2  ;;  %v3685_v49 = vld [vmem:[%s6475_s2 + $0xb8] sm:$0xff]  ;;  %v225_v52 = vld [vmem:[%s6477_s4 + $0x90] sm:$0xff]  ;;  %vm117_vm14 = vcmp.lt.s32.totalorder %v3680_v46, %v4652_v10  ;;  %v147_v53 = vld [vmem:[%s6474_s1] sm:$0xff]  ;;  %vm88_vm15 = vcmp.lt.s32.totalorder %v71_v48, %v4645_v7 }
  0x1d   :  { %277 = vmatpush1.msra.mxu0 %v216_v17  ;;  %v226_v50 = vld [vmem:[%s6477_s4 + $0x98] sm:$0xff]  ;;  %v224_v54 = vld [vmem:[%s6477_s4 + $0x88] sm:$0xff]  ;;  %vm122_vm0 = vcmp.lt.s32.totalorder %v3685_v49, %v4652_v10  ;;  %vm4807_vm1 = vmand %vm83_vm13, %vm117_vm14  ;;  %v175_v60 = vsub.f32 %v147_v53, %v4803_v55 }
  0x1e   :  { %278 = vmatprep.subr.mxu0 %v4540_v2  ;;  %v223_v57 = vld [vmem:[%s6477_s4 + $0x80] sm:$0xff]  ;;  %v149_v58 = vld [vmem:[%s6474_s1 + $0x10] sm:$0xff]  ;;  %vm4818_vm2 = vmand %vm88_vm15, %vm122_vm0 }
  0x1f   :  { %279 = vmatpush1.msra.mxu0 %v215_v19  ;;  %v68_v61 = vld [vmem:[%s6475_s2 + $0x20] sm:$0xff]  ;;  %v154_v63 = vld [vmem:[%s6474_s1 + $0x38] sm:$0xff]  ;;  %v73_v1 = vld [vmem:[%s6475_s2 + $0x48] sm:$0xff]  ;;  %v177_v5 = vsub.f32 %v149_v58, %v4803_v55 }
  0x20   :  { %280 = vmatprep.subr.mxu0 %v4540_v2  ;;  %v3682_v62 = vld [vmem:[%s6475_s2 + $0xa0] sm:$0xff]  ;;  %v3687_v3 = vld [vmem:[%s6475_s2 + $0xc8] sm:$0xff]  ;;  %v3684_v6 = vld [vmem:[%s6475_s2 + $0xb0] sm:$0xff]  ;;  %vm85_vm4 = vcmp.lt.s32.totalorder %v68_v61, %v4645_v7  ;;  %v182_v8 = vsub.f32 %v154_v63, %v4675_v16  ;;  %vm90_vm7 = vcmp.lt.s32.totalorder %v73_v1, %v4645_v7 }
  0x21   :  { %281 = vmatpush1.msra.mxu0 %v214_v21  ;;  %v151_v0 = vld [vmem:[%s6474_s1 + $0x20] sm:$0xff]  ;;  %vm119_vm5 = vcmp.lt.s32.totalorder %v3682_v62, %v4652_v10  ;;  %v156_v9 = vld [vmem:[%s6474_s1 + $0x48] sm:$0xff]  ;;  %vm124_vm8 = vcmp.lt.s32.totalorder %v3687_v3, %v4652_v10  ;;  %vm121_vm10 = vcmp.lt.s32.totalorder %v3684_v6, %v4652_v10  ;;  %v153_v13 = vld [vmem:[%s6474_s1 + $0x30] sm:$0xff] }
  0x22   :  { %282 = vmatprep.subr.mxu0 %v4540_v2  ;;  %vm4861_vm6 = vmand %vm85_vm4, %vm119_vm5  ;;  %v179_v12 = vsub.f32 %v151_v0, %v4803_v55  ;;  %v75_v14 = vld [vmem:[%s6475_s2 + $0x58] sm:$0xff]  ;;  %v198_v17 = vsel %vm4818_vm2, %v182_v8, 0.0  ;;  %v184_v18 = vsub.f32 %v156_v9, %v4675_v16  ;;  %v72_v19 = vld [vmem:[%s6475_s2 + $0x40] sm:$0xff] }
  0x23   :  { %283 = vmatpush1.msra.mxu0 %v213_v22  ;;  %v3689_v15 = vld [vmem:[%s6475_s2 + $0xd8] sm:$0xff]  ;;  %v3686_v20 = vld [vmem:[%s6475_s2 + $0xc0] sm:$0xff]  ;;  %vm140_vm11 = vmand %vm90_vm7, %vm124_vm8  ;;  %vm92_vm13 = vcmp.lt.s32.totalorder %v75_v14, %v4645_v7  ;;  %vm89_vm15 = vcmp.lt.s32.totalorder %v72_v19, %v4645_v7 }
  0x24   :  { %284 = vmatprep.subr.mxu0 %v4540_v2  ;;  %v158_v21 = vld [vmem:[%s6474_s1 + $0x58] sm:$0xff]  ;;  %vm126_vm14 = vcmp.lt.s32.totalorder %v3689_v15, %v4652_v10  ;;  %vm123_vm0 = vcmp.lt.s32.totalorder %v3686_v20, %v4652_v10  ;;  %v155_v24 = vld [vmem:[%s6474_s1 + $0x40] sm:$0xff]  ;;  %v77_v25 = vld [vmem:[%s6475_s2 + $0x68] sm:$0xff]  ;;  %v200_v27 = vsel %vm140_vm11, %v184_v18, 0.0 }
  0x25   :  { %285 = vmatpush1.msra.mxu0 %v212_v23  ;;  %v181_v23 = vsub.f32 %v153_v13, %v4803_v55  ;;  %v186_v28 = vsub.f32 %v158_v21, %v4675_v16  ;;  %v3688_v30 = vld [vmem:[%s6475_s2 + $0xd0] sm:$0xff]  ;;  %v160_v31 = vld [vmem:[%s6474_s1 + $0x68] sm:$0xff]  ;;  %vm4926_vm2 = vmand %vm89_vm15, %vm123_vm0  ;;  %v183_v33 = vsub.f32 %v155_v24, %v4803_v55  ;;  %vm94_vm4 = vcmp.lt.s32.totalorder %v77_v25, %v4645_v7 }
  0x26   :  { %286 = vmatprep.subr.mxu0 %v4540_v2  ;;  %v157_v34 = vld [vmem:[%s6474_s1 + $0x50] sm:$0xff]  ;;  %vm125_vm7 = vcmp.lt.s32.totalorder %v3688_v30, %v4652_v10  ;;  %v188_v38 = vsub.f32 %v160_v31, %v4675_v16  ;;  %v76_v39 = vld [vmem:[%s6475_s2 + $0x60] sm:$0xff]  ;;  %v234_v63 = vld [vmem:[%s6478_s5 + $0x18] sm:$0xff] }
  0x27   :  { %287 = vmatpush1.msra.mxu0 %v211_v26  ;;  %v3691_v26 = vld [vmem:[%s6475_s2 + $0xe8] sm:$0xff]  ;;  %v3690_v40 = vld [vmem:[%s6475_s2 + $0xe0] sm:$0xff]  ;;  %v78_v46 = vld [vmem:[%s6475_s2 + $0x70] sm:$0xff] }
  0x28   :  { %288 = vmatprep.subr.mxu0 %v4540_v2  ;;  %vm128_vm5 = vcmp.lt.s32.totalorder %v3691_v26, %v4652_v10  ;;  %v161_v49 = vld [vmem:[%s6474_s1 + $0x70] sm:$0xff]  ;;  %vm95_vm0 = vcmp.lt.s32.totalorder %v78_v46, %v4645_v7  ;;  %v231_v51 = vld [vmem:[%s6478_s5] sm:$0xff] }
  0x29   :  { %289 = vmatpush1.msra.mxu0 %v210_v29  ;;  %v74_v29 = vld [vmem:[%s6475_s2 + $0x50] sm:$0xff]  ;;  %vm144_vm8 = vmand %vm94_vm4, %vm128_vm5  ;;  %vm371_vm4 = vcmask 261120   ;;  %vm619_vm5 = vcmask 130048  }
  0x2a   :  { %290 = vmatprep.subr.mxu0 %v4540_v2  ;;  %v233_v58 = vld [vmem:[%s6478_s5 + $0x10] sm:$0xff] }
  0x2b   :  { %291 = vmatpush1.msra.mxu0 %v209_v32  ;;  %v237_v18 = vld [vmem:[%s6478_s5 + $0x30] sm:$0xff] }
  0x2c   :  { %292 = vmatprep.subr.mxu0 %v4540_v2 }
  0x2d   :  { %293 = vmatpush1.msra.mxu0 %v208_v35  ;;  %v79_v35 = vld [vmem:[%s6475_s2 + $0x78] sm:$0xff] }
  0x2e   :  { %294 = vmatprep.subr.mxu0 %v4540_v2 }
  0x2f   :  { %295 = vmatpush1.msra.mxu0 %v207_v36  ;;  %v3693_v36 = vld [vmem:[%s6475_s2 + $0xf8] sm:$0xff] }
  0x30   :  { %312 = vmatprep.subr.mxu0 %v4540_v2 }
  0x31   :  { %313 = vmatpush2.msra.mxu0 %v230_v37 }
  0x32   :  { %314 = vmatprep.subr.mxu0 %v4540_v2 }
  0x33   :  { %315 = vmatpush2.msra.mxu0 %v229_v43  ;;  %v159_v43 = vld [vmem:[%s6474_s1 + $0x60] sm:$0xff] }
  0x34   :  { %316 = vmatprep.subr.mxu0 %v4540_v2  ;;  %v187_v48 = vsub.f32 %v159_v43, %v4803_v55 }
  0x35   :  { %317 = vmatpush2.msra.mxu0 %v228_v44  ;;  %v204_v44 = vsel %vm144_vm8, %v188_v38, 0.0 }
  0x36   :  { %318 = vmatprep.subr.mxu0 %v4540_v2 }
  0x37   :  { %319 = vmatpush2.msra.mxu0 %v227_v47  ;;  %v3692_v47 = vld [vmem:[%s6475_s2 + $0xf0] sm:$0xff] }
  0x38   :  { %320 = vmatprep.subr.mxu0 %v4540_v2 }
  0x39   :  { %321 = vmatpush2.msra.mxu0 %v226_v50  ;;  %v189_v50 = vsub.f32 %v161_v49, %v4803_v55 }
  0x3a   :  { %322 = vmatprep.subr.mxu0 %v4540_v2 }
  0x3b   :  { %323 = vmatpush2.msra.mxu0 %v225_v52 }
  0x3c   :  { %324 = vmatprep.subr.mxu0 %v4540_v2 }
  0x3d   :  { %325 = vmatpush2.msra.mxu0 %v224_v54 }
  0x3e   :  { %326 = vmatprep.subr.mxu0 %v4540_v2  ;;  %v70_v2 = vld [vmem:[%s6475_s2 + $0x30] sm:$0xff] }
  0x3f   :  { %327 = vmatpush2.msra.mxu0 %v223_v57  ;;  %vm87_vm9 = vcmp.lt.s32.totalorder %v70_v2, %v4645_v7  ;;  %v235_v2 = vld [vmem:[%s6478_s5 + $0x20] sm:$0xff] }
  0x40   :  { %3695 = vmatmul.mubr.msk.f32.vlgmr.msra.gmra.mxu0 %vm4785_vm12, %v175_v60  ;;  %vm4895_vm12 = vmand %vm87_vm9, %vm121_vm10  ;;  %vm96_vm9 = vcmp.lt.s32.totalorder %v79_v35, %v4645_v7  ;;  %vm130_vm10 = vcmp.lt.s32.totalorder %v3693_v36, %v4652_v10 }
  0x41   :  { %3696 = vmatprep.mubr.msk.f32.mxu0 %vm239_vm3, %v194_v41  ;;  %v162_v41 = vld [vmem:[%s6474_s1 + $0x78] sm:$0xff] }
  0x42   :  { %v190_v45 = vsub.f32 %v162_v41, %v4675_v16 }
  0x44   :  { %3697 = vmatmul.mubr.msk.f32.gmra.mxu0 %vm4807_vm1, %v177_v5  ;;  %vm142_vm1 = vmand %vm92_vm13, %vm126_vm14  ;;  %vm127_vm13 = vcmp.lt.s32.totalorder %v3690_v40, %v4652_v10 }
  0x45   :  { %3698 = vmatprep.mubr.msk.f32.mxu0 %vm239_vm3, %v4753_v42  ;;  %v202_v37 = vsel %vm142_vm1, %v186_v28, 0.0  ;;  %v185_v42 = vsub.f32 %v157_v34, %v4803_v55  ;;  %vm146_vm14 = vmand %vm96_vm9, %vm130_vm10  ;;  %vm129_vm1 = vcmp.lt.s32.totalorder %v3692_v47, %v4652_v10 }
  0x46   :  { %v206_v16 = vsel %vm146_vm14, %v190_v45, 0.0 }
  0x48   :  { %3699 = vmatmul.mubr.msk.f32.gmra.mxu0 %vm4861_vm6, %v179_v12  ;;  %vm91_vm6 = vcmp.lt.s32.totalorder %v74_v29, %v4645_v7  ;;  %v236_v12 = vld [vmem:[%s6478_s5 + $0x28] sm:$0xff] }
  0x49   :  { %3700 = vmatprep.mubr.msk.f32.mxu0 %vm239_vm3, %v198_v17  ;;  %vm141_vm11 = vmand %vm91_vm6, %vm125_vm7  ;;  %vm2420_vm6 = vcmp.lt.s32.totalorder %v4635_v4, 7 }
  0x4c   :  { %3701 = vmatmul.mubr.msk.f32.gmra.mxu0 %vm4895_vm12, %v181_v23  ;;  %vm93_vm12 = vcmp.lt.s32.totalorder %v76_v39, %v4645_v7  ;;  %v232_v7 = vld [vmem:[%s6478_s5 + $0x8] sm:$0xff]  ;;  %v238_v23 = vld [vmem:[%s6478_s5 + $0x38] sm:$0xff] }
  0x4d   :  { %3702 = vmatprep.mubr.msk.f32.mxu0 %vm239_vm3, %v200_v27  ;;  %vm143_vm15 = vmand %vm93_vm12, %vm127_vm13 }
  0x50   :  { %3703 = vmatmul.mubr.msk.f32.gmra.mxu0 %vm4926_vm2, %v183_v33  ;;  %vm145_vm2 = vmand %vm95_vm0, %vm129_vm1 }
  0x51   :  { %3704 = vmatprep.mubr.msk.f32.mxu0 %vm239_vm3, %v202_v37 }
  0x54   :  { %3705 = vmatmul.mubr.msk.f32.gmra.mxu0 %vm141_vm11, %v185_v42 }
  0x55   :  { %3706 = vmatprep.mubr.msk.f32.mxu0 %vm239_vm3, %v204_v44 }
  0x58   :  { %3707 = vmatmul.mubr.msk.f32.gmra.mxu0 %vm143_vm15, %v187_v48 }
  0x59   :  { %3708 = vmatprep.mubr.msk.f32.mxu0 %vm239_vm3, %v206_v16 }
  0x5c   :  { %3709 = vmatmul.mubr.msk.f32.gmra.mxu0 %vm145_vm2, %v189_v50 }
 0x100   :  { %v330_v52 = vpop.f32.mrf.mxu0 }
 0x101   :  { %v4985_v53 = vadd.f32 %v330_v52, %v231_v51 }
 0x102   :  { %v332_v54 = vpop.f32.mrf.mxu0 }
 0x103   :  { %v372_v10 = vsel %vm371_vm4, %v4985_v53, 0.0 }
 0x104   :  { %v335_v55 = vpop.f32.mrf.mxu0  ;;  %373 = vadd.xlane.f32.xlu0 %v372_v10 }
 0x105   :  { %v4992_v56 = vadd.f32 %v335_v55, %v232_v7 }
 0x106   :  { %v337_v57 = vpop.f32.mrf.mxu0 }
 0x107   :  { %v375_v59 = vsel %vm371_vm4, %v4992_v56, 0.0 }
 0x108   :  { %v340_v60 = vpop.f32.mrf.mxu0  ;;  %376 = vadd.xlane.f32.xlu0 %v375_v59 }
 0x109   :  { %v4999_v61 = vadd.f32 %v340_v60, %v233_v58 }
 0x10a   :  { %v342_v62 = vpop.f32.mrf.mxu0 }
 0x10b   :  { %v378_v0 = vsel %vm371_vm4, %v4999_v61, 0.0 }
 0x10c   :  { %v345_v1 = vpop.f32.mrf.mxu0  ;;  %379 = vadd.xlane.f32.xlu1 %v378_v0 }
 0x10d   :  { %v5006_v3 = vadd.f32 %v345_v1, %v234_v63 }
 0x10e   :  { %v347_v5 = vpop.f32.mrf.mxu0 }
 0x10f   :  { %v381_v6 = vsel %vm371_vm4, %v5006_v3, 0.0 }
 0x110   :  { %v350_v8 = vpop.f32.mrf.mxu0  ;;  %382 = vadd.xlane.f32.xlu1 %v381_v6 }
 0x111   :  { %v5013_v9 = vadd.f32 %v350_v8, %v235_v2  ;;  %v4325_v8 = vld [vmem:[%s6480_s7 + $0x8] sm:$0xff]  }
 0x112   :  { %v352_v11 = vpop.f32.mrf.mxu0  ;;  %4052 = vmatprep.subr.bf16.mxu1 %v4325_v8 }
 0x113   :  { %v384_v13 = vsel %vm371_vm4, %v5013_v9, 0.0  ;;  %4053 = vmatpush3.bf16.msra.mxu1 %v4325_v8  ;;  %v4326_v11 = vld [vmem:[%s6480_s7] sm:$0xff]  }
 0x114   :  { %v355_v14 = vpop.f32.mrf.mxu0  ;;  %385 = vadd.xlane.f32.xlu0 %v384_v13  ;;  %4054 = vmatprep.subr.bf16.mxu1 %v4326_v11 }
 0x115   :  { %v5020_v15 = vadd.f32 %v355_v14, %v236_v12 }
 0x116   :  { %v357_v17 = vpop.f32.mrf.mxu0 }
 0x117   :  { %v387_v19 = vsel %vm371_vm4, %v5020_v15, 0.0  ;;  %4055 = vmatpush3.bf16.msra.mxu1 %v4326_v11 }
 0x118   :  { %v360_v20 = vpop.f32.mrf.mxu0  ;;  %388 = vadd.xlane.f32.xlu1 %v387_v19 }
 0x119   :  { %v5027_v21 = vadd.f32 %v360_v20, %v237_v18 }
 0x11a   :  { %v362_v22 = vpop.f32.mrf.mxu0 }
 0x11b   :  { %v390_v24 = vsel %vm371_vm4, %v5027_v21, 0.0 }
 0x11c   :  { %v365_v25 = vpop.f32.mrf.mxu0  ;;  %391 = vadd.xlane.f32.xlu0 %v390_v24 }
 0x11d   :  { %v5034_v26 = vadd.f32 %v365_v25, %v238_v23 }
 0x11e   :  { %v367_v27 = vpop.f32.mrf.mxu0 }
 0x11f   :  { %v393_v28 = vsel %vm371_vm4, %v5034_v26, 0.0 }
 0x120   :  { %394 = vadd.xlane.f32.xlu1 %v393_v28 }
 0x18d   :  { %v374_v29 = vpop.xlane.xlu0 %373 }
 0x18e   :  { %v397_v30 = vmul.f32 0.03125, %v374_v29 }
 0x190   :  { %v5039_v31 = vsub.f32 %v4985_v53, %v397_v30 }
 0x191   :  { %v377_v32 = vpop.xlane.xlu0 %376 }
 0x192   :  { %v398_v33 = vmul.f32 0.03125, %v377_v32  ;;  %v413_v34 = vmul.f32 %v5039_v31, %v5039_v31 }
 0x194   :  { %v5044_v35 = vsub.f32 %v4992_v56, %v398_v33  ;;  %v421_v36 = vsel %vm371_vm4, %v413_v34, 0.0 }
 0x195   :  { %v380_v37 = vpop.xlane.xlu1 %379  ;;  %422 = vadd.xlane.f32.xlu0 %v421_v36  ;;  %v3710_v36 = vld [vmem:[%s6479_s6 + $0x1] ss:$0 sm:$0xff] }
 0x196   :  { %v399_v38 = vmul.f32 0.03125, %v380_v37  ;;  %v414_v39 = vmul.f32 %v5044_v35, %v5044_v35 }
 0x198   :  { %v5050_v40 = vsub.f32 %v4999_v61, %v399_v38  ;;  %v424_v41 = vsel %vm371_vm4, %v414_v39, 0.0 }
 0x199   :  { %v383_v42 = vpop.xlane.xlu1 %382  ;;  %425 = vadd.xlane.f32.xlu1 %v424_v41 }
 0x19a   :  { %v400_v43 = vmul.f32 0.03125, %v383_v42  ;;  %v415_v44 = vmul.f32 %v5050_v40, %v5050_v40 }
 0x19c   :  { %v5056_v45 = vsub.f32 %v5006_v3, %v400_v43  ;;  %v427_v46 = vsel %vm371_vm4, %v415_v44, 0.0  ;;  %v3711_v44 = vld [vmem:[%s6479_s6 + $0x2] ss:$0 sm:$0xff] }
 0x19d   :  { %428 = vadd.xlane.f32.xlu0 %v427_v46  ;;  %v386_v47 = vpop.xlane.xlu0 %385 }
 0x19e   :  { %v401_v48 = vmul.f32 0.03125, %v386_v47  ;;  %v416_v49 = vmul.f32 %v5056_v45, %v5056_v45 }
 0x1a0   :  { %v5062_v16 = vsub.f32 %v5013_v9, %v401_v48  ;;  %v430_v50 = vsel %vm371_vm4, %v416_v49, 0.0 }
 0x1a1   :  { %v389_v51 = vpop.xlane.xlu1 %388  ;;  %431 = vadd.xlane.f32.xlu1 %v430_v50 }
 0x1a2   :  { %v402_v52 = vmul.f32 0.03125, %v389_v51  ;;  %v417_v54 = vmul.f32 %v5062_v16, %v5062_v16 }
 0x1a4   :  { %v5068_v7 = vsub.f32 %v5020_v15, %v402_v52  ;;  %v433_v10 = vsel %vm371_vm4, %v417_v54, 0.0 }
 0x1a5   :  { %434 = vadd.xlane.f32.xlu0 %v433_v10  ;;  %v392_v55 = vpop.xlane.xlu0 %391 }
 0x1a6   :  { %v403_v57 = vmul.f32 0.03125, %v392_v55  ;;  %v418_v58 = vmul.f32 %v5068_v7, %v5068_v7 }
 0x1a8   :  { %v5074_v59 = vsub.f32 %v5027_v21, %v403_v57  ;;  %v436_v60 = vsel %vm371_vm4, %v418_v58, 0.0 }
 0x1a9   :  { %v395_v62 = vpop.xlane.xlu1 %394  ;;  %437 = vadd.xlane.f32.xlu1 %v436_v60 }
 0x1aa   :  { %v404_v63 = vmul.f32 0.03125, %v395_v62  ;;  %v419_v0 = vmul.f32 %v5074_v59, %v5074_v59 }
 0x1ac   :  { %v5080_v1 = vsub.f32 %v5034_v26, %v404_v63  ;;  %v439_v5 = vsel %vm371_vm4, %v419_v0, 0.0 }
 0x1ad   :  { %440 = vadd.xlane.f32.xlu0 %v439_v5 }
 0x1ae   :  { %v420_v2 = vmul.f32 %v5080_v1, %v5080_v1 }
 0x1b0   :  { %v442_v6 = vsel %vm371_vm4, %v420_v2, 0.0 }
 0x1b1   :  { %443 = vadd.xlane.f32.xlu1 %v442_v6 }
 0x21e   :  { %v423_v12 = vpop.xlane.xlu0 %422 }
 0x21f   :  { %v445_v13 = vmul.f32 0.03125, %v423_v12 }
 0x221   :  { %v453_v14 = vadd.f32 1e-05, %v445_v13 }
 0x222   :  { %v426_v17 = vpop.xlane.xlu1 %425 }
 0x223   :  { %4359 = vrsqrt.f32 %v453_v14  ;;  %v446_v18 = vmul.f32 0.03125, %v426_v17 }
 0x225   :  { %v454_v19 = vadd.f32 1e-05, %v446_v18 }
 0x226   :  { %v429_v20 = vpop.xlane.xlu0 %428 }
 0x227   :  { %4361 = vrsqrt.f32 %v454_v19  ;;  %v447_v22 = vmul.f32 0.03125, %v429_v20 }
 0x229   :  { %v455_v23 = vadd.f32 1e-05, %v447_v22 }
 0x22a   :  { %v432_v24 = vpop.xlane.xlu1 %431 }
 0x22b   :  { %4363 = vrsqrt.f32 %v455_v23  ;;  %v448_v25 = vmul.f32 0.03125, %v432_v24 }
 0x22d   :  { %v456_v27 = vadd.f32 1e-05, %v448_v25 }
 0x22e   :  { %v435_v28 = vpop.xlane.xlu0 %434 }
 0x22f   :  { %4365 = vrsqrt.f32 %v456_v27  ;;  %v449_v29 = vmul.f32 0.03125, %v435_v28 }
 0x230   :  { %v4360_v30 = vpop.eup %4359 }
 0x231   :  { %v457_v32 = vadd.f32 1e-05, %v449_v29  ;;  %v469_v33 = vmul.f32 %v4360_v30, %v5039_v31 }
 0x232   :  { %v438_v34 = vpop.xlane.xlu1 %437 }
 0x233   :  { %4367 = vrsqrt.f32 %v457_v32  ;;  %v450_v37 = vmul.f32 0.03125, %v438_v34  ;;  %v481_v42 = vmul.f32 %v3710_v36, %v469_v33 }
 0x234   :  { %v4362_v38 = vpop.eup %4361 }
 0x235   :  { %v458_v39 = vadd.f32 1e-05, %v450_v37  ;;  %v470_v41 = vmul.f32 %v4362_v38, %v5044_v35  ;;  %v493_v49 = vadd.f32 %v3711_v44, %v481_v42 }
 0x236   :  { %v441_v43 = vpop.xlane.xlu0 %440 }
 0x237   :  { %4369 = vrsqrt.f32 %v458_v39  ;;  %v451_v46 = vmul.f32 0.03125, %v441_v43  ;;  %v482_v31 = vmul.f32 %v3710_v36, %v470_v41 }
 0x238   :  { %v4364_v47 = vpop.eup %4363 }
 0x239   :  { %v459_v48 = vadd.f32 1e-05, %v451_v46  ;;  %v494_v50 = vadd.f32 %v3711_v44, %v482_v31  ;;  %v471_v51 = vmul.f32 %v4364_v47, %v5050_v40 }
 0x23a   :  { %v444_v52 = vpop.xlane.xlu1 %443 }
 0x23b   :  { %4371 = vrsqrt.f32 %v459_v48  ;;  %v452_v54 = vmul.f32 0.03125, %v444_v52  ;;  %v501_v10 = vpack.c.bf16 %v494_v50, %v493_v49  ;;  %v483_v58 = vmul.f32 %v3710_v36, %v471_v51 }
 0x23c   :  { %v4366_v35 = vpop.eup %4365 }
 0x23d   :  { %v460_v55 = vadd.f32 1e-05, %v452_v54  ;;  %4056 = vmatprep.mubr.msk.bf16.mxu1 %vm371_vm4, %v501_v10  ;;  %v472_v57 = vmul.f32 %v4366_v35, %v5056_v45  ;;  %v495_v63 = vadd.f32 %v3711_v44, %v483_v58 }
 0x23f   :  { %4373 = vrsqrt.f32 %v460_v55  ;;  %v484_v60 = vmul.f32 %v3710_v36, %v472_v57 }
 0x240   :  { %v4368_v62 = vpop.eup %4367 }
 0x241   :  { %v496_v0 = vadd.f32 %v3711_v44, %v484_v60  ;;  %v473_v5 = vmul.f32 %v4368_v62, %v5062_v16 }
 0x243   :  { %v502_v2 = vpack.c.bf16 %v496_v0, %v495_v63  ;;  %v485_v8 = vmul.f32 %v3710_v36, %v473_v5 }
 0x244   :  { %v4370_v40 = vpop.eup %4369 }
 0x245   :  { %4057 = vmatmul.mubr.msk.bf16.vlgmr.msra.gmra.mxu1 %vm371_vm4, %v502_v2  ;;  %v474_v6 = vmul.f32 %v4370_v40, %v5068_v7  ;;  %v497_v13 = vadd.f32 %v3711_v44, %v485_v8 }
 0x247   :  { %v486_v11 = vmul.f32 %v3710_v36, %v474_v6 }
 0x248   :  { %v4372_v12 = vpop.eup %4371 }
 0x249   :  { %v498_v14 = vadd.f32 %v3711_v44, %v486_v11  ;;  %v475_v45 = vmul.f32 %v4372_v12, %v5074_v59  ;;  %v3712_v59 = vld [vmem:[%s6479_s6] ss:$0 sm:$0xff] }
 0x24b   :  { %v503_v17 = vpack.c.bf16 %v498_v14, %v497_v13  ;;  %v487_v16 = vmul.f32 %v3710_v36, %v475_v45 }
 0x24c   :  { %v4374_v18 = vpop.eup %4373 }
 0x24d   :  { %4060 = vmatprep.mubr.msk.bf16.mxu1 %vm371_vm4, %v503_v17  ;;  %v476_v19 = vmul.f32 %v4374_v18, %v5080_v1  ;;  %v499_v22 = vadd.f32 %v3711_v44, %v487_v16 }
 0x24f   :  { %v488_v20 = vmul.f32 %v3710_v36, %v476_v19 }
 0x251   :  { %v500_v23 = vadd.f32 %v3711_v44, %v488_v20 }
 0x253   :  { %v504_v24 = vpack.c.bf16 %v500_v23, %v499_v22 }
 0x255   :  { %4061 = vmatmul.mubr.msk.bf16.gmra.mxu1 %vm371_vm4, %v504_v24 }
 0x305   :  { %v4058_v7 = vpop.f32.mrf.mxu1 }
 0x306   :  { %v581_v46 = vadd.f32 %v4058_v7, %v3712_v59 }
 0x307   :  { %v572_v25 = vpop.f32.mrf.mxu1 }
 0x308   :  { %v573_v29 = vadd.f32 %v3712_v59, %v572_v25 }
 0x309   :  { %v4059_v27 = vpop.f32.mrf.mxu1 }
 0x30a   :  { %v584_v43 = vadd.f32 %v4059_v27, %v3712_v59 }
 0x30b   :  { %v575_v28 = vpop.f32.mrf.mxu1 }
 0x30c   :  { %v576_v30 = vadd.f32 %v3712_v59, %v575_v28  ;;  %v5123_v31 = vpack.c.bf16 %v584_v43, %v581_v46 }
 0x30e   :  { %v5113_v32 = vpack.c.bf16 %v576_v30, %v573_v29 }
 0x310   :  { %4072 = vmatprep.mubr.msk.bf16.mxu1 %vm619_vm5, %v5113_v32 }
 0x315   :  { %v4062_v1 = vpop.f32.mrf.mxu1 }
 0x316   :  { %v597_v36 = vadd.f32 %v4062_v1, %v3712_v59 }
 0x317   :  { %v588_v33 = vpop.f32.mrf.mxu1 }
 0x318   :  { %v589_v39 = vadd.f32 %v3712_v59, %v588_v33 }
 0x319   :  { %v4063_v34 = vpop.f32.mrf.mxu1 }
 0x31a   :  { %v600_v37 = vadd.f32 %v4063_v34, %v3712_v59 }
 0x31b   :  { %v591_v38 = vpop.f32.mrf.mxu1 }
 0x31c   :  { %v5117_v41 = vpack.c.bf16 %v600_v37, %v597_v36  ;;  %v592_v42 = vadd.f32 %v3712_v59, %v591_v38 }
 0x31e   :  { %v5119_v44 = vpack.c.bf16 %v592_v42, %v589_v39  ;;  %617 = vrot.lane.b32.xlu0 %v5117_v41, %s4541_s20 }
 0x320   :  { %615 = vrot.lane.b32.xlu1 %v5119_v44, %s4541_s20 }
 0x322   :  { %611 = vrot.lane.b32.xlu0 %v5113_v32, %s4541_s20 }
 0x324   :  { %613 = vrot.lane.b32.xlu1 %v5123_v31, %s4541_s20 }
 0x326   :  { %914 = vrot.lane.b32.xlu0 %v5123_v31, %s4542_s0 }
 0x328   :  { %918 = vrot.lane.b32.xlu1 %v5117_v41, %s4542_s0 }
 0x32a   :  { %904 = vrot.lane.b32.xlu0 %v5113_v32, %s4543_s21 }
 0x32c   :  { %916 = vrot.lane.b32.xlu1 %v5119_v44, %s4542_s0 }
 0x32e   :  { %908 = vrot.lane.b32.xlu0 %v5119_v44, %s4543_s21 }
 0x330   :  { %912 = vrot.lane.b32.xlu1 %v5113_v32, %s4542_s0 }
 0x332   :  { %815 = vrot.lane.b32.xlu0 %v5117_v41, %s4544_s22 }
 0x334   :  { %906 = vrot.lane.b32.xlu1 %v5123_v31, %s4543_s21 }
 0x338   :  { %910 = vrot.lane.b32.xlu1 %v5117_v41, %s4543_s21 }
 0x33c   :  { %813 = vrot.lane.b32.xlu1 %v5119_v44, %s4544_s22 }
 0x390   :  { %v618_v47 = vpop.permute.xlu0 %617 }
 0x391   :  { %4304 = vmatprep.subr.msk.bf16.mxu1 %vm619_vm5, %v618_v47  ;;  %v642_v48 = vsel %vm619_vm5, %v618_v47, 0 }
 0x392   :  { %4065 = vmatpush3.bf16.xpose.msra.mxu1 %v642_v48  ;;  %v616_v49 = vpop.permute.xlu1 %615 }
 0x393   :  { %4305 = vmatprep.subr.msk.bf16.mxu1 %vm619_vm5, %v616_v49  ;;  %v639_v54 = vsel %vm619_vm5, %v616_v49, 0 }
 0x394   :  { %v612_v50 = vpop.permute.xlu0 %611 }
 0x395   :  { %v633_v5 = vsel %vm619_vm5, %v612_v50, 0 }
 0x396   :  { %v614_v51 = vpop.permute.xlu1 %613 }
 0x397   :  { %v636_v58 = vsel %vm619_vm5, %v614_v51, 0 }
 0x398   :  { %v915_v52 = vpop.permute.xlu0 %914 }
 0x399   :  { %v936_v40 = vsel %vm619_vm5, %v915_v52, 0 }
 0x39a   :  { %4067 = vmatpush3.bf16.xpose.msra.mxu1 %v639_v54  ;;  %v919_v10 = vpop.permute.xlu1 %918 }
 0x39b   :  { %4306 = vmatprep.subr.msk.bf16.mxu1 %vm619_vm5, %v614_v51  ;;  %4308 = vmatprep.subr.msk.bf16.mxu0 %vm619_vm5, %v919_v10  ;;  %v942_v35 = vsel %vm619_vm5, %v919_v10, 0 }
 0x39c   :  { %v905_v55 = vpop.permute.xlu0 %904  ;;  %4097 = vmatpush3.bf16.xpose.msra.mxu0 %v942_v35 }
 0x39d   :  { %4104 = vmatprep.mubr.msk.bf16.mxu0 %vm619_vm5, %v905_v55 }
 0x39e   :  { %v917_v57 = vpop.permute.xlu1 %916 }
 0x39f   :  { %4309 = vmatprep.subr.msk.bf16.mxu0 %vm619_vm5, %v917_v57  ;;  %v939_v62 = vsel %vm619_vm5, %v917_v57, 0 }
 0x3a0   :  { %v909_v63 = vpop.permute.xlu0 %908 }
 0x3a2   :  { %4069 = vmatpush3.bf16.xpose.msra.mxu1 %v636_v58  ;;  %v913_v60 = vpop.permute.xlu1 %912 }
 0x3a3   :  { %4307 = vmatprep.subr.msk.bf16.mxu1 %vm619_vm5, %v612_v50  ;;  %v933_v11 = vsel %vm619_vm5, %v913_v60, 0 }
 0x3a4   :  { %4099 = vmatpush3.bf16.xpose.msra.mxu0 %v939_v62  ;;  %v816_v2 = vpop.permute.xlu0 %815 }
 0x3a5   :  { %4310 = vmatprep.subr.msk.bf16.mxu0 %vm619_vm5, %v915_v52 }
 0x3a6   :  { %v907_v0 = vpop.permute.xlu1 %906 }
 0x3aa   :  { %4071 = vmatpush3.bf16.xpose.msra.mxu1 %v633_v5  ;;  %v911_v6 = vpop.permute.xlu1 %910 }
 0x3ab   :  { %4080 = vmatprep.subr.bf16.mxu1 %v816_v2 }
 0x3ac   :  { %4101 = vmatpush3.bf16.xpose.msra.mxu0 %v936_v40 }
 0x3ad   :  { %4311 = vmatprep.subr.msk.bf16.mxu0 %vm619_vm5, %v913_v60 }
 0x3ae   :  { %v814_v8 = vpop.permute.xlu1 %813 }
 0x3b1   :  { %4073 = vmatmul.mubr.msk.bf16.vlgmr.msra.gmra.mxu1 %vm619_vm5, %v5123_v31 }
 0x3b2   :  { %4076 = vmatprep.mubr.msk.bf16.mxu1 %vm619_vm5, %v5119_v44  ;;  %4081 = vmatpush3.bf16.msra.mxu1 %v816_v2 }
 0x3b3   :  { %4082 = vmatprep.subr.bf16.mxu1 %v814_v8 }
 0x3b4   :  { %4103 = vmatpush3.bf16.xpose.msra.mxu0 %v933_v11 }
 0x3b6   :  { %4083 = vmatpush3.bf16.msra.mxu1 %v814_v8 }
 0x3b9   :  { %4077 = vmatmul.mubr.msk.bf16.gmra.mxu1 %vm619_vm5, %v5117_v41 }
 0x3bb   :  { %4105 = vmatmul.mubr.msk.bf16.vlgmr.msra.gmra.mxu0 %vm619_vm5, %v907_v0 }
 0x3bc   :  { %4108 = vmatprep.mubr.msk.bf16.mxu0 %vm619_vm5, %v909_v63 }
 0x3c3   :  { %4109 = vmatmul.mubr.msk.bf16.gmra.mxu0 %vm619_vm5, %v911_v6 }
 0x471   :  { %v4074_v12 = vpop.f32.mrf.mxu1 }
 0x472   :  { %v5165_v13 = vmul.f32 0.25, %v4074_v12 }
 0x473   :  { %v678_v45 = vpop.f32.mrf.mxu1 }
 0x474   :  { %v723_v14 = vsel %vm239_vm3, %v5165_v13, -inf  ;;  %v5171_v20 = vmul.f32 0.25, %v678_v45 }
 0x475   :  { %724 = vmax.xlane.f32.xlu0 %v723_v14  ;;  %v4075_v17 = vpop.f32.mrf.mxu1 }
 0x476   :  { %v717_v59 = vsel %vm239_vm3, %v5171_v20, -inf  ;;  %v5185_v30 = vmul.f32 0.25, %v4075_v17 }
 0x477   :  { %v681_v23 = vpop.f32.mrf.mxu1 }
 0x478   :  { %v5177_v25 = vmul.f32 0.25, %v681_v23  ;;  %v726_v38 = vsel %vm239_vm3, %v5185_v30, -inf }
 0x479   :  { %v4078_v36 = vpop.f32.mrf.mxu1 }
 0x47a   :  { %v720_v34 = vsel %vm239_vm3, %v5177_v25, -inf  ;;  %v5193_v37 = vmul.f32 0.25, %v4078_v36 }
 0x47b   :  { %v4106_v18 = vpop.f32.mrf.mxu0  ;;  %v694_v47 = vpop.f32.mrf.mxu1 }
 0x47c   :  { %v5169_v19 = vmul.f32 0.25, %v4106_v18  ;;  %v735_v46 = vsel %vm239_vm3, %v5193_v37, -inf  ;;  %v5203_v48 = vmul.f32 0.25, %v694_v47 }
 0x47d   :  { %v978_v16 = vpop.f32.mrf.mxu0  ;;  %v4079_v51 = vpop.f32.mrf.mxu1 }
 0x47e   :  { %v1023_v22 = vsel %vm239_vm3, %v5169_v19, -inf  ;;  %v5179_v27 = vmul.f32 0.25, %v978_v16  ;;  %v729_v50 = vsel %vm239_vm3, %v5203_v48, -inf  ;;  %v5213_v54 = vmul.f32 0.25, %v4079_v51 }
 0x47f   :  { %1024 = vmax.xlane.f32.xlu0 %v1023_v22  ;;  %v4107_v24 = vpop.f32.mrf.mxu0  ;;  %v697_v57 = vpop.f32.mrf.mxu1 }
 0x480   :  { %v5175_v7 = vmul.f32 0.25, %v4107_v24  ;;  %v1017_v33 = vsel %vm239_vm3, %v5179_v27, -inf  ;;  %v738_v55 = vsel %vm239_vm3, %v5213_v54, -inf  ;;  %v5219_v58 = vmul.f32 0.25, %v697_v57 }
 0x481   :  { %v981_v29 = vpop.f32.mrf.mxu0 }
 0x482   :  { %v1026_v28 = vsel %vm239_vm3, %v5175_v7, -inf  ;;  %v5187_v1 = vmul.f32 0.25, %v981_v29  ;;  %v732_v0 = vsel %vm239_vm3, %v5219_v58, -inf }
 0x483   :  { %718 = vmax.xlane.f32.xlu0 %v717_v59  ;;  %1027 = vmax.xlane.f32.xlu1 %v1026_v28  ;;  %v4110_v42 = vpop.f32.mrf.mxu0 }
 0x484   :  { %v1020_v39 = vsel %vm239_vm3, %v5187_v1, -inf  ;;  %v5199_v43 = vmul.f32 0.25, %v4110_v42 }
 0x485   :  { %v994_v52 = vpop.f32.mrf.mxu0 }
 0x486   :  { %v1035_v49 = vsel %vm239_vm3, %v5199_v43, -inf  ;;  %v5223_v62 = vmul.f32 0.25, %v994_v52 }
 0x487   :  { %1018 = vmax.xlane.f32.xlu0 %v1017_v33  ;;  %721 = vmax.xlane.f32.xlu1 %v720_v34  ;;  %v4111_v10 = vpop.f32.mrf.mxu0 }
 0x488   :  { %v5215_v35 = vmul.f32 0.25, %v4111_v10  ;;  %v1029_v5 = vsel %vm239_vm3, %v5223_v62, -inf }
 0x489   :  { %v997_v60 = vpop.f32.mrf.mxu0 }
 0x48a   :  { %v5225_v63 = vmul.f32 0.25, %v997_v60 }
 0x48b   :  { %727 = vmax.xlane.f32.xlu0 %v726_v38  ;;  %1021 = vmax.xlane.f32.xlu1 %v1020_v39 }
 0x48c   :  { %v1032_v2 = vsel %vm239_vm3, %v5225_v63, -inf }
 0x48f   :  { %736 = vmax.xlane.f32.xlu0 %v735_v46 }
 0x493   :  { %1036 = vmax.xlane.f32.xlu0 %v1035_v49 }
 0x497   :  { %730 = vmax.xlane.f32.xlu0 %v729_v50 }
 0x49c   :  { %1115 = vrot.lane.b32.xlu1 %v5117_v41, %s4545_s23  ;;  %v1038_v41 = vsel %vm239_vm3, %v5215_v35, -inf }
 0x4ad   :  { %811 = vrot.lane.b32.xlu0 %v5123_v31, %s4544_s22 }
 0x4c0   :  { %739 = vmax.xlane.f32.xlu1 %v738_v55 }
 0x4c4   :  { %1039 = vmax.xlane.f32.xlu1 %v1038_v41 }
 0x4c8   :  { %733 = vmax.xlane.f32.xlu1 %v732_v0 }
 0x4cc   :  { %1030 = vmax.xlane.f32.xlu0 %v1029_v5  ;;  %1033 = vmax.xlane.f32.xlu1 %v1032_v2 }
 0x4dd   :  { %1113 = vrot.lane.b32.xlu1 %v5119_v44, %s4545_s23 }
 0x4e2   :  { %809 = vrot.lane.b32.xlu0 %v5113_v32, %s4544_s22 }
 0x4fe   :  { %v725_v40 = vpop.xlane.xlu0 %724 }
 0x4ff   :  { %v743_v6 = vsub.f32 %v5165_v13, %v725_v40 }
 0x501   :  { %v753_v8 = vmul.f32 1.442695, %v743_v6 }
 0x503   :  { %4375 = vpow2.f32 %v753_v8 }
 0x508   :  { %v1025_v11 = vpop.xlane.xlu0 %1024 }
 0x509   :  { %v1043_v12 = vsub.f32 %v5169_v19, %v1025_v11 }
 0x50b   :  { %v1053_v14 = vmul.f32 1.442695, %v1043_v12 }
 0x50c   :  { %v719_v45 = vpop.xlane.xlu0 %718  ;;  %v1028_v17 = vpop.xlane.xlu1 %1027 }
 0x50d   :  { %4377 = vpow2.f32 %v1053_v14  ;;  %v741_v18 = vsub.f32 %v5171_v20, %v719_v45  ;;  %v1044_v24 = vsub.f32 %v5175_v7, %v1028_v17 }
 0x50f   :  { %v749_v16 = vmul.f32 1.442695, %v741_v18  ;;  %v1055_v20 = vmul.f32 1.442695, %v1044_v24 }
 0x510   :  { %v5240_v22 = vpop.eup %4375  ;;  %v1019_v44 = vpop.xlane.xlu0 %1018 }
 0x511   :  { %4379 = vpow2.f32 %v749_v16  ;;  %v1041_v23 = vsub.f32 %v5179_v27, %v1019_v44  ;;  %v771_v13 = vsel %vm239_vm3, %v5240_v22, 0.0  ;;  %v722_v59 = vpop.xlane.xlu1 %721 }
 0x512   :  { %772 = vadd.xlane.f32.xlu0 %v771_v13  ;;  %v742_v33 = vsub.f32 %v5177_v25, %v722_v59 }
 0x513   :  { %v1049_v19 = vmul.f32 1.442695, %v1041_v23 }
 0x514   :  { %v728_v28 = vpop.xlane.xlu0 %727  ;;  %v751_v7 = vmul.f32 1.442695, %v742_v33 }
 0x515   :  { %4381 = vpow2.f32 %v1049_v19  ;;  %v744_v29 = vsub.f32 %v5185_v30, %v728_v28  ;;  %v1022_v36 = vpop.xlane.xlu1 %1021 }
 0x516   :  { %v1042_v42 = vsub.f32 %v5187_v1, %v1022_v36 }
 0x517   :  { %v755_v34 = vmul.f32 1.442695, %v744_v29 }
 0x518   :  { %v737_v38 = vpop.xlane.xlu0 %736  ;;  %v1051_v50 = vmul.f32 1.442695, %v1042_v42 }
 0x519   :  { %4383 = vpow2.f32 %v755_v34  ;;  %v747_v27 = vsub.f32 %v5193_v37, %v737_v38  ;;  %v5292_v18 = vpop.permute.xlu1 %1115 }
 0x51a   :  { %v5249_v39 = vpop.eup %4377  ;;  %4385 = vpow2.f32 %v1055_v20 }
 0x51b   :  { %v761_v46 = vmul.f32 1.442695, %v747_v27  ;;  %v1071_v47 = vsel %vm239_vm3, %v5249_v39, 0.0 }
 0x51c   :  { %v1037_v30 = vpop.xlane.xlu0 %1036  ;;  %1072 = vadd.xlane.f32.xlu1 %v1071_v47 }
 0x51d   :  { %4387 = vpow2.f32 %v761_v46  ;;  %v1047_v25 = vsub.f32 %v5199_v43, %v1037_v30 }
 0x51e   :  { %v5255_v49 = vpop.eup %4379  ;;  %4389 = vpow2.f32 %v751_v7 }
 0x51f   :  { %v1061_v37 = vmul.f32 1.442695, %v1047_v25  ;;  %v765_v51 = vsel %vm239_vm3, %v5255_v49, 0.0 }
 0x520   :  { %v731_v52 = vpop.xlane.xlu0 %730  ;;  %766 = vadd.xlane.f32.xlu0 %v765_v51 }
 0x521   :  { %4391 = vpow2.f32 %v1061_v37  ;;  %v745_v1 = vsub.f32 %v5203_v48, %v731_v52 }
 0x522   :  { %v5260_v10 = vpop.eup %4381  ;;  %4393 = vpow2.f32 %v1051_v50 }
 0x523   :  { %v757_v55 = vmul.f32 1.442695, %v745_v1  ;;  %v1065_v43 = vsel %vm239_vm3, %v5260_v10, 0.0 }
 0x524   :  { %v812_v57 = vpop.permute.xlu0 %811  ;;  %1066 = vadd.xlane.f32.xlu1 %v1065_v43 }
 0x525   :  { %4395 = vpow2.f32 %v757_v55  ;;  %4084 = vmatprep.subr.bf16.mxu1 %v812_v57 }
 0x526   :  { %v5264_v41 = vpop.eup %4383  ;;  %4085 = vmatpush3.bf16.msra.mxu1 %v812_v57 }
 0x527   :  { %v5266_v60 = vpop.eup %4385  ;;  %v774_v0 = vsel %vm239_vm3, %v5264_v41, 0.0 }
 0x528   :  { %775 = vadd.xlane.f32.xlu1 %v774_v0  ;;  %v1074_v2 = vsel %vm239_vm3, %v5266_v60, 0.0 }
 0x52a   :  { %v5270_v48 = vpop.eup %4387 }
 0x52b   :  { %v783_v5 = vsel %vm239_vm3, %v5270_v48, 0.0  ;;  %v5276_v40 = vpop.eup %4389 }
 0x52c   :  { %784 = vadd.xlane.f32.xlu0 %v783_v5  ;;  %1075 = vadd.xlane.f32.xlu1 %v1074_v2  ;;  %v768_v11 = vsel %vm239_vm3, %v5276_v40, 0.0 }
 0x52e   :  { %v5278_v6 = vpop.eup %4391 }
 0x52f   :  { %v1083_v8 = vsel %vm239_vm3, %v5278_v6, 0.0  ;;  %v5284_v12 = vpop.eup %4393 }
 0x530   :  { %1084 = vadd.xlane.f32.xlu0 %v1083_v8  ;;  %769 = vadd.xlane.f32.xlu1 %v768_v11  ;;  %v1068_v17 = vsel %vm239_vm3, %v5284_v12, 0.0 }
 0x532   :  { %v5286_v14 = vpop.eup %4395 }
 0x533   :  { %v777_v45 = vsel %vm239_vm3, %v5286_v14, 0.0 }
 0x534   :  { %778 = vadd.xlane.f32.xlu0 %v777_v45  ;;  %1069 = vadd.xlane.f32.xlu1 %v1068_v17 }
 0x549   :  { %v740_v16 = vpop.xlane.xlu1 %739 }
 0x54a   :  { %v748_v44 = vsub.f32 %v5213_v54, %v740_v16 }
 0x54c   :  { %v763_v23 = vmul.f32 1.442695, %v748_v44 }
 0x54d   :  { %v1040_v13 = vpop.xlane.xlu1 %1039 }
 0x54e   :  { %4397 = vpow2.f32 %v763_v23  ;;  %v1048_v19 = vsub.f32 %v5215_v35, %v1040_v13 }
 0x550   :  { %v1063_v36 = vmul.f32 1.442695, %v1048_v19 }
 0x551   :  { %v734_v24 = vpop.xlane.xlu1 %733 }
 0x552   :  { %v746_v59 = vsub.f32 %v5219_v58, %v734_v24 }
 0x554   :  { %v759_v28 = vmul.f32 1.442695, %v746_v59 }
 0x555   :  { %v1031_v29 = vpop.xlane.xlu0 %1030  ;;  %v1034_v20 = vpop.xlane.xlu1 %1033 }
 0x556   :  { %4399 = vpow2.f32 %v759_v28  ;;  %v1045_v33 = vsub.f32 %v5223_v62, %v1031_v29  ;;  %v1046_v34 = vsub.f32 %v5225_v63, %v1034_v20 }
 0x558   :  { %v1057_v38 = vmul.f32 1.442695, %v1045_v33  ;;  %v1059_v27 = vmul.f32 1.442695, %v1046_v34 }
 0x559   :  { %v810_v54 = vpop.permute.xlu0 %809  ;;  %v1114_v50 = vpop.permute.xlu1 %1113 }
 0x55a   :  { %4401 = vpow2.f32 %v1057_v38  ;;  %4086 = vmatprep.subr.bf16.mxu1 %v810_v54 }
 0x55b   :  { %v5299_v7 = vpop.eup %4397  ;;  %4403 = vpow2.f32 %v1059_v27  ;;  %4087 = vmatpush3.bf16.msra.mxu1 %v810_v54 }
 0x55c   :  { %4405 = vpow2.f32 %v1063_v36  ;;  %4112 = vmatprep.subr.bf16.mxu1 %v5292_v18  ;;  %v786_v35 = vsel %vm239_vm3, %v5299_v7, 0.0 }
 0x55d   :  { %787 = vadd.xlane.f32.xlu1 %v786_v35 }
 0x563   :  { %v5304_v58 = vpop.eup %4399 }
 0x564   :  { %v780_v62 = vsel %vm239_vm3, %v5304_v58, 0.0 }
 0x565   :  { %781 = vadd.xlane.f32.xlu1 %v780_v62 }
 0x567   :  { %v5308_v63 = vpop.eup %4401 }
 0x568   :  { %v5310_v42 = vpop.eup %4403  ;;  %v1077_v46 = vsel %vm239_vm3, %v5308_v63, 0.0 }
 0x569   :  { %v5314_v47 = vpop.eup %4405  ;;  %1078 = vadd.xlane.f32.xlu0 %v1077_v46  ;;  %v1080_v30 = vsel %vm239_vm3, %v5310_v42, 0.0 }
 0x56a   :  { %1081 = vadd.xlane.f32.xlu1 %v1080_v30  ;;  %v1086_v25 = vsel %vm239_vm3, %v5314_v47, 0.0 }
 0x56d   :  { %1087 = vadd.xlane.f32.xlu0 %v1086_v25 }
 0x57b   :  { %1109 = vrot.lane.b32.xlu1 %v5113_v32, %s4545_s23 }
 0x583   :  { %1111 = vrot.lane.b32.xlu0 %v5123_v31, %s4545_s23 }
 0x59b   :  { %v773_v1 = vpop.xlane.xlu0 %772 }
 0x5a5   :  { %v1073_v37 = vpop.xlane.xlu1 %1072 }
 0x5a9   :  { %v767_v43 = vpop.xlane.xlu0 %766 }
 0x5ad   :  { %v1067_v51 = vpop.xlane.xlu1 %1066 }
 0x5b1   :  { %v776_v52 = vpop.xlane.xlu1 %775 }
 0x5b2   :  { %4407 = vrcp.f32 %v776_v52 }
 0x5b3   :  { %4409 = vrcp.f32 %v767_v43 }
 0x5b4   :  { %4411 = vrcp.f32 %v773_v1 }
 0x5b5   :  { %v1076_v55 = vpop.xlane.xlu1 %1075  ;;  %v785_v44 = vpop.xlane.xlu0 %784 }
 0x5b9   :  { %v770_v57 = vpop.xlane.xlu1 %769  ;;  %v1085_v23 = vpop.xlane.xlu0 %1084 }
 0x5ba   :  { %4413 = vrcp.f32 %v770_v57 }
 0x5bb   :  { %4415 = vrcp.f32 %v1067_v51 }
 0x5bd   :  { %v1070_v13 = vpop.xlane.xlu1 %1069 }
 0x5bf   :  { %v4408_v0 = vpop.eup %4407 }
 0x5c0   :  { %v4410_v5 = vpop.eup %4409  ;;  %v800_v32 = vmul.f32 %v4408_v0, %v5264_v41  ;;  %v779_v41 = vpop.xlane.xlu0 %778 }
 0x5c1   :  { %v4412_v2 = vpop.eup %4411  ;;  %v797_v31 = vmul.f32 %v4410_v5, %v5255_v49  ;;  %4417 = vrcp.f32 %v779_v41 }
 0x5c2   :  { %v799_v45 = vmul.f32 %v4412_v2, %v5240_v22 }
 0x5c4   :  { %v806_v16 = vpack.c.bf16 %v800_v32, %v799_v45 }
 0x5c7   :  { %v4414_v8 = vpop.eup %4413 }
 0x5c8   :  { %v798_v11 = vmul.f32 %v4414_v8, %v5276_v40  ;;  %v4416_v59 = vpop.eup %4415 }
 0x5c9   :  { %v1097_v30 = vmul.f32 %v4416_v59, %v5260_v10 }
 0x5ca   :  { %v805_v17 = vpack.c.bf16 %v798_v11, %v797_v31 }
 0x5cc   :  { %4088 = vmatprep.mubr.msk.bf16.mxu1 %vm239_vm3, %v805_v17 }
 0x5cd   :  { %4089 = vmatmul.mubr.msk.bf16.vlgmr.msra.gmra.mxu1 %vm239_vm3, %v806_v16 }
 0x5ce   :  { %4113 = vmatpush3.bf16.msra.mxu1 %v5292_v18  ;;  %v4418_v19 = vpop.eup %4417 }
 0x5cf   :  { %4114 = vmatprep.subr.bf16.mxu1 %v1114_v50  ;;  %v801_v27 = vmul.f32 %v4418_v19, %v5286_v14 }
 0x5d2   :  { %4115 = vmatpush3.bf16.msra.mxu1 %v1114_v50 }
 0x5e6   :  { %v788_v24 = vpop.xlane.xlu1 %787 }
 0x5e7   :  { %4419 = vrcp.f32 %v788_v24 }
 0x5e8   :  { %4421 = vrcp.f32 %v1070_v13 }
 0x5e9   :  { %4423 = vrcp.f32 %v785_v44 }
 0x5ee   :  { %v782_v22 = vpop.xlane.xlu1 %781 }
 0x5ef   :  { %4425 = vrcp.f32 %v782_v22 }
 0x5f0   :  { %4427 = vrcp.f32 %v1076_v55 }
 0x5f2   :  { %v1079_v49 = vpop.xlane.xlu0 %1078 }
 0x5f3   :  { %v1082_v40 = vpop.xlane.xlu1 %1081  ;;  %4429 = vrcp.f32 %v1079_v49 }
 0x5f4   :  { %4431 = vrcp.f32 %v1082_v40  ;;  %v4420_v28 = vpop.eup %4419 }
 0x5f5   :  { %4433 = vrcp.f32 %v1073_v37  ;;  %v4422_v29 = vpop.eup %4421  ;;  %v804_v38 = vmul.f32 %v4420_v28, %v5299_v7 }
 0x5f6   :  { %v1088_v18 = vpop.xlane.xlu0 %1087  ;;  %v4424_v33 = vpop.eup %4423  ;;  %v1098_v35 = vmul.f32 %v4422_v29, %v5284_v12 }
 0x5f7   :  { %4435 = vrcp.f32 %v1088_v18  ;;  %v1110_v36 = vpop.permute.xlu1 %1109  ;;  %v803_v62 = vmul.f32 %v4424_v33, %v5270_v48 }
 0x5f8   :  { %4437 = vrcp.f32 %v1085_v23  ;;  %v1105_v7 = vpack.c.bf16 %v1098_v35, %v1097_v30  ;;  %v3747_v30 = vld [vmem:[%s6479_s6 + $0x3] ss:$0 sm:$0xff] }
 0x5f9   :  { %v808_v50 = vpack.c.bf16 %v804_v38, %v803_v62 }
 0x5fa   :  { %v1112_v20 = vpop.permute.xlu0 %1111 }
 0x5fb   :  { %4116 = vmatprep.subr.bf16.mxu1 %v1112_v20 }
 0x5fc   :  { %v4426_v34 = vpop.eup %4425  ;;  %4117 = vmatpush3.bf16.msra.mxu1 %v1112_v20 }
 0x5fd   :  { %4118 = vmatprep.subr.bf16.mxu1 %v1110_v36  ;;  %v802_v54 = vmul.f32 %v4426_v34, %v5304_v58  ;;  %v4428_v25 = vpop.eup %4427 }
 0x5fe   :  { %v1100_v12 = vmul.f32 %v4428_v25, %v5266_v60  ;;  %v4327_v60 = vld [vmem:[%s6481_s8] sm:$0xff]  }
 0x5ff   :  { %v807_v46 = vpack.c.bf16 %v802_v54, %v801_v27  ;;  %4138 = vmatprep.subr.bf16.mxu0 %v4327_v60 }
 0x600   :  { %4119 = vmatpush3.bf16.msra.mxu1 %v1110_v36  ;;  %v4430_v37 = vpop.eup %4429  ;;  %4139 = vmatpush3.bf16.msra.mxu0 %v4327_v60 }
 0x601   :  { %4092 = vmatprep.mubr.msk.bf16.mxu1 %vm239_vm3, %v807_v46  ;;  %v4432_v51 = vpop.eup %4431  ;;  %v1101_v48 = vmul.f32 %v4430_v37, %v5308_v63 }
 0x602   :  { %4093 = vmatmul.mubr.msk.bf16.gmra.mxu1 %vm239_vm3, %v808_v50  ;;  %v4434_v14 = vpop.eup %4433  ;;  %v1102_v58 = vmul.f32 %v4432_v51, %v5310_v42 }
 0x603   :  { %4120 = vmatprep.mubr.msk.bf16.mxu1 %vm239_vm3, %v1105_v7  ;;  %v1099_v10 = vmul.f32 %v4434_v14, %v5249_v39  ;;  %v4328_v39 = vld [vmem:[%s6481_s8 + $0x8] sm:$0xff]  }
 0x604   :  { %v4436_v1 = vpop.eup %4435  ;;  %v1107_v55 = vpack.c.bf16 %v1102_v58, %v1101_v48  ;;  %4128 = vmatprep.subr.bf16.mxu1 %v4328_v39 }
 0x605   :  { %v1106_v52 = vpack.c.bf16 %v1100_v12, %v1099_v10  ;;  %v4438_v43 = vpop.eup %4437  ;;  %v1104_v57 = vmul.f32 %v4436_v1, %v5314_v47 }
 0x606   :  { %v1103_v0 = vmul.f32 %v4438_v43, %v5278_v6 }
 0x608   :  { %v1108_v5 = vpack.c.bf16 %v1104_v57, %v1103_v0 }
 0x60a   :  { %4121 = vmatmul.mubr.msk.bf16.vlgmr.msra.gmra.mxu1 %vm239_vm3, %v1106_v52 }
 0x60b   :  { %4124 = vmatprep.mubr.msk.bf16.mxu1 %vm239_vm3, %v1107_v55  ;;  %4129 = vmatpush3.bf16.msra.mxu1 %v4328_v39 }
 0x612   :  { %4125 = vmatmul.mubr.msk.bf16.gmra.mxu1 %vm239_vm3, %v1108_v5  ;;  %vm2079_vm3 = vcmp.lt.s32.totalorder %v4635_v4, 1 }
 0x68d   :  { %v4090_v63 = vpop.f32.mrf.mxu1 }
 0x68f   :  { %v867_v42 = vpop.f32.mrf.mxu1 }
 0x691   :  { %v4091_v47 = vpop.f32.mrf.mxu1 }
 0x692   :  { %v899_v8 = vpack.c.bf16 %v4091_v47, %v4090_v63 }
 0x693   :  { %v870_v2 = vpop.f32.mrf.mxu1 }
 0x694   :  { %v898_v6 = vpack.c.bf16 %v870_v2, %v867_v42 }
 0x696   :  { %4140 = vmatprep.mubr.msk.bf16.mxu0 %vm619_vm5, %v898_v6 }
 0x697   :  { %4141 = vmatmul.mubr.msk.bf16.vlgmr.msra.gmra.mxu0 %vm619_vm5, %v899_v8 }
 0x6c2   :  { %v4094_v32 = vpop.f32.mrf.mxu1 }
 0x6c4   :  { %v883_v31 = vpop.f32.mrf.mxu1 }
 0x6c6   :  { %v4095_v11 = vpop.f32.mrf.mxu1 }
 0x6c7   :  { %v901_v16 = vpack.c.bf16 %v4095_v11, %v4094_v32 }
 0x6c8   :  { %v886_v45 = vpop.f32.mrf.mxu1 }
 0x6c9   :  { %v900_v17 = vpack.c.bf16 %v886_v45, %v883_v31 }
 0x6ca   :  { %v4122_v44 = vpop.f32.mrf.mxu1 }
 0x6cb   :  { %4144 = vmatprep.mubr.msk.bf16.mxu0 %vm619_vm5, %v900_v17 }
 0x6cc   :  { %v1167_v23 = vpop.f32.mrf.mxu1  ;;  %4145 = vmatmul.mubr.msk.bf16.gmra.mxu0 %vm619_vm5, %v901_v16 }
 0x6ce   :  { %v4123_v13 = vpop.f32.mrf.mxu1 }
 0x6cf   :  { %v1199_v22 = vpack.c.bf16 %v4123_v13, %v4122_v44 }
 0x6d0   :  { %v1170_v41 = vpop.f32.mrf.mxu1 }
 0x6d1   :  { %v1198_v24 = vpack.c.bf16 %v1170_v41, %v1167_v23 }
 0x6d2   :  { %v4126_v49 = vpop.f32.mrf.mxu1 }
 0x6d3   :  { %4130 = vmatprep.mubr.msk.bf16.mxu1 %vm619_vm5, %v1198_v24 }
 0x6d4   :  { %v1183_v40 = vpop.f32.mrf.mxu1  ;;  %4131 = vmatmul.mubr.msk.bf16.vlgmr.msra.gmra.mxu1 %vm619_vm5, %v1199_v22 }
 0x6d6   :  { %v4127_v18 = vpop.f32.mrf.mxu1 }
 0x6d7   :  { %v1201_v28 = vpack.c.bf16 %v4127_v18, %v4126_v49 }
 0x6d8   :  { %v1186_v59 = vpop.f32.mrf.mxu1 }
 0x6d9   :  { %v1200_v19 = vpack.c.bf16 %v1186_v59, %v1183_v40 }
 0x6db   :  { %4134 = vmatprep.mubr.msk.bf16.mxu1 %vm619_vm5, %v1200_v19 }
 0x6dc   :  { %4135 = vmatmul.mubr.msk.bf16.gmra.mxu1 %vm619_vm5, %v1201_v28 }
 0x757   :  { %v4142_v29 = vpop.f32.mrf.mxu0 }
 0x759   :  { %v1340_v20 = vpop.f32.mrf.mxu0 }
 0x75b   :  { %v4143_v33 = vpop.f32.mrf.mxu0 }
 0x75d   :  { %v1343_v34 = vpop.f32.mrf.mxu0 }
 0x78c   :  { %v4146_v27 = vpop.f32.mrf.mxu0 }
 0x78e   :  { %v1356_v37 = vpop.f32.mrf.mxu0 }
 0x790   :  { %v4147_v52 = vpop.f32.mrf.mxu0 }
 0x792   :  { %v1359_v39 = vpop.f32.mrf.mxu0 }
 0x794   :  { %v4132_v36 = vpop.f32.mrf.mxu1 }
 0x795   :  { %v1349_v38 = vadd.f32 %v4142_v29, %v4132_v36 }
 0x796   :  { %v1257_v54 = vpop.f32.mrf.mxu1 }
 0x797   :  { %v1341_v35 = vadd.f32 %v1340_v20, %v1257_v54  ;;  %v1373_v62 = vadd.f32 %v1349_v38, %v4999_v61 }
 0x798   :  { %v4133_v46 = vpop.f32.mrf.mxu1 }
 0x799   :  { %v1371_v25 = vadd.f32 %v1341_v35, %v4985_v53  ;;  %v1352_v50 = vadd.f32 %v4143_v33, %v4133_v46  ;;  %v5370_v12 = vadd.f32 %v3747_v30, %v1373_v62 }
 0x79a   :  { %v1260_v7 = vpop.f32.mrf.mxu1 }
 0x79b   :  { %v5368_v51 = vadd.f32 %v3747_v30, %v1371_v25  ;;  %v1344_v14 = vadd.f32 %v1343_v34, %v1260_v7  ;;  %v1374_v58 = vadd.f32 %v1352_v50, %v5006_v3  ;;  %v1400_v0 = vsel %vm371_vm4, %v5370_v12, 0.0 }
 0x79c   :  { %v4136_v48 = vpop.f32.mrf.mxu1 }
 0x79d   :  { %v1372_v61 = vadd.f32 %v1344_v14, %v4992_v56  ;;  %v1394_v10 = vsel %vm371_vm4, %v5368_v51, 0.0  ;;  %v1365_v43 = vadd.f32 %v4146_v27, %v4136_v48  ;;  %v5380_v5 = vadd.f32 %v3747_v30, %v1374_v58 }
 0x79e   :  { %1395 = vadd.xlane.f32.xlu0 %v1394_v10  ;;  %v1273_v1 = vpop.f32.mrf.mxu1 }
 0x79f   :  { %v5376_v53 = vadd.f32 %v3747_v30, %v1372_v61  ;;  %v1357_v55 = vadd.f32 %v1356_v37, %v1273_v1  ;;  %v1377_v47 = vadd.f32 %v1365_v43, %v5027_v21 }
 0x7a0   :  { %v4137_v57 = vpop.f32.mrf.mxu1 }
 0x7a1   :  { %v1375_v3 = vadd.f32 %v1357_v55, %v5013_v9  ;;  %v1368_v60 = vadd.f32 %v4147_v52, %v4137_v57  ;;  %v1397_v56 = vsel %vm371_vm4, %v5376_v53, 0.0  ;;  %v1403_v9 = vsel %vm371_vm4, %v5380_v5, 0.0 }
 0x7a2   :  { %1401 = vadd.xlane.f32.xlu0 %v1400_v0  ;;  %1398 = vadd.xlane.f32.xlu1 %v1397_v56  ;;  %v1276_v63 = vpop.f32.mrf.mxu1  ;;  %v5394_v31 = vadd.f32 %v3747_v30, %v1377_v47  ;;  %v4329_v0 = vld [vmem:[%s6482_s9 + $0x8] sm:$0xff]  }
 0x7a3   :  { %v1360_v42 = vadd.f32 %v1359_v39, %v1276_v63  ;;  %v5386_v2 = vadd.f32 %v3747_v30, %v1375_v3  ;;  %v1378_v6 = vadd.f32 %v1368_v60, %v5034_v26  ;;  %4148 = vmatprep.subr.bf16.mxu1 %v4329_v0  ;;  %v4330_v3 = vld [vmem:[%s6482_s9] sm:$0xff]  }
 0x7a4   :  { %4149 = vmatpush3.bf16.msra.mxu1 %v4329_v0 }
 0x7a5   :  { %v1376_v8 = vadd.f32 %v1360_v42, %v5020_v15  ;;  %v5396_v11 = vadd.f32 %v3747_v30, %v1378_v6  ;;  %v1406_v45 = vsel %vm371_vm4, %v5386_v2, 0.0  ;;  %v1412_v15 = vsel %vm371_vm4, %v5394_v31, 0.0  ;;  %4150 = vmatprep.subr.bf16.mxu1 %v4330_v3 }
 0x7a6   :  { %1404 = vadd.xlane.f32.xlu0 %v1403_v9 }
 0x7a7   :  { %v5392_v32 = vadd.f32 %v3747_v30, %v1376_v8  ;;  %v1415_v26 = vsel %vm371_vm4, %v5396_v11, 0.0 }
 0x7a8   :  { %4151 = vmatpush3.bf16.msra.mxu1 %v4330_v3 }
 0x7a9   :  { %v1409_v21 = vsel %vm371_vm4, %v5392_v32, 0.0 }
 0x7aa   :  { %1407 = vadd.xlane.f32.xlu0 %v1406_v45  ;;  %1410 = vadd.xlane.f32.xlu1 %v1409_v21 }
 0x7ae   :  { %1413 = vadd.xlane.f32.xlu0 %v1412_v15  ;;  %1416 = vadd.xlane.f32.xlu1 %v1415_v26 }
 0x827   :  { %v1396_v17 = vpop.xlane.xlu0 %1395 }
 0x828   :  { %v1418_v16 = vmul.f32 0.03125, %v1396_v17 }
 0x82a   :  { %v5407_v44 = vsub.f32 %v5368_v51, %v1418_v16 }
 0x82b   :  { %v1402_v23 = vpop.xlane.xlu0 %1401  ;;  %v1399_v13 = vpop.xlane.xlu1 %1398 }
 0x82c   :  { %v1420_v41 = vmul.f32 0.03125, %v1402_v23  ;;  %v1419_v24 = vmul.f32 0.03125, %v1399_v13  ;;  %v1434_v22 = vmul.f32 %v5407_v44, %v5407_v44 }
 0x82e   :  { %v5412_v49 = vsub.f32 %v5370_v12, %v1420_v41  ;;  %v5415_v40 = vsub.f32 %v5376_v53, %v1419_v24  ;;  %v1442_v18 = vsel %vm371_vm4, %v1434_v22, 0.0 }
 0x82f   :  { %v1405_v59 = vpop.xlane.xlu0 %1404  ;;  %1443 = vadd.xlane.f32.xlu0 %v1442_v18 }
 0x830   :  { %v1421_v19 = vmul.f32 0.03125, %v1405_v59  ;;  %v1436_v28 = vmul.f32 %v5412_v49, %v5412_v49  ;;  %v1435_v29 = vmul.f32 %v5415_v40, %v5415_v40 }
 0x832   :  { %v5423_v20 = vsub.f32 %v5380_v5, %v1421_v19  ;;  %v1448_v33 = vsel %vm371_vm4, %v1436_v28, 0.0  ;;  %v1445_v34 = vsel %vm371_vm4, %v1435_v29, 0.0 }
 0x833   :  { %1449 = vadd.xlane.f32.xlu0 %v1448_v33  ;;  %v1408_v36 = vpop.xlane.xlu0 %1407  ;;  %1446 = vadd.xlane.f32.xlu1 %v1445_v34  ;;  %v1411_v38 = vpop.xlane.xlu1 %1410  ;;  %v3748_v34 = vld [vmem:[%s6479_s6 + $0x4] ss:$0 sm:$0xff] }
 0x834   :  { %v1422_v27 = vmul.f32 0.03125, %v1408_v36  ;;  %v1423_v54 = vmul.f32 0.03125, %v1411_v38  ;;  %v1437_v35 = vmul.f32 %v5423_v20, %v5423_v20 }
 0x836   :  { %v5430_v62 = vsub.f32 %v5386_v2, %v1422_v27  ;;  %v5433_v46 = vsub.f32 %v5392_v32, %v1423_v54  ;;  %v1451_v30 = vsel %vm371_vm4, %v1437_v35, 0.0 }
 0x837   :  { %v1414_v25 = vpop.xlane.xlu0 %1413  ;;  %1452 = vadd.xlane.f32.xlu1 %v1451_v30  ;;  %v1417_v50 = vpop.xlane.xlu1 %1416  ;;  %v3749_v30 = vld [vmem:[%s6479_s6 + $0x5] ss:$0 sm:$0xff] }
 0x838   :  { %v1424_v37 = vmul.f32 0.03125, %v1414_v25  ;;  %v1425_v7 = vmul.f32 0.03125, %v1417_v50  ;;  %v1438_v14 = vmul.f32 %v5430_v62, %v5430_v62  ;;  %v1439_v48 = vmul.f32 %v5433_v46, %v5433_v46 }
 0x83a   :  { %v5441_v58 = vsub.f32 %v5394_v31, %v1424_v37  ;;  %v5444_v61 = vsub.f32 %v5396_v11, %v1425_v7  ;;  %v1454_v10 = vsel %vm371_vm4, %v1438_v14, 0.0  ;;  %v1457_v52 = vsel %vm371_vm4, %v1439_v48, 0.0 }
 0x83b   :  { %1455 = vadd.xlane.f32.xlu0 %v1454_v10  ;;  %1458 = vadd.xlane.f32.xlu1 %v1457_v52 }
 0x83c   :  { %v1440_v1 = vmul.f32 %v5441_v58, %v5441_v58  ;;  %v1441_v55 = vmul.f32 %v5444_v61, %v5444_v61 }
 0x83e   :  { %v1460_v43 = vsel %vm371_vm4, %v1440_v1, 0.0  ;;  %v1463_v57 = vsel %vm371_vm4, %v1441_v55, 0.0 }
 0x83f   :  { %1461 = vadd.xlane.f32.xlu0 %v1460_v43  ;;  %1464 = vadd.xlane.f32.xlu1 %v1463_v57 }
 0x8b8   :  { %v1444_v60 = vpop.xlane.xlu0 %1443 }
 0x8b9   :  { %v1466_v56 = vmul.f32 0.03125, %v1444_v60 }
 0x8bb   :  { %v1474_v39 = vadd.f32 1e-05, %v1466_v56 }
 0x8bc   :  { %v1450_v63 = vpop.xlane.xlu0 %1449  ;;  %v1447_v42 = vpop.xlane.xlu1 %1446 }
 0x8bd   :  { %4439 = vrsqrt.f32 %v1474_v39  ;;  %v1468_v47 = vmul.f32 0.03125, %v1450_v63  ;;  %v1467_v6 = vmul.f32 0.03125, %v1447_v42 }
 0x8bf   :  { %v1476_v8 = vadd.f32 1e-05, %v1468_v47  ;;  %v1475_v9 = vadd.f32 1e-05, %v1467_v6 }
 0x8c0   :  { %v1453_v45 = vpop.xlane.xlu1 %1452 }
 0x8c1   :  { %4441 = vrsqrt.f32 %v1476_v8  ;;  %v1469_v21 = vmul.f32 0.03125, %v1453_v45  ;;  %v4331_v45 = vld [vmem:[%s6483_s10 + $0x38] sm:$0xff]  }
 0x8c2   :  { %4443 = vrsqrt.f32 %v1475_v9  ;;  %4160 = vmatprep.subr.bf16.mxu0 %v4331_v45 }
 0x8c3   :  { %v1477_v15 = vadd.f32 1e-05, %v1469_v21  ;;  %4161 = vmatpush3.bf16.msra.mxu0 %v4331_v45  ;;  %v4334_v21 = vld [vmem:[%s6483_s10 + $0x20] sm:$0xff]  }
 0x8c4   :  { %v1456_v26 = vpop.xlane.xlu0 %1455  ;;  %v1459_v17 = vpop.xlane.xlu1 %1458 }
 0x8c5   :  { %4445 = vrsqrt.f32 %v1477_v15  ;;  %v1470_v16 = vmul.f32 0.03125, %v1456_v26  ;;  %v1471_v23 = vmul.f32 0.03125, %v1459_v17  ;;  %v4335_v15 = vld [vmem:[%s6483_s10 + $0x18] sm:$0xff]   ;;  %v4336_v26 = vld [vmem:[%s6483_s10 + $0x10] sm:$0xff]   ;;  %v4337_v17 = vld [vmem:[%s6483_s10 + $0x8] sm:$0xff]  }
 0x8c7   :  { %v1478_v13 = vadd.f32 1e-05, %v1470_v16  ;;  %v1479_v41 = vadd.f32 1e-05, %v1471_v23  ;;  %v4338_v16 = vld [vmem:[%s6483_s10] sm:$0xff]   ;;  %v4339_v23 = vld [vmem:[%s6484_s11 + $0x8] sm:$0xff]  }
 0x8c8   :  { %v1462_v24 = vpop.xlane.xlu0 %1461  ;;  %v1465_v22 = vpop.xlane.xlu1 %1464  ;;  %4184 = vmatprep.subr.bf16.mxu1 %v4339_v23 }
 0x8c9   :  { %4447 = vrsqrt.f32 %v1478_v13  ;;  %v1472_v18 = vmul.f32 0.03125, %v1462_v24  ;;  %v1473_v59 = vmul.f32 0.03125, %v1465_v22  ;;  %v3750_v13 = vld [vmem:[%s6479_s6 + $0x6] ss:$0 sm:$0xff] }
 0x8ca   :  { %v4440_v19 = vpop.eup %4439  ;;  %4449 = vrsqrt.f32 %v1479_v41 }
 0x8cb   :  { %v1480_v28 = vadd.f32 1e-05, %v1472_v18  ;;  %v1481_v29 = vadd.f32 1e-05, %v1473_v59  ;;  %v1490_v33 = vmul.f32 %v4440_v19, %v5407_v44 }
 0x8cd   :  { %4451 = vrsqrt.f32 %v1480_v28  ;;  %v1502_v35 = vmul.f32 %v3748_v34, %v1490_v33 }
 0x8ce   :  { %v4442_v36 = vpop.eup %4441  ;;  %4453 = vrsqrt.f32 %v1481_v29 }
 0x8cf   :  { %v4444_v38 = vpop.eup %4443  ;;  %v1492_v27 = vmul.f32 %v4442_v36, %v5412_v49  ;;  %v1514_v7 = vadd.f32 %v3749_v30, %v1502_v35 }
 0x8d0   :  { %v1491_v54 = vmul.f32 %v4444_v38, %v5415_v40 }
 0x8d1   :  { %v1504_v44 = vmul.f32 %v3748_v34, %v1492_v27 }
 0x8d2   :  { %v4446_v25 = vpop.eup %4445  ;;  %v1503_v50 = vmul.f32 %v3748_v34, %v1491_v54 }
 0x8d3   :  { %v1493_v37 = vmul.f32 %v4446_v25, %v5423_v20  ;;  %v1516_v55 = vadd.f32 %v3749_v30, %v1504_v44 }
 0x8d4   :  { %v1515_v14 = vadd.f32 %v3749_v30, %v1503_v50 }
 0x8d5   :  { %v1505_v48 = vmul.f32 %v3748_v34, %v1493_v37 }
 0x8d6   :  { %v4448_v10 = vpop.eup %4447  ;;  %v1522_v52 = vpack.c.bf16 %v1515_v14, %v1514_v7 }
 0x8d7   :  { %v4450_v1 = vpop.eup %4449  ;;  %v1517_v49 = vadd.f32 %v3749_v30, %v1505_v48  ;;  %v1494_v40 = vmul.f32 %v4448_v10, %v5430_v62 }
 0x8d8   :  { %4152 = vmatprep.mubr.msk.bf16.mxu1 %vm371_vm4, %v1522_v52  ;;  %v1495_v43 = vmul.f32 %v4450_v1, %v5433_v46 }
 0x8d9   :  { %v1523_v57 = vpack.c.bf16 %v1517_v49, %v1516_v55  ;;  %v1506_v0 = vmul.f32 %v3748_v34, %v1494_v40 }
 0x8da   :  { %v4452_v3 = vpop.eup %4451  ;;  %v1507_v60 = vmul.f32 %v3748_v34, %v1495_v43 }
 0x8db   :  { %v4454_v56 = vpop.eup %4453  ;;  %4153 = vmatmul.mubr.msk.bf16.vlgmr.msra.gmra.mxu1 %vm371_vm4, %v1523_v57  ;;  %v1518_v20 = vadd.f32 %v3749_v30, %v1506_v0  ;;  %v1496_v39 = vmul.f32 %v4452_v3, %v5441_v58  ;;  %v4332_v58 = vld [vmem:[%s6483_s10 + $0x30] sm:$0xff]  }
 0x8dc   :  { %v1519_v63 = vadd.f32 %v3749_v30, %v1507_v60  ;;  %v1497_v42 = vmul.f32 %v4454_v56, %v5444_v61  ;;  %4162 = vmatprep.subr.bf16.mxu0 %v4332_v58  ;;  %v4333_v61 = vld [vmem:[%s6483_s10 + $0x28] sm:$0xff]   ;;  %4185 = vmatpush3.bf16.msra.mxu1 %v4339_v23 }
 0x8dd   :  { %v1508_v47 = vmul.f32 %v3748_v34, %v1496_v39  ;;  %4163 = vmatpush3.bf16.msra.mxu0 %v4332_v58 }
 0x8de   :  { %v1524_v6 = vpack.c.bf16 %v1519_v63, %v1518_v20  ;;  %v1509_v62 = vmul.f32 %v3748_v34, %v1497_v42  ;;  %4164 = vmatprep.subr.bf16.mxu0 %v4333_v61 }
 0x8df   :  { %v1520_v8 = vadd.f32 %v3749_v30, %v1508_v47 }
 0x8e0   :  { %4156 = vmatprep.mubr.msk.bf16.mxu1 %vm371_vm4, %v1524_v6  ;;  %v1521_v46 = vadd.f32 %v3749_v30, %v1509_v62 }
 0x8e1   :  { %4165 = vmatpush3.bf16.msra.mxu0 %v4333_v61 }
 0x8e2   :  { %v1525_v9 = vpack.c.bf16 %v1521_v46, %v1520_v8  ;;  %4166 = vmatprep.subr.bf16.mxu0 %v4334_v21 }
 0x8e4   :  { %4157 = vmatmul.mubr.msk.bf16.gmra.mxu1 %vm371_vm4, %v1525_v9 }
 0x8e5   :  { %4167 = vmatpush3.bf16.msra.mxu0 %v4334_v21 }
 0x8e6   :  { %4168 = vmatprep.subr.bf16.mxu0 %v4335_v15 }
 0x8e9   :  { %4169 = vmatpush3.bf16.msra.mxu0 %v4335_v15 }
 0x8ea   :  { %4170 = vmatprep.subr.bf16.mxu0 %v4336_v26 }
 0x8ed   :  { %4171 = vmatpush3.bf16.msra.mxu0 %v4336_v26 }
 0x8ee   :  { %4172 = vmatprep.subr.bf16.mxu0 %v4337_v17 }
 0x8f1   :  { %4173 = vmatpush3.bf16.msra.mxu0 %v4337_v17 }
 0x8f2   :  { %4174 = vmatprep.subr.bf16.mxu0 %v4338_v16 }
 0x8f5   :  { %4175 = vmatpush3.bf16.msra.mxu0 %v4338_v16 }
 0x99b   :  { %v4154_v41 = vpop.f32.mrf.mxu1 }
 0x99c   :  { %v5508_v24 = vadd.f32 %v4154_v41, %v3750_v13 }
 0x99d   :  { %v1593_v22 = vpop.f32.mrf.mxu1 }
 0x99e   :  { %v1626_v18 = vmul.f32 %v5508_v24, %v5508_v24  ;;  %v5512_v59 = vadd.f32 %v3750_v13, %v1593_v22 }
 0x99f   :  { %v4155_v19 = vpop.f32.mrf.mxu1 }
 0x9a0   :  { %v1634_v28 = vmul.f32 %v1626_v18, %v5508_v24  ;;  %v1624_v29 = vmul.f32 %v5512_v59, %v5512_v59  ;;  %v5517_v33 = vadd.f32 %v4155_v19, %v3750_v13 }
 0x9a1   :  { %v1596_v34 = vpop.f32.mrf.mxu1 }
 0x9a2   :  { %v1642_v36 = vmul.f32 0.044715, %v1634_v28  ;;  %v1632_v38 = vmul.f32 %v1624_v29, %v5512_v59  ;;  %v1627_v27 = vmul.f32 %v5517_v33, %v5517_v33  ;;  %v5522_v54 = vadd.f32 %v3750_v13, %v1596_v34 }
 0x9a4   :  { %v1650_v35 = vadd.f32 %v1642_v36, %v5508_v24  ;;  %v1640_v30 = vmul.f32 0.044715, %v1632_v38  ;;  %v1635_v25 = vmul.f32 %v1627_v27, %v5517_v33  ;;  %v1625_v50 = vmul.f32 %v5522_v54, %v5522_v54  ;;  %v4158_v44 = vpop.f32.mrf.mxu1 }
 0x9a5   :  { %v5528_v37 = vadd.f32 %v4158_v44, %v3750_v13 }
 0x9a6   :  { %v1658_v7 = vmul.f32 0.7978846, %v1650_v35  ;;  %v1648_v14 = vadd.f32 %v1640_v30, %v5512_v59  ;;  %v1643_v48 = vmul.f32 0.044715, %v1635_v25  ;;  %v1633_v10 = vmul.f32 %v1625_v50, %v5522_v54  ;;  %v1609_v52 = vpop.f32.mrf.mxu1 }
 0x9a7   :  { %v1630_v1 = vmul.f32 %v5528_v37, %v5528_v37  ;;  %v5534_v55 = vadd.f32 %v3750_v13, %v1609_v52 }
 0x9a8   :  { %v1656_v49 = vmul.f32 0.7978846, %v1648_v14  ;;  %v1651_v40 = vadd.f32 %v1643_v48, %v5517_v33  ;;  %v1641_v43 = vmul.f32 0.044715, %v1633_v10  ;;  %v4159_v57 = vpop.f32.mrf.mxu1  ;;  %4455 = vtanh.f32 %v1658_v7 }
 0x9a9   :  { %v1638_v0 = vmul.f32 %v1630_v1, %v5528_v37  ;;  %v1628_v3 = vmul.f32 %v5534_v55, %v5534_v55  ;;  %v1621_v60 = vadd.f32 %v4159_v57, %v3750_v13 }
 0x9aa   :  { %4457 = vtanh.f32 %v1656_v49  ;;  %v1659_v56 = vmul.f32 0.7978846, %v1651_v40  ;;  %v1649_v20 = vadd.f32 %v1641_v43, %v5522_v54  ;;  %v1612_v39 = vpop.f32.mrf.mxu1 }
 0x9ab   :  { %v1646_v63 = vmul.f32 0.044715, %v1638_v0  ;;  %v1636_v42 = vmul.f32 %v1628_v3, %v5534_v55  ;;  %v1631_v47 = vmul.f32 %v1621_v60, %v1621_v60  ;;  %v1613_v6 = vadd.f32 %v3750_v13, %v1612_v39 }
 0x9ac   :  { %4459 = vtanh.f32 %v1659_v56  ;;  %v1657_v62 = vmul.f32 0.7978846, %v1649_v20 }
 0x9ad   :  { %v1654_v8 = vadd.f32 %v1646_v63, %v5528_v37  ;;  %v1644_v46 = vmul.f32 0.044715, %v1636_v42  ;;  %v1639_v9 = vmul.f32 %v1631_v47, %v1621_v60  ;;  %v1629_v45 = vmul.f32 %v1613_v6, %v1613_v6 }
 0x9ae   :  { %4461 = vtanh.f32 %v1657_v62  ;;  %v4340_v62 = vld [vmem:[%s6484_s11] sm:$0xff]  }
 0x9af   :  { %v1662_v58 = vmul.f32 0.7978846, %v1654_v8  ;;  %v1652_v61 = vadd.f32 %v1644_v46, %v5534_v55  ;;  %v1647_v21 = vmul.f32 0.044715, %v1639_v9  ;;  %v1637_v15 = vmul.f32 %v1629_v45, %v1613_v6  ;;  %4186 = vmatprep.subr.bf16.mxu1 %v4340_v62 }
 0x9b0   :  { %4187 = vmatpush3.bf16.msra.mxu1 %v4340_v62 }
 0x9b1   :  { %v1660_v26 = vmul.f32 0.7978846, %v1652_v61  ;;  %v1655_v17 = vadd.f32 %v1647_v21, %v1621_v60  ;;  %v1645_v16 = vmul.f32 0.044715, %v1637_v15  ;;  %4463 = vtanh.f32 %v1662_v58 }
 0x9b3   :  { %4465 = vtanh.f32 %v1660_v26  ;;  %v1663_v23 = vmul.f32 0.7978846, %v1655_v17  ;;  %v1653_v13 = vadd.f32 %v1645_v16, %v1613_v6 }
 0x9b5   :  { %4467 = vtanh.f32 %v1663_v23  ;;  %v1661_v41 = vmul.f32 0.7978846, %v1653_v13  ;;  %v4456_v22 = vpop.eup %4455 }
 0x9b6   :  { %v1674_v29 = vadd.f32 1.0, %v4456_v22 }
 0x9b7   :  { %v4458_v18 = vpop.eup %4457  ;;  %4469 = vtanh.f32 %v1661_v41 }
 0x9b8   :  { %v1672_v19 = vadd.f32 1.0, %v4458_v18  ;;  %v1682_v30 = vmul.f32 0.5, %v1674_v29 }
 0x9b9   :  { %v4460_v28 = vpop.eup %4459 }
 0x9ba   :  { %v1675_v34 = vadd.f32 1.0, %v4460_v28  ;;  %v1680_v35 = vmul.f32 0.5, %v1672_v19  ;;  %v1690_v10 = vmul.f32 %v1682_v30, %v5508_v24 }
 0x9bb   :  { %v4462_v36 = vpop.eup %4461 }
 0x9bc   :  { %v1683_v38 = vmul.f32 0.5, %v1675_v34  ;;  %v1673_v27 = vadd.f32 1.0, %v4462_v36  ;;  %v1688_v14 = vmul.f32 %v1680_v35, %v5512_v59 }
 0x9be   :  { %v1681_v25 = vmul.f32 0.5, %v1673_v27  ;;  %v4464_v50 = vpop.eup %4463  ;;  %v1691_v44 = vmul.f32 %v1683_v38, %v5517_v33 }
 0x9bf   :  { %v1678_v40 = vadd.f32 1.0, %v4464_v50 }
 0x9c0   :  { %v4466_v7 = vpop.eup %4465  ;;  %v1689_v48 = vmul.f32 %v1681_v25, %v5522_v54  ;;  %v1697_v43 = vpack.c.bf16 %v1691_v44, %v1690_v10 }
 0x9c1   :  { %v1676_v52 = vadd.f32 1.0, %v4466_v7  ;;  %v1686_v33 = vmul.f32 0.5, %v1678_v40 }
 0x9c2   :  { %v4468_v1 = vpop.eup %4467  ;;  %v1696_v49 = vpack.c.bf16 %v1689_v48, %v1688_v14 }
 0x9c3   :  { %v1679_v57 = vadd.f32 1.0, %v4468_v1  ;;  %v1684_v56 = vmul.f32 0.5, %v1676_v52  ;;  %v1694_v24 = vmul.f32 %v1686_v33, %v5528_v37  ;;  %v4546_v1 = vmov 0  }
 0x9c4   :  { %v4470_v0 = vpop.eup %4469  ;;  %4176 = vmatprep.mubr.bf16.mxu0 %v1696_v49  ;;  %4324 = vset.pattern.permute.xlu1 %v4546_v1 }
 0x9c5   :  { %4177 = vmatmul.mubr.bf16.vlgmr.msra.gmra.mxu0 %v1697_v43  ;;  %v1677_v3 = vadd.f32 1.0, %v4470_v0  ;;  %v1687_v20 = vmul.f32 0.5, %v1679_v57  ;;  %v1692_v59 = vmul.f32 %v1684_v56, %v5534_v55  ;;  %4323 = vset.pattern.permute.xlu0 %v4546_v1  ;;  %v3813_v1 = vld [vmem:[%s6486_s13 + $0xa8] sm:$0xff] }
 0x9c7   :  { %v1685_v39 = vmul.f32 0.5, %v1677_v3  ;;  %v1695_v63 = vmul.f32 %v1687_v20, %v1621_v60  ;;  %v3757_v60 = vld [vmem:[%s6479_s6 + $0x7] ss:$0 sm:$0xff] }
 0x9c9   :  { %v1693_v54 = vmul.f32 %v1685_v39, %v1613_v6  ;;  %v1699_v47 = vpack.c.bf16 %v1695_v63, %v1694_v24 }
 0x9cb   :  { %v1698_v42 = vpack.c.bf16 %v1693_v54, %v1692_v59 }
 0x9cd   :  { %4180 = vmatprep.mubr.bf16.mxu0 %v1698_v42 }
 0x9ce   :  { %4181 = vmatmul.mubr.bf16.gmra.mxu0 %v1699_v47 }
 0xa85   :  { %v4178_v8 = vpop.f32.mrf.mxu0 }
 0xa86   :  { %v1812_v37 = vadd.f32 %v4178_v8, %v3757_v60 }
 0xa87   :  { %v1803_v46 = vpop.f32.mrf.mxu0 }
 0xa88   :  { %v1804_v6 = vadd.f32 %v3757_v60, %v1803_v46  ;;  %v1836_v17 = vadd.f32 %v1812_v37, %v5370_v12 }
 0xa89   :  { %v4179_v55 = vpop.f32.mrf.mxu0 }
 0xa8a   :  { %v1815_v9 = vadd.f32 %v4179_v55, %v3757_v60  ;;  %v1834_v21 = vadd.f32 %v1804_v6, %v5368_v51 }
 0xa8b   :  { %v1806_v45 = vpop.f32.mrf.mxu0 }
 0xa8c   :  { %v1807_v58 = vadd.f32 %v3757_v60, %v1806_v45  ;;  %v1837_v61 = vadd.f32 %v1815_v9, %v5380_v5 }
 0xa8e   :  { %v1835_v15 = vadd.f32 %v1807_v58, %v5376_v53  ;;  %v4182_v26 = vpop.f32.mrf.mxu0  ;;  %v1843_v13 = vpack.c.bf16 %v1837_v61, %v1836_v17 }
 0xa8f   :  { %v1828_v19 = vadd.f32 %v4182_v26, %v3757_v60 }
 0xa90   :  { %v1842_v16 = vpack.c.bf16 %v1835_v15, %v1834_v21  ;;  %v1819_v23 = vpop.f32.mrf.mxu0 }
 0xa91   :  { %v1820_v22 = vadd.f32 %v3757_v60, %v1819_v23  ;;  %v1840_v12 = vadd.f32 %v1828_v19, %v5394_v31 }
 0xa92   :  { %v4183_v41 = vpop.f32.mrf.mxu0  ;;  %4188 = vmatprep.mubr.msk.bf16.mxu1 %vm371_vm4, %v1842_v16 }
 0xa93   :  { %v1831_v18 = vadd.f32 %v4183_v41, %v3757_v60  ;;  %4189 = vmatmul.mubr.msk.bf16.vlgmr.msra.gmra.mxu1 %vm371_vm4, %v1843_v13  ;;  %v1838_v53 = vadd.f32 %v1820_v22, %v5386_v2 }
 0xa94   :  { %v1822_v28 = vpop.f32.mrf.mxu0 }
 0xa95   :  { %v1823_v5 = vadd.f32 %v3757_v60, %v1822_v28  ;;  %v1841_v51 = vadd.f32 %v1831_v18, %v5396_v11 }
 0xa97   :  { %v1839_v29 = vadd.f32 %v1823_v5, %v5392_v32  ;;  %v1845_v36 = vpack.c.bf16 %v1841_v51, %v1840_v12  ;;  %v2186_v51 = vld [vmem:[%s6486_s13 + $0x8] sm:$0xff]  ;;  %v2188_v12 = vld [vmem:[%s6486_s13 + $0x18] sm:$0xff] }
 0xa99   :  { %v1844_v34 = vpack.c.bf16 %v1839_v29, %v1838_v53  ;;  %v2187_v53 = vld [vmem:[%s6486_s13 + $0x10] sm:$0xff]  ;;  %v2185_v29 = vld [vmem:[%s6486_s13] sm:$0xff] }
 0xa9b   :  { %4192 = vmatprep.mubr.msk.bf16.mxu1 %vm371_vm4, %v1844_v34  ;;  %v3791_v34 = vld [vmem:[%s6486_s13 + $0x48] sm:$0xff] }
 0xa9c   :  { %4193 = vmatmul.mubr.msk.bf16.gmra.mxu1 %vm371_vm4, %v1845_v36  ;;  %v4342_v36 = vld [vmem:[%s6485_s12 + $0x18] sm:$0xff]  }
 0xa9d   :  { %4208 = vmatprep.subr.bf16.mxu0 %v4342_v36 }
 0xa9e   :  { %4209 = vmatpush3.bf16.msra.mxu0 %v4342_v36  ;;  %v3899_v36 = vld [vmem:[%s6486_s13 + $0x1c8] sm:$0xff] }
 0xb53   :  { %v4190_v38 = vpop.f32.mrf.mxu1 }
 0xb54   :  { %v1947_v14 = vsel %vm371_vm4, %v4190_v38, 0.0 }
 0xb55   :  { %v1908_v27 = vpop.f32.mrf.mxu1 }
 0xb56   :  { %v1941_v35 = vsel %vm371_vm4, %v1908_v27, 0.0 }
 0xb57   :  { %1942 = vadd.xlane.f32.xlu0 %v1941_v35  ;;  %v4191_v30 = vpop.f32.mrf.mxu1  ;;  %v3793_v35 = vld [vmem:[%s6486_s13 + $0x58] sm:$0xff] }
 0xb58   :  { %v1950_v7 = vsel %vm371_vm4, %v4191_v30, 0.0 }
 0xb59   :  { %v1911_v25 = vpop.f32.mrf.mxu1 }
 0xb5a   :  { %v1944_v31 = vsel %vm371_vm4, %v1911_v25, 0.0 }
 0xb5c   :  { %v4194_v11 = vpop.f32.mrf.mxu1 }
 0xb5d   :  { %v1959_v2 = vsel %vm371_vm4, %v4194_v11, 0.0 }
 0xb5e   :  { %1960 = vadd.xlane.f32.xlu1 %v1959_v2  ;;  %v1924_v32 = vpop.f32.mrf.mxu1  ;;  %v3795_v2 = vld [vmem:[%s6486_s13 + $0x68] sm:$0xff] }
 0xb5f   :  { %v1953_v10 = vsel %vm371_vm4, %v1924_v32, 0.0 }
 0xb60   :  { %v4195_v50 = vpop.f32.mrf.mxu1 }
 0xb61   :  { %v1962_v44 = vsel %vm371_vm4, %v4195_v50, 0.0 }
 0xb62   :  { %1945 = vadd.xlane.f32.xlu1 %v1944_v31  ;;  %1963 = vadd.xlane.f32.xlu0 %v1962_v44  ;;  %v1927_v48 = vpop.f32.mrf.mxu1  ;;  %v3797_v31 = vld [vmem:[%s6486_s13 + $0x78] sm:$0xff] }
 0xb63   :  { %v1956_v52 = vsel %vm371_vm4, %v1927_v48, 0.0  ;;  %v2192_v44 = vld [vmem:[%s6486_s13 + $0x38] sm:$0xff] }
 0xb66   :  { %1951 = vadd.xlane.f32.xlu1 %v1950_v7  ;;  %1948 = vadd.xlane.f32.xlu0 %v1947_v14  ;;  %v3809_v7 = vld [vmem:[%s6486_s13 + $0x88] sm:$0xff]  ;;  %v5676_v14 = vld [vmem:[%s6485_s12 + $0x38] sm:$0xff]  }
 0xb6a   :  { %1954 = vadd.xlane.f32.xlu0 %v1953_v10  ;;  %1957 = vadd.xlane.f32.xlu1 %v1956_v52  ;;  %v3811_v10 = vld [vmem:[%s6486_s13 + $0x98] sm:$0xff]  ;;  %v3792_v52 = vld [vmem:[%s6486_s13 + $0x50] sm:$0xff] }
 0xbe0   :  { %v1943_v49 = vpop.xlane.xlu0 %1942 }
 0xbe1   :  { %v1965_v40 = vmul.f32 0.03125, %v1943_v49  ;;  %v3794_v49 = vld [vmem:[%s6486_s13 + $0x60] sm:$0xff] }
 0xbe3   :  { %v5576_v43 = vsub.f32 %v1908_v27, %v1965_v40  ;;  %v4341_v27 = vld [vmem:[%s6485_s12 + $0x8] sm:$0xff]   ;;  %v3815_v40 = vld [vmem:[%s6486_s13 + $0xb8] sm:$0xff] }
 0xbe4   :  { %4196 = vmatprep.subr.bf16.mxu1 %v4341_v27 }
 0xbe5   :  { %v1981_v57 = vmul.f32 %v5576_v43, %v5576_v43  ;;  %4197 = vmatpush3.bf16.msra.mxu1 %v4341_v27  ;;  %v3880_v27 = vld [vmem:[%s6486_s13 + $0x180] sm:$0xff] }
 0xbe7   :  { %v1961_v0 = vpop.xlane.xlu1 %1960  ;;  %v1989_v3 = vsel %vm371_vm4, %v1981_v57, 0.0  ;;  %v3796_v57 = vld [vmem:[%s6486_s13 + $0x70] sm:$0xff] }
 0xbe8   :  { %v1971_v56 = vmul.f32 0.03125, %v1961_v0  ;;  %1990 = vadd.xlane.f32.xlu0 %v1989_v3  ;;  %v3827_v0 = vld [vmem:[%s6486_s13 + $0xc8] sm:$0xff]  ;;  %v3808_v3 = vld [vmem:[%s6486_s13 + $0x80] sm:$0xff] }
 0xbea   :  { %v5581_v20 = vsub.f32 %v4194_v11, %v1971_v56  ;;  %v2190_v11 = vld [vmem:[%s6486_s13 + $0x28] sm:$0xff]  ;;  %v3829_v56 = vld [vmem:[%s6486_s13 + $0xd8] sm:$0xff] }
 0xbeb   :  { %v1946_v33 = vpop.xlane.xlu1 %1945  ;;  %v1964_v39 = vpop.xlane.xlu0 %1963 }
 0xbec   :  { %v1966_v63 = vmul.f32 0.03125, %v1946_v33  ;;  %v1972_v59 = vmul.f32 0.03125, %v1964_v39  ;;  %v1987_v54 = vmul.f32 %v5581_v20, %v5581_v20  ;;  %v3810_v33 = vld [vmem:[%s6486_s13 + $0x90] sm:$0xff]  ;;  %v3831_v39 = vld [vmem:[%s6486_s13 + $0xe8] sm:$0xff] }
 0xbee   :  { %v5585_v24 = vsub.f32 %v1911_v25, %v1966_v63  ;;  %v5587_v42 = vsub.f32 %v4195_v50, %v1972_v59  ;;  %v2007_v47 = vsel %vm371_vm4, %v1987_v54, 0.0  ;;  %v4343_v25 = vld [vmem:[%s6485_s12] sm:$0xff]   ;;  %v2191_v50 = vld [vmem:[%s6486_s13 + $0x30] sm:$0xff]  ;;  %v3833_v59 = vld [vmem:[%s6486_s13 + $0xf8] sm:$0xff] }
 0xbef   :  { %v1952_v62 = vpop.xlane.xlu1 %1951  ;;  %v1949_v8 = vpop.xlane.xlu0 %1948  ;;  %2008 = vadd.xlane.f32.xlu1 %v2007_v47  ;;  %4198 = vmatprep.subr.bf16.mxu1 %v4343_v25  ;;  %v3812_v63 = vld [vmem:[%s6486_s13 + $0xa0] sm:$0xff]  ;;  %v3814_v54 = vld [vmem:[%s6486_s13 + $0xb0] sm:$0xff]  ;;  %v3845_v47 = vld [vmem:[%s6486_s13 + $0x108] sm:$0xff] }
 0xbf0   :  { %v1968_v46 = vmul.f32 0.03125, %v1952_v62  ;;  %v1967_v60 = vmul.f32 0.03125, %v1949_v8  ;;  %v1988_v55 = vmul.f32 %v5587_v42, %v5587_v42  ;;  %v1982_v6 = vmul.f32 %v5585_v24, %v5585_v24  ;;  %4199 = vmatpush3.bf16.msra.mxu1 %v4343_v25  ;;  %v3826_v62 = vld [vmem:[%s6486_s13 + $0xc0] sm:$0xff]  ;;  %v3847_v8 = vld [vmem:[%s6486_s13 + $0x118] sm:$0xff] }
 0xbf2   :  { %v5594_v9 = vsub.f32 %v4191_v30, %v1968_v46  ;;  %v5596_v37 = vsub.f32 %v4190_v38, %v1967_v60  ;;  %v2010_v45 = vsel %vm371_vm4, %v1988_v55, 0.0  ;;  %v1992_v58 = vsel %vm371_vm4, %v1982_v6, 0.0  ;;  %v2189_v38 = vld [vmem:[%s6486_s13 + $0x20] sm:$0xff]  ;;  %v4344_v30 = vld [vmem:[%s6485_s12 + $0x10] sm:$0xff]   ;;  %v3849_v60 = vld [vmem:[%s6486_s13 + $0x128] sm:$0xff] }
 0xbf3   :  { %2011 = vadd.xlane.f32.xlu0 %v2010_v45  ;;  %v1955_v61 = vpop.xlane.xlu0 %1954  ;;  %1993 = vadd.xlane.f32.xlu1 %v1992_v58  ;;  %v1958_v21 = vpop.xlane.xlu1 %1957  ;;  %v3828_v46 = vld [vmem:[%s6486_s13 + $0xd0] sm:$0xff]  ;;  %v3830_v55 = vld [vmem:[%s6486_s13 + $0xe0] sm:$0xff]  ;;  %v3851_v6 = vld [vmem:[%s6486_s13 + $0x138] sm:$0xff] }
 0xbf4   :  { %v1969_v15 = vmul.f32 0.03125, %v1955_v61  ;;  %v1970_v26 = vmul.f32 0.03125, %v1958_v21  ;;  %v1983_v17 = vmul.f32 %v5596_v37, %v5596_v37  ;;  %v1984_v16 = vmul.f32 %v5594_v9, %v5594_v9  ;;  %4210 = vmatprep.subr.bf16.mxu0 %v4344_v30  ;;  %v3832_v45 = vld [vmem:[%s6486_s13 + $0xf0] sm:$0xff]  ;;  %v3863_v58 = vld [vmem:[%s6486_s13 + $0x148] sm:$0xff]  ;;  %v3844_v61 = vld [vmem:[%s6486_s13 + $0x100] sm:$0xff] }
 0xbf5   :  { %4211 = vmatpush3.bf16.msra.mxu0 %v4344_v30  ;;  %v3865_v21 = vld [vmem:[%s6486_s13 + $0x158] sm:$0xff] }
 0xbf6   :  { %v5604_v23 = vsub.f32 %v1924_v32, %v1969_v15  ;;  %v5606_v13 = vsub.f32 %v1927_v48, %v1970_v26  ;;  %v1995_v41 = vsel %vm371_vm4, %v1983_v17, 0.0  ;;  %v1998_v22 = vsel %vm371_vm4, %v1984_v16, 0.0  ;;  %v5658_v32 = vld [vmem:[%s6485_s12 + $0x28] sm:$0xff]   ;;  %4232 = vmatprep.subr.bf16.mxu0 %v5676_v14  ;;  %v3790_v48 = vld [vmem:[%s6486_s13 + $0x40] sm:$0xff]  ;;  %v3846_v15 = vld [vmem:[%s6486_s13 + $0x110] sm:$0xff] }
 0xbf7   :  { %1996 = vadd.xlane.f32.xlu0 %v1995_v41  ;;  %1999 = vadd.xlane.f32.xlu1 %v1998_v22  ;;  %v3867_v26 = vld [vmem:[%s6486_s13 + $0x168] sm:$0xff]  ;;  %v3848_v17 = vld [vmem:[%s6486_s13 + $0x120] sm:$0xff]  ;;  %v3869_v16 = vld [vmem:[%s6486_s13 + $0x178] sm:$0xff] }
 0xbf8   :  { %v1985_v18 = vmul.f32 %v5604_v23, %v5604_v23  ;;  %v1986_v19 = vmul.f32 %v5606_v13, %v5606_v13  ;;  %4220 = vmatprep.subr.bf16.mxu1 %v5658_v32  ;;  %v3850_v41 = vld [vmem:[%s6486_s13 + $0x130] sm:$0xff]  ;;  %v3881_v22 = vld [vmem:[%s6486_s13 + $0x188] sm:$0xff] }
 0xbfa   :  { %v2001_v28 = vsel %vm371_vm4, %v1985_v18, 0.0  ;;  %v2004_v5 = vsel %vm371_vm4, %v1986_v19, 0.0  ;;  %v3862_v18 = vld [vmem:[%s6486_s13 + $0x140] sm:$0xff]  ;;  %v3883_v19 = vld [vmem:[%s6486_s13 + $0x198] sm:$0xff] }
 0xbfb   :  { %2002 = vadd.xlane.f32.xlu0 %v2001_v28  ;;  %2005 = vadd.xlane.f32.xlu1 %v2004_v5  ;;  %v3864_v28 = vld [vmem:[%s6486_s13 + $0x150] sm:$0xff]  ;;  %v3885_v5 = vld [vmem:[%s6486_s13 + $0x1a8] sm:$0xff] }
 0xc0c   :  { %2200 = vperm.xlu1 %4324, %v2186_v51   ;;  %v3866_v51 = vld [vmem:[%s6486_s13 + $0x160] sm:$0xff] }
 0xc10   :  { %2205 = vperm.xlu1 %4324, %v2187_v53   ;;  %v3887_v53 = vld [vmem:[%s6486_s13 + $0x1b8] sm:$0xff] }
 0xc11   :  { %2195 = vperm.xlu0 %4323, %v2185_v29  }
 0xc14   :  { %2210 = vperm.xlu1 %4324, %v2188_v12   ;;  %v3868_v12 = vld [vmem:[%s6486_s13 + $0x170] sm:$0xff] }
 0xc15   :  { %2363 = vperm.xlu0 %4323, %v3791_v34  }
 0xc18   :  { %2215 = vperm.xlu1 %4324, %v2189_v38  }
 0xc19   :  { %2373 = vperm.xlu0 %4323, %v3793_v35   ;;  %v3901_v35 = vld [vmem:[%s6486_s13 + $0x1d8] sm:$0xff] }
 0xc1c   :  { %2220 = vperm.xlu1 %4324, %v2190_v11   ;;  %v3882_v11 = vld [vmem:[%s6486_s13 + $0x190] sm:$0xff] }
 0xc1d   :  { %2383 = vperm.xlu0 %4323, %v3795_v2   ;;  %v3903_v2 = vld [vmem:[%s6486_s13 + $0x1e8] sm:$0xff] }
 0xc20   :  { %2225 = vperm.xlu1 %4324, %v2191_v50  }
 0xc21   :  { %2393 = vperm.xlu0 %4323, %v3797_v31  }
 0xc24   :  { %2230 = vperm.xlu1 %4324, %v2192_v44  }
 0xc25   :  { %2543 = vperm.xlu0 %4323, %v3809_v7  }
 0xc28   :  { %2358 = vperm.xlu1 %4324, %v3790_v48  }
 0xc29   :  { %2553 = vperm.xlu0 %4323, %v3811_v10   ;;  %v3884_v10 = vld [vmem:[%s6486_s13 + $0x1a0] sm:$0xff] }
 0xc2c   :  { %2368 = vperm.xlu1 %4324, %v3792_v52   ;;  %v3905_v52 = vld [vmem:[%s6486_s13 + $0x1f8] sm:$0xff] }
 0xc2d   :  { %2563 = vperm.xlu0 %4323, %v3813_v1  }
 0xc30   :  { %2378 = vperm.xlu1 %4324, %v3794_v49  }
 0xc31   :  { %2573 = vperm.xlu0 %4323, %v3815_v40  }
 0xc34   :  { %2388 = vperm.xlu1 %4324, %v3796_v57  }
 0xc35   :  { %2706 = vperm.xlu0 %4323, %v3827_v0  }
 0xc38   :  { %2538 = vperm.xlu1 %4324, %v3808_v3  }
 0xc39   :  { %2716 = vperm.xlu0 %4323, %v3829_v56   ;;  %v3886_v56 = vld [vmem:[%s6486_s13 + $0x1b0] sm:$0xff] }
 0xc3c   :  { %2548 = vperm.xlu1 %4324, %v3810_v33   ;;  %v3917_v33 = vld [vmem:[%s6486_s13 + $0x208] sm:$0xff] }
 0xc3d   :  { %2726 = vperm.xlu0 %4323, %v3831_v39  }
 0xc40   :  { %2558 = vperm.xlu1 %4324, %v3812_v63  }
 0xc41   :  { %2736 = vperm.xlu0 %4323, %v3833_v59  }
 0xc44   :  { %2568 = vperm.xlu1 %4324, %v3814_v54  }
 0xc45   :  { %2869 = vperm.xlu0 %4323, %v3845_v47  }
 0xc48   :  { %2701 = vperm.xlu1 %4324, %v3826_v62  }
 0xc49   :  { %2879 = vperm.xlu0 %4323, %v3847_v8  }
 0xc4c   :  { %2711 = vperm.xlu1 %4324, %v3828_v46   ;;  %v3898_v46 = vld [vmem:[%s6486_s13 + $0x1c0] sm:$0xff] }
 0xc4d   :  { %2889 = vperm.xlu0 %4323, %v3849_v60   ;;  %v3919_v60 = vld [vmem:[%s6486_s13 + $0x218] sm:$0xff] }
 0xc50   :  { %2721 = vperm.xlu1 %4324, %v3830_v55  }
 0xc51   :  { %2899 = vperm.xlu0 %4323, %v3851_v6  }
 0xc54   :  { %2731 = vperm.xlu1 %4324, %v3832_v45  }
 0xc55   :  { %3032 = vperm.xlu0 %4323, %v3863_v58   ;;  %v3772_v58 = vld [vmem:[%s6479_s6 + $0x8] ss:$0 sm:$0xff] }
 0xc58   :  { %2864 = vperm.xlu1 %4324, %v3844_v61   ;;  %v3900_v61 = vld [vmem:[%s6486_s13 + $0x1d0] sm:$0xff] }
 0xc59   :  { %3042 = vperm.xlu0 %4323, %v3865_v21  }
 0xc5c   :  { %2874 = vperm.xlu1 %4324, %v3846_v15   ;;  %v3921_v15 = vld [vmem:[%s6486_s13 + $0x228] sm:$0xff] }
 0xc5d   :  { %3052 = vperm.xlu0 %4323, %v3867_v26  }
 0xc60   :  { %2884 = vperm.xlu1 %4324, %v3848_v17   ;;  %v3773_v17 = vld [vmem:[%s6479_s6 + $0x9] ss:$0 sm:$0xff] }
 0xc61   :  { %3062 = vperm.xlu0 %4323, %v3869_v16  }
 0xc64   :  { %2894 = vperm.xlu1 %4324, %v3850_v41   ;;  %v3902_v41 = vld [vmem:[%s6486_s13 + $0x1e0] sm:$0xff] }
 0xc65   :  { %3179 = vperm.xlu0 %4323, %v3881_v22  }
 0xc68   :  { %3027 = vperm.xlu1 %4324, %v3862_v18   ;;  %v3923_v18 = vld [vmem:[%s6486_s13 + $0x238] sm:$0xff] }
 0xc69   :  { %3189 = vperm.xlu0 %4323, %v3883_v19  }
 0xc6c   :  { %3037 = vperm.xlu1 %4324, %v3864_v28  }
 0xc6d   :  { %3199 = vperm.xlu0 %4323, %v3885_v5  }
 0xc70   :  { %3047 = vperm.xlu1 %4324, %v3866_v51  }
 0xc71   :  { %v1991_v29 = vpop.xlane.xlu0 %1990  ;;  %3209 = vperm.xlu0 %4323, %v3887_v53   ;;  %v3904_v53 = vld [vmem:[%s6486_s13 + $0x1f0] sm:$0xff] }
 0xc72   :  { %v2013_v34 = vmul.f32 0.03125, %v1991_v29 }
 0xc74   :  { %v2021_v38 = vadd.f32 1e-06, %v2013_v34  ;;  %3057 = vperm.xlu1 %4324, %v3868_v12  }
 0xc75   :  { %3326 = vperm.xlu0 %4323, %v3899_v36  }
 0xc76   :  { %4471 = vrsqrt.f32 %v2021_v38 }
 0xc78   :  { %3174 = vperm.xlu1 %4324, %v3880_v27   ;;  %v2009_v30 = vpop.xlane.xlu1 %2008 }
 0xc79   :  { %v2019_v25 = vmul.f32 0.03125, %v2009_v30  ;;  %3336 = vperm.xlu0 %4323, %v3901_v35  }
 0xc7b   :  { %v2027_v50 = vadd.f32 1e-06, %v2019_v25 }
 0xc7c   :  { %v2012_v31 = vpop.xlane.xlu0 %2011  ;;  %3184 = vperm.xlu1 %4324, %v3882_v11   ;;  %v1994_v44 = vpop.xlane.xlu1 %1993 }
 0xc7d   :  { %4473 = vrsqrt.f32 %v2027_v50  ;;  %v2020_v7 = vmul.f32 0.03125, %v2012_v31  ;;  %v2014_v48 = vmul.f32 0.03125, %v1994_v44  ;;  %3346 = vperm.xlu0 %4323, %v3903_v2  }
 0xc7f   :  { %v2028_v1 = vadd.f32 1e-06, %v2020_v7  ;;  %v2022_v49 = vadd.f32 1e-06, %v2014_v48 }
 0xc80   :  { %v1997_v40 = vpop.xlane.xlu0 %1996  ;;  %3194 = vperm.xlu1 %4324, %v3884_v10   ;;  %v2000_v57 = vpop.xlane.xlu1 %1999 }
 0xc81   :  { %4475 = vrsqrt.f32 %v2028_v1  ;;  %v2015_v0 = vmul.f32 0.03125, %v1997_v40  ;;  %v2016_v3 = vmul.f32 0.03125, %v2000_v57  ;;  %3356 = vperm.xlu0 %4323, %v3905_v52   ;;  %v3918_v57 = vld [vmem:[%s6486_s13 + $0x210] sm:$0xff] }
 0xc82   :  { %4477 = vrsqrt.f32 %v2022_v49 }
 0xc83   :  { %v2023_v39 = vadd.f32 1e-06, %v2015_v0  ;;  %v2024_v63 = vadd.f32 1e-06, %v2016_v3  ;;  %v4472_v47 = vpop.eup %4471 }
 0xc84   :  { %v2003_v59 = vpop.xlane.xlu0 %2002  ;;  %3204 = vperm.xlu1 %4324, %v3886_v56   ;;  %v2006_v54 = vpop.xlane.xlu1 %2005  ;;  %v2037_v45 = vmul.f32 %v4472_v47, %v5576_v43 }
 0xc85   :  { %4479 = vrsqrt.f32 %v2023_v39  ;;  %v2017_v62 = vmul.f32 0.03125, %v2003_v59  ;;  %v2018_v8 = vmul.f32 0.03125, %v2006_v54  ;;  %3473 = vperm.xlu0 %4323, %v3917_v33  }
 0xc86   :  { %4481 = vrsqrt.f32 %v2024_v63  ;;  %v2049_v43 = vmul.f32 %v3772_v58, %v2037_v45  ;;  %v4350_v45 = vld [vmem:[%s6485_s12 + $0x58] sm:$0xff]  }
 0xc87   :  { %v2025_v55 = vadd.f32 1e-06, %v2017_v62  ;;  %v2026_v6 = vadd.f32 1e-06, %v2018_v8  ;;  %v4347_v62 = vld [vmem:[%s6485_s12 + $0x20] sm:$0xff]  }
 0xc88   :  { %3321 = vperm.xlu1 %4324, %v3898_v46   ;;  %v5851_v5 = vadd.f32 %v3773_v17, %v2049_v43  ;;  %v3920_v46 = vld [vmem:[%s6486_s13 + $0x220] sm:$0xff] }
 0xc89   :  { %4483 = vrsqrt.f32 %v2025_v55  ;;  %3483 = vperm.xlu0 %4323, %v3919_v60  }
 0xc8a   :  { %v4474_v21 = vpop.eup %4473  ;;  %4485 = vrsqrt.f32 %v2026_v6  ;;  %v2069_v35 = vrot.slane %v5851_v5, 7 }
 0xc8b   :  { %v2043_v26 = vmul.f32 %v4474_v21, %v5581_v20 }
 0xc8c   :  { %3331 = vperm.xlu1 %4324, %v3900_v61  }
 0xc8d   :  { %v2055_v16 = vmul.f32 %v3772_v58, %v2043_v26  ;;  %3493 = vperm.xlu0 %4323, %v3921_v15   ;;  %v2412_v15 = vrot.slane %v5851_v5, 1 }
 0xc8e   :  { %v4476_v22 = vpop.eup %4475 }
 0xc8f   :  { %v4478_v19 = vpop.eup %4477  ;;  %v2044_v20 = vmul.f32 %v4476_v22, %v5587_v42  ;;  %v5853_v51 = vadd.f32 %v3773_v17, %v2055_v16  ;;  %v4349_v16 = vld [vmem:[%s6485_s12 + $0x48] sm:$0xff]  }
 0xc90   :  { %v2038_v28 = vmul.f32 %v4478_v19, %v5585_v24  ;;  %3341 = vperm.xlu1 %4324, %v3902_v41  }
 0xc91   :  { %v2056_v29 = vmul.f32 %v3772_v58, %v2044_v20  ;;  %3503 = vperm.xlu0 %4323, %v3923_v18   ;;  %v2075_v11 = vrot.slane %v5853_v51, 7 }
 0xc92   :  { %v4480_v12 = vpop.eup %4479  ;;  %v2050_v34 = vmul.f32 %v3772_v58, %v2038_v28 }
 0xc93   :  { %v4482_v36 = vpop.eup %4481  ;;  %v2039_v38 = vmul.f32 %v4480_v12, %v5596_v37  ;;  %v5859_v27 = vadd.f32 %v3773_v17, %v2056_v29  ;;  %v3916_v37 = vld [vmem:[%s6486_s13 + $0x200] sm:$0xff] }
 0xc94   :  { %v5861_v42 = vadd.f32 %v3773_v17, %v2050_v34  ;;  %v2040_v24 = vmul.f32 %v4482_v36, %v5594_v9  ;;  %3351 = vperm.xlu1 %4324, %v3904_v53  }
 0xc95   :  { %v2051_v30 = vmul.f32 %v3772_v58, %v2039_v38  ;;  %v5868_v25 = vpack.c.bf16 %v5851_v5, %v5859_v27  ;;  %v2076_v2 = vrot.slane %v5859_v27, 7  ;;  %v2419_v6 = vrot.slane %v5859_v27, 1 }
 0xc96   :  { %v4484_v50 = vpop.eup %4483  ;;  %v2070_v9 = vrot.slane %v5861_v42, 7  ;;  %v2052_v31 = vmul.f32 %v3772_v58, %v2040_v24  ;;  %v2413_v55 = vrot.slane %v5861_v42, 1  ;;  %v4352_v24 = vld [vmem:[%s6485_s12 + $0x50] sm:$0xff]  }
 0xc97   :  { %v4486_v44 = vpop.eup %4485  ;;  %v5876_v7 = vadd.f32 %v3773_v17, %v2051_v30  ;;  %v2041_v48 = vmul.f32 %v4484_v50, %v5604_v23  ;;  %4212 = vmatprep.mubr.msk.bf16.mxu0 %vm371_vm4, %v5868_v25  ;;  %v5883_v10 = vsel %vm2079_vm3, %v2075_v11, %v2076_v2  ;;  %v2087_v52 = vsel %vm2079_vm3, %v2076_v2, %v2069_v35  ;;  %v4351_v2 = vld [vmem:[%s6485_s12 + $0x40] sm:$0xff]  }
 0xc98   :  { %v2042_v1 = vmul.f32 %v4486_v44, %v5606_v13  ;;  %3468 = vperm.xlu1 %4324, %v3916_v37   ;;  %v5889_v49 = vpack.c.bf16 %v2087_v52, %v5883_v10  ;;  %v5891_v40 = vadd.f32 %v3773_v17, %v2052_v31  ;;  %v4348_v13 = vld [vmem:[%s6485_s12 + $0x30] sm:$0xff]   ;;  %v2086_v33 = vsel %vm2079_vm3, %v2069_v35, %v2070_v9  ;;  %v4353_v44 = vld [vmem:[%s6485_s12 + $0x68] sm:$0xff]  }
 0xc99   :  { %v5895_v23 = vpack.c.bf16 %v5876_v7, %v5861_v42  ;;  %v2071_v0 = vrot.slane %v5876_v7, 7  ;;  %v2053_v3 = vmul.f32 %v3772_v58, %v2041_v48  ;;  %v2592_v41 = vpack.c.bf16 %v2086_v33, %v2087_v52 }
 0xc9a   :  { %4200 = vmatprep.mubr.msk.bf16.mxu1 %vm371_vm4, %v5889_v49  ;;  %v2054_v56 = vmul.f32 %v3772_v58, %v2042_v1  ;;  %v2072_v59 = vrot.slane %v5891_v40, 7  ;;  %v2427_v22 = vsel %vm2420_vm6, %v2412_v15, %v2413_v55  ;;  %v5972_v18 = vsel %vm2420_vm6, %v2419_v6, %v2412_v15 }
 0xc9b   :  { %4213 = vmatmul.mubr.msk.bf16.vlgmr.msra.gmra.mxu0 %vm371_vm4, %v5895_v23  ;;  %v2085_v39 = vsel %vm2079_vm3, %v2070_v9, %v2071_v0  ;;  %v5912_v63 = vadd.f32 %v3773_v17, %v2053_v3  ;;  %v2414_v20 = vrot.slane %v5876_v7, 1  ;;  %v5981_v28 = vpack.c.bf16 %v2427_v22, %v5972_v18  ;;  %v4354_v9 = vld [vmem:[%s6485_s12 + $0x78] sm:$0xff]  }
 0xc9c   :  { %3478 = vperm.xlu1 %4324, %v3918_v57   ;;  %v5915_v54 = vpack.c.bf16 %v2085_v39, %v2086_v33  ;;  %v5917_v47 = vadd.f32 %v3773_v17, %v2054_v56  ;;  %4233 = vmatpush3.bf16.msra.mxu0 %v5676_v14  ;;  %v2084_v61 = vsel %vm2079_vm3, %v2071_v0, %v2072_v59  ;;  %v2415_v53 = vrot.slane %v5891_v40, 1  ;;  %v6053_v33 = vpop.permute.xlu1 %2200 }
 0xc9d   :  { %v5925_v8 = vpack.c.bf16 %v5912_v63, %v5891_v40  ;;  %v2073_v60 = vrot.slane %v5912_v63, 7  ;;  %4234 = vmatprep.subr.bf16.mxu0 %v4348_v13  ;;  %v2416_v29 = vrot.slane %v5912_v63, 1  ;;  %v2593_v34 = vpack.c.bf16 %v2084_v61, %v2085_v39 }
 0xc9e   :  { %4201 = vmatmul.mubr.msk.bf16.vlgmr.msra.gmra.mxu1 %vm371_vm4, %v5915_v54  ;;  %v2074_v14 = vrot.slane %v5917_v47, 7  ;;  %v5952_v26 = vpack.c.bf16 %v5853_v51, %v5917_v47  ;;  %v2417_v12 = vrot.slane %v5917_v47, 1  ;;  %v2426_v36 = vsel %vm2420_vm6, %v2413_v55, %v2414_v20 }
 0xc9f   :  { %4216 = vmatprep.mubr.msk.bf16.mxu0 %vm371_vm4, %v5925_v8  ;;  %4221 = vmatpush3.bf16.msra.mxu1 %v5658_v32  ;;  %v2083_v58 = vsel %vm2079_vm3, %v2072_v59, %v2073_v60  ;;  %v3922_v32 = vld [vmem:[%s6486_s13 + $0x230] sm:$0xff]  ;;  %v2425_v38 = vsel %vm2420_vm6, %v2414_v20, %v2415_v53  ;;  %v2424_v37 = vsel %vm2420_vm6, %v2415_v53, %v2416_v29  ;;  %v2418_v31 = vrot.slane %v5853_v51, 1 }
 0xca0   :  { %3488 = vperm.xlu1 %4324, %v3920_v46   ;;  %v5947_v21 = vpack.c.bf16 %v2083_v58, %v2084_v61  ;;  %4222 = vmatprep.subr.bf16.mxu1 %v4347_v62  ;;  %v2081_v43 = vsel %vm2079_vm3, %v2074_v14, %v2075_v11  ;;  %v2082_v17 = vsel %vm2079_vm3, %v2073_v60, %v2074_v14 }
 0xca1   :  { %4235 = vmatpush3.bf16.msra.mxu0 %v4348_v13  ;;  %v5977_v19 = vpack.c.bf16 %v2081_v43, %v2082_v17  ;;  %v2594_v35 = vpack.c.bf16 %v2082_v17, %v2083_v58  ;;  %v2423_v30 = vsel %vm2420_vm6, %v2416_v29, %v2417_v12  ;;  %v6003_v11 = vpack.c.bf16 %v2425_v38, %v2426_v36  ;;  %v4356_v13 = vld [vmem:[%s6485_s12 + $0x70] sm:$0xff]  }
 0xca2   :  { %4204 = vmatprep.mubr.msk.bf16.mxu1 %vm371_vm4, %v5947_v21  ;;  %4256 = vmatprep.subr.bf16.mxu0 %v4350_v45  ;;  %v6008_v50 = vpack.c.bf16 %v2423_v30, %v2424_v37  ;;  %v2595_v48 = vpack.c.bf16 %v5883_v10, %v2081_v43  ;;  %v2422_v52 = vsel %vm2420_vm6, %v2417_v12, %v2418_v31 }
 0xca3   :  { %4217 = vmatmul.mubr.msk.bf16.gmra.mxu0 %vm371_vm4, %v5952_v26  ;;  %4223 = vmatpush3.bf16.msra.mxu1 %v4347_v62  ;;  %v2918_v1 = vpack.c.bf16 %v2426_v36, %v2427_v22  ;;  %v2421_v57 = vsel %vm2420_vm6, %v2418_v31, %v2419_v6  ;;  %v2755_v10 = vpack.c.bf16 %v5861_v42, %v5851_v5  ;;  %v4355_v5 = vld [vmem:[%s6485_s12 + $0x60] sm:$0xff]  }
 0xca4   :  { %3498 = vperm.xlu1 %4324, %v3922_v32   ;;  %4236 = vmatprep.mubr.msk.bf16.mxu0 %vm371_vm4, %v2592_v41  ;;  %v2432_v0 = vpack.c.bf16 %v2421_v57, %v2422_v52  ;;  %v2919_v3 = vpack.c.bf16 %v2424_v37, %v2425_v38  ;;  %v2920_v56 = vpack.c.bf16 %v2422_v52, %v2423_v30 }
 0xca5   :  { %4244 = vmatprep.subr.bf16.mxu1 %v4349_v16  ;;  %v2756_v4 = vpack.c.bf16 %v5891_v40, %v5876_v7  ;;  %v2757_v42 = vpack.c.bf16 %v5917_v47, %v5912_v63  ;;  %v4357_v7 = vld [vmem:[%s6485_s12 + $0x88] sm:$0xff]   ;;  %v2921_v40 = vpack.c.bf16 %v5972_v18, %v2421_v57  ;;  %v2758_v39 = vpack.c.bf16 %v5859_v27, %v5853_v51  ;;  %v6062_v63 = vpop.permute.xlu1 %2205  ;;  %v6096_v47 = vpop.permute.xlu0 %2195 }
 0xca6   :  { %4205 = vmatmul.mubr.msk.bf16.gmra.mxu1 %vm371_vm4, %v5977_v19 }
 0xca7   :  { %4224 = vmatprep.mubr.msk.bf16.mxu1 %vm371_vm4, %v5981_v28 }
 0xca9   :  { %v6075_v51 = vpop.permute.xlu1 %2210  ;;  %v6100_v62 = vpop.permute.xlu0 %2363 }
 0xcab   :  { %4237 = vmatmul.mubr.msk.bf16.vlgmr.msra.gmra.mxu0 %vm371_vm4, %v2593_v34 }
 0xcac   :  { %4240 = vmatprep.mubr.msk.bf16.mxu0 %vm371_vm4, %v2594_v35  ;;  %4257 = vmatpush3.bf16.msra.mxu0 %v4350_v45 }
 0xcad   :  { %4258 = vmatprep.subr.bf16.mxu0 %v4352_v24  ;;  %v6079_v27 = vpop.permute.xlu1 %2215  ;;  %v6104_v46 = vpop.permute.xlu0 %2373 }
 0xcae   :  { %4225 = vmatmul.mubr.msk.bf16.vlgmr.msra.gmra.mxu1 %vm371_vm4, %v6003_v11 }
 0xcaf   :  { %4228 = vmatprep.mubr.msk.bf16.mxu1 %vm371_vm4, %v6008_v50  ;;  %4245 = vmatpush3.bf16.msra.mxu1 %v4349_v16 }
 0xcb0   :  { %4246 = vmatprep.subr.bf16.mxu1 %v4351_v2  ;;  %4259 = vmatpush3.bf16.msra.mxu0 %v4352_v24 }
 0xcb1   :  { %4280 = vmatprep.subr.bf16.mxu0 %v4354_v9  ;;  %v6085_v59 = vpop.permute.xlu1 %2220  ;;  %v6108_v14 = vpop.permute.xlu0 %2383 }
 0xcb3   :  { %4241 = vmatmul.mubr.msk.bf16.gmra.mxu0 %vm371_vm4, %v2595_v48  ;;  %4247 = vmatpush3.bf16.msra.mxu1 %v4351_v2 }
 0xcb4   :  { %4260 = vmatprep.mubr.msk.bf16.mxu0 %vm371_vm4, %v2918_v1  ;;  %4268 = vmatprep.subr.bf16.mxu1 %v4353_v44 }
 0xcb5   :  { %v6112_v6 = vpop.permute.xlu0 %2393 }
 0xcb6   :  { %4229 = vmatmul.mubr.msk.bf16.gmra.mxu1 %vm371_vm4, %v2432_v0 }
 0xcb7   :  { %4248 = vmatprep.mubr.msk.bf16.mxu1 %vm371_vm4, %v2755_v10 }
 0xcb9   :  { %v6116_v58 = vpop.permute.xlu0 %2543 }
 0xcbb   :  { %4261 = vmatmul.mubr.msk.bf16.vlgmr.msra.gmra.mxu0 %vm371_vm4, %v2919_v3 }
 0xcbc   :  { %4264 = vmatprep.mubr.msk.bf16.mxu0 %vm371_vm4, %v2920_v56  ;;  %4281 = vmatpush3.bf16.msra.mxu0 %v4354_v9 }
 0xcbd   :  { %4282 = vmatprep.subr.bf16.mxu0 %v4356_v13 }
 0xcbe   :  { %4249 = vmatmul.mubr.msk.bf16.vlgmr.msra.gmra.mxu1 %vm371_vm4, %v2756_v4 }
 0xcbf   :  { %4252 = vmatprep.mubr.msk.bf16.mxu1 %vm371_vm4, %v2757_v42  ;;  %4269 = vmatpush3.bf16.msra.mxu1 %v4353_v44 }
 0xcc0   :  { %4270 = vmatprep.subr.bf16.mxu1 %v4355_v5  ;;  %4283 = vmatpush3.bf16.msra.mxu0 %v4356_v13 }
 0xcc3   :  { %4265 = vmatmul.mubr.msk.bf16.gmra.mxu0 %vm371_vm4, %v2921_v40  ;;  %4271 = vmatpush3.bf16.msra.mxu1 %v4355_v5 }
 0xcc4   :  { %4284 = vmatprep.mubr.msk.bf16.mxu0 %vm371_vm4, %v5895_v23  ;;  %4292 = vmatprep.subr.bf16.mxu1 %v4357_v7  ;;  %v4358_v23 = vld [vmem:[%s6485_s12 + $0x80] sm:$0xff]  }
 0xcc6   :  { %4253 = vmatmul.mubr.msk.bf16.gmra.mxu1 %vm371_vm4, %v2758_v39 }
 0xcc7   :  { %4272 = vmatprep.mubr.msk.bf16.mxu1 %vm371_vm4, %v5915_v54  ;;  %v6090_v54 = vpop.permute.xlu1 %2225 }
 0xccb   :  { %4285 = vmatmul.mubr.msk.bf16.vlgmr.msra.gmra.mxu0 %vm371_vm4, %v5925_v8 }
 0xccc   :  { %4288 = vmatprep.mubr.msk.bf16.mxu0 %vm371_vm4, %v5952_v26 }
 0xcce   :  { %4273 = vmatmul.mubr.msk.bf16.vlgmr.msra.gmra.mxu1 %vm371_vm4, %v5947_v21  ;;  %v6120_v21 = vpop.permute.xlu0 %2553 }
 0xccf   :  { %4276 = vmatprep.mubr.msk.bf16.mxu1 %vm371_vm4, %v5977_v19  ;;  %4293 = vmatpush3.bf16.msra.mxu1 %v4357_v7 }
 0xcd0   :  { %4294 = vmatprep.subr.bf16.mxu1 %v4358_v23 }
 0xcd2   :  { %v6124_v26 = vpop.permute.xlu0 %2563 }
 0xcd3   :  { %4289 = vmatmul.mubr.msk.bf16.gmra.mxu0 %vm371_vm4, %v5868_v25  ;;  %4295 = vmatpush3.bf16.msra.mxu1 %v4358_v23  ;;  %v6094_v25 = vpop.permute.xlu1 %2230  ;;  %6500 = vst [vmem:[#allocation8_spill] sm:$0xff] %v6124_v26 }
 0xcd6   :  { %4277 = vmatmul.mubr.msk.bf16.gmra.mxu1 %vm371_vm4, %v5889_v49  ;;  %v6128_v43 = vpop.permute.xlu0 %2573 }
 0xcd7   :  { %4296 = vmatprep.mubr.msk.bf16.mxu1 %vm371_vm4, %v6003_v11  ;;  %v6098_v49 = vpop.permute.xlu1 %2358 }
 0xcda   :  { %v6132_v16 = vpop.permute.xlu0 %2706 }
 0xcdb   :  { %v6102_v8 = vpop.permute.xlu1 %2368  ;;  %6501 = vst [vmem:[#allocation9_spill] sm:$0xff] %v6132_v16 }
 0xcde   :  { %4297 = vmatmul.mubr.msk.bf16.vlgmr.msra.gmra.mxu1 %vm371_vm4, %v6008_v50  ;;  %v6136_v22 = vpop.permute.xlu0 %2716 }
 0xcdf   :  { %4300 = vmatprep.mubr.msk.bf16.mxu1 %vm371_vm4, %v2432_v0  ;;  %v6106_v60 = vpop.permute.xlu1 %2378 }
 0xce2   :  { %v6140_v19 = vpop.permute.xlu0 %2726 }
 0xce3   :  { %v6110_v55 = vpop.permute.xlu1 %2388  ;;  %6503 = vst [vmem:[#allocation11_spill] sm:$0xff] %v6140_v19 }
 0xce6   :  { %4301 = vmatmul.mubr.msk.bf16.gmra.mxu1 %vm371_vm4, %v5981_v28  ;;  %v6144_v28 = vpop.permute.xlu0 %2736 }
 0xce7   :  { %v6114_v45 = vpop.permute.xlu1 %2538  ;;  %6505 = vst [vmem:[#allocation13_spill] sm:$0xff] %v6144_v28 }
 0xcea   :  { %v6148_v29 = vpop.permute.xlu0 %2869 }
 0xceb   :  { %v6118_v61 = vpop.permute.xlu1 %2548  ;;  %6507 = vst [vmem:[#allocation15_spill] sm:$0xff] %v6148_v29 }
 0xcee   :  { %v6152_v34 = vpop.permute.xlu0 %2879 }
 0xcef   :  { %v6122_v15 = vpop.permute.xlu1 %2558  ;;  %6508 = vst [vmem:[#allocation16_spill] sm:$0xff] %v6152_v34 }
 0xcf2   :  { %v6156_v38 = vpop.permute.xlu0 %2889 }
 0xcf3   :  { %v6126_v32 = vpop.permute.xlu1 %2568  ;;  %6510 = vst [vmem:[#allocation18_spill] sm:$0xff] %v6156_v38 }
 0xcf6   :  { %v6160_v35 = vpop.permute.xlu0 %2899 }
 0xcf7   :  { %v6130_v17 = vpop.permute.xlu1 %2701  ;;  %6512 = vst [vmem:[#allocation20_spill] sm:$0xff] %v6160_v35 }
 0xcfa   :  { %v6164_v37 = vpop.permute.xlu0 %3032 }
 0xcfb   :  { %v6134_v41 = vpop.permute.xlu1 %2711  ;;  %6514 = vst [vmem:[#allocation22_spill] sm:$0xff] %v6164_v37 }
 0xcfe   :  { %v6168_v2 = vpop.permute.xlu0 %3042 }
 0xcff   :  { %v6138_v18 = vpop.permute.xlu1 %2721  ;;  %6516 = vst [vmem:[#allocation24_spill] sm:$0xff] %v6168_v2 }
 0xd00   :  { %6502 = vst [vmem:[#allocation10_spill] sm:$0xff] %v6138_v18 }
 0xd02   :  { %v6174_v44 = vpop.permute.xlu0 %3052 }
 0xd03   :  { %v6142_v20 = vpop.permute.xlu1 %2731  ;;  %6518 = vst [vmem:[#allocation26_spill] sm:$0xff] %v6174_v44 }
 0xd04   :  { %6504 = vst [vmem:[#allocation12_spill] sm:$0xff] %v6142_v20 }
 0xd06   :  { %v6184_v13 = vpop.permute.xlu0 %3062 }
 0xd07   :  { %v6146_v53 = vpop.permute.xlu1 %2864  ;;  %6520 = vst [vmem:[#allocation28_spill] sm:$0xff] %v6184_v13 }
 0xd08   :  { %6506 = vst [vmem:[#allocation14_spill] sm:$0xff] %v6146_v53 }
 0xd0a   :  { %v6194_v23 = vpop.permute.xlu0 %3179 }
 0xd0b   :  { %v6150_v12 = vpop.permute.xlu1 %2874  ;;  %6522 = vst [vmem:[#allocation30_spill] sm:$0xff] %v6194_v23 }
 0xd0e   :  { %v6206_v2 = vpop.permute.xlu0 %3189 }
 0xd0f   :  { %v6154_v36 = vpop.permute.xlu1 %2884  ;;  %6524 = vst [vmem:[#allocation32_spill] sm:$0xff] %v6206_v2 }
 0xd10   :  { %6509 = vst [vmem:[#allocation17_spill] sm:$0xff] %v6154_v36 }
 0xd13   :  { %v6158_v24 = vpop.permute.xlu1 %2894 }
 0xd14   :  { %6511 = vst [vmem:[#allocation19_spill] sm:$0xff] %v6158_v24 }
 0xd17   :  { %v6162_v30 = vpop.permute.xlu1 %3027 }
 0xd18   :  { %6513 = vst [vmem:[#allocation21_spill] sm:$0xff] %v6162_v30 }
 0xd1b   :  { %v6166_v11 = vpop.permute.xlu1 %3037 }
 0xd1c   :  { %6515 = vst [vmem:[#allocation23_spill] sm:$0xff] %v6166_v11 }
 0xd1f   :  { %v6170_v50 = vpop.permute.xlu1 %3047 }
 0xd20   :  { %6517 = vst [vmem:[#allocation25_spill] sm:$0xff] %v6170_v50 }
 0xd23   :  { %v6178_v1 = vpop.permute.xlu1 %3057 }
 0xd24   :  { %6519 = vst [vmem:[#allocation27_spill] sm:$0xff] %v6178_v1 }
 0xd27   :  { %v6188_v5 = vpop.permute.xlu1 %3174 }
 0xd28   :  { %6521 = vst [vmem:[#allocation29_spill] sm:$0xff] %v6188_v5 }
 0xd2b   :  { %v6198_v38 = vpop.permute.xlu1 %3184 }
 0xd2c   :  { %6523 = vst [vmem:[#allocation31_spill] sm:$0xff] %v6198_v38  ;;  %v6216_v38 = vpop.permute.xlu0 %3199 }
 0xd2d   :  { %6529 = vst [vmem:[#allocation37_spill] sm:$0xff] %v6216_v38 }
 0xd2f   :  { %v6210_v5 = vpop.permute.xlu1 %3194 }
 0xd30   :  { %6526 = vst [vmem:[#allocation34_spill] sm:$0xff] %v6210_v5  ;;  %v6228_v5 = vpop.permute.xlu0 %3209 }
 0xd31   :  { %6535 = vst [vmem:[#allocation43_spill] sm:$0xff] %v6228_v5 }
 0xd33   :  { %v6220_v34 = vpop.permute.xlu1 %3204 }
 0xd34   :  { %6531 = vst [vmem:[#allocation39_spill] sm:$0xff] %v6220_v34 }
 0xd5b   :  { %v4214_v9 = vpop.f32.mrf.mxu0 }
 0xd5d   :  { %v6172_v31 = vpop.f32.mrf.mxu0 }
 0xd5e   :  { %v4202_v48 = vpop.f32.mrf.mxu1 }
 0xd5f   :  { %v6176_v52 = vpop.f32.mrf.mxu0 }
 0xd60   :  { %v2154_v57 = vpop.f32.mrf.mxu1 }
 0xd61   :  { %v6180_v0 = vpop.f32.mrf.mxu0 }
 0xd62   :  { %v4203_v10 = vpop.f32.mrf.mxu1 }
 0xd63   :  { %v6182_v3 = vpop.f32.mrf.mxu0 }
 0xd64   :  { %v2157_v56 = vpop.f32.mrf.mxu1 }
 0xd65   :  { %v6186_v4 = vpop.f32.mrf.mxu0 }
 0xd66   :  { %v4206_v42 = vpop.f32.mrf.mxu1 }
 0xd67   :  { %v6190_v7 = vpop.f32.mrf.mxu0 }
 0xd68   :  { %v2170_v40 = vpop.f32.mrf.mxu1 }
 0xd69   :  { %v6192_v39 = vpop.f32.mrf.mxu0 }
 0xd6a   :  { %v4207_v35 = vpop.f32.mrf.mxu1 }
 0xd6b   :  { %v6196_v44 = vpop.f32.mrf.mxu0 }
 0xd6c   :  { %v6200_v50 = vpop.f32.mrf.mxu1 }
 0xd6d   :  { %v6202_v13 = vpop.f32.mrf.mxu0 }
 0xd6e   :  { %v4226_v1 = vpop.f32.mrf.mxu1 }
 0xd6f   :  { %v6204_v37 = vpop.f32.mrf.mxu0 }
 0xd70   :  { %v2496_v36 = vpop.f32.mrf.mxu1 }
 0xd71   :  { %v6208_v24 = vpop.f32.mrf.mxu0 }
 0xd72   :  { %6525 = vst [vmem:[#allocation33_spill] sm:$0xff] %v6208_v24  ;;  %v4227_v23 = vpop.f32.mrf.mxu1 }
 0xd73   :  { %v6212_v30 = vpop.f32.mrf.mxu0 }
 0xd74   :  { %6527 = vst [vmem:[#allocation35_spill] sm:$0xff] %v6212_v30  ;;  %v2499_v19 = vpop.f32.mrf.mxu1 }
 0xd75   :  { %v6214_v11 = vpop.f32.mrf.mxu0 }
 0xd76   :  { %6528 = vst [vmem:[#allocation36_spill] sm:$0xff] %v6214_v11  ;;  %v4230_v29 = vpop.f32.mrf.mxu1  ;;  %v6234_v11 = vpop.permute.xlu1 %3321 }
 0xd77   :  { %v6218_v28 = vpop.f32.mrf.mxu0  ;;  %6538 = vst [vmem:[#allocation46_spill] sm:$0xff] %v6234_v11 }
 0xd78   :  { %6530 = vst [vmem:[#allocation38_spill] sm:$0xff] %v6218_v28  ;;  %v2512_v18 = vpop.f32.mrf.mxu1 }
 0xd79   :  { %v6222_v2 = vpop.f32.mrf.mxu0 }
 0xd7a   :  { %6532 = vst [vmem:[#allocation40_spill] sm:$0xff] %v6222_v2  ;;  %v6224_v26 = vpop.f32.mrf.mxu1  ;;  %v6242_v2 = vpop.permute.xlu0 %3326 }
 0xd7b   :  { %6533 = vst [vmem:[#allocation41_spill] sm:$0xff] %v6224_v26  ;;  %v6226_v20 = vpop.f32.mrf.mxu0  ;;  %6542 = vst [vmem:[#allocation50_spill] sm:$0xff] %v6242_v2  ;;  %v6248_v5 = vpop.permute.xlu1 %3331  ;;  %v2233_v2 = vmul.f32 %v6096_v47, %v2154_v57  ;;  %v2399_v47 = vmul.f32 %v6176_v52, %v6104_v46  ;;  %v2239_v57 = vmul.f32 %v4206_v42, %v6090_v54 }
 0xd7c   :  { %6534 = vst [vmem:[#allocation42_spill] sm:$0xff] %v6226_v20  ;;  %v6230_v30 = vpop.f32.mrf.mxu1  ;;  %6545 = vst [vmem:[#allocation53_spill] sm:$0xff] %v6248_v5  ;;  %v2236_v5 = vmul.f32 %v4203_v10, %v6075_v51  ;;  %v2397_v10 = vmul.f32 %v6100_v62, %v6180_v0  ;;  %v2400_v46 = vmul.f32 %v6106_v60, %v6186_v4 }
 0xd7d   :  { %6536 = vst [vmem:[#allocation44_spill] sm:$0xff] %v6230_v30  ;;  %v6232_v53 = vpop.f32.mrf.mxu0  ;;  %v2240_v54 = vmul.f32 %v4207_v35, %v6094_v25  ;;  %v2403_v62 = vmul.f32 %v6190_v7, %v6112_v6  ;;  %v2401_v60 = vmul.f32 %v6108_v14, %v6192_v39  ;;  %v2577_v25 = vmul.f32 %v6116_v58, %v2499_v19  ;;  %v6553_v7 = vld [vmem:[#allocation14_spill] sm:$0xff] }
 0xd7e   :  { %6537 = vst [vmem:[#allocation45_spill] sm:$0xff] %v6232_v53  ;;  %v4250_v38 = vpop.f32.mrf.mxu1  ;;  %v2741_v6 = vmul.f32 %v6196_v44, %v6134_v41  ;;  %v2739_v14 = vmul.f32 %v6130_v17, %v6202_v13 }
 0xd7f   :  { %v6236_v16 = vpop.f32.mrf.mxu0  ;;  %v2411_v0 = vadd.f32 %v2403_v62, %v2240_v54  ;;  %v2904_v58 = vmul.f32 %v4250_v38, %v6150_v12  ;;  %v6554_v38 = vld [vmem:[#allocation12_spill] sm:$0xff] }
 0xd80   :  { %6539 = vst [vmem:[#allocation47_spill] sm:$0xff] %v6236_v16  ;;  %v6238_v28 = vpop.f32.mrf.mxu1  ;;  %v2235_v16 = vmul.f32 %v4202_v48, %v6062_v63  ;;  %v2234_v63 = vmul.f32 %v6053_v33, %v2157_v56  ;;  %v2237_v33 = vmul.f32 %v6079_v27, %v2170_v40  ;;  %v2579_v27 = vmul.f32 %v4227_v23, %v6120_v21  ;;  %v6555_v40 = vld [vmem:[#allocation35_spill] sm:$0xff] }
 0xd81   :  { %6540 = vst [vmem:[#allocation48_spill] sm:$0xff] %v6238_v28  ;;  %v6240_v34 = vpop.f32.mrf.mxu0  ;;  %v6259_v28 = vpop.permute.xlu0 %3336  ;;  %v2580_v21 = vmul.f32 %v6122_v15, %v2512_v18 }
 0xd82   :  { %6541 = vst [vmem:[#allocation49_spill] sm:$0xff] %v6240_v34  ;;  %v6244_v24 = vpop.f32.mrf.mxu1  ;;  %v2408_v35 = vadd.f32 %v2400_v46, %v2237_v33  ;;  %v6549_v4 = vld [vmem:[#allocation41_spill] sm:$0xff]  ;;  %v6560_v33 = vld [vmem:[#allocation16_spill] sm:$0xff] }
 0xd83   :  { %6543 = vst [vmem:[#allocation51_spill] sm:$0xff] %v6244_v24  ;;  %v6246_v20 = vpop.f32.mrf.mxu0  ;;  %v2583_v41 = vmul.f32 %v6549_v4, %v6128_v43  ;;  %v6557_v43 = vld [vmem:[#allocation8_spill] sm:$0xff] }
 0xd84   :  { %6544 = vst [vmem:[#allocation52_spill] sm:$0xff] %v6246_v20  ;;  %v6250_v30 = vpop.f32.mrf.mxu1  ;;  %v2398_v20 = vmul.f32 %v4214_v9, %v6102_v8  ;;  %v2578_v8 = vmul.f32 %v4226_v1, %v6118_v61  ;;  %v2576_v61 = vmul.f32 %v6114_v45, %v2496_v36  ;;  %v2588_v39 = vadd.f32 %v2580_v21, %v2408_v35  ;;  %v6556_v23 = vld [vmem:[#allocation44_spill] sm:$0xff]  ;;  %v6566_v35 = vld [vmem:[#allocation23_spill] sm:$0xff] }
 0xd85   :  { %6546 = vst [vmem:[#allocation54_spill] sm:$0xff] %v6250_v30  ;;  %v6252_v53 = vpop.f32.mrf.mxu0  ;;  %v6268_v30 = vpop.permute.xlu1 %3341 }
 0xd86   :  { %6547 = vst [vmem:[#allocation55_spill] sm:$0xff] %v6252_v53  ;;  %v6254_v11 = vpop.f32.mrf.mxu1  ;;  %v2396_v53 = vmul.f32 %v6098_v49, %v6172_v31  ;;  %v2402_v49 = vmul.f32 %v6182_v3, %v6110_v55  ;;  %v2238_v55 = vmul.f32 %v6085_v59, %v6200_v50  ;;  %v2582_v59 = vmul.f32 %v4230_v29, %v6126_v32  ;;  %v6550_v32 = vld [vmem:[#allocation33_spill] sm:$0xff] }
 0xd87   :  { %v6257_v26 = vpop.f32.mrf.mxu0  ;;  %v2742_v3 = vmul.f32 %v6204_v37, %v6136_v22  ;;  %v6551_v29 = vld [vmem:[#allocation9_spill] sm:$0xff]  ;;  %v2745_v22 = vmul.f32 %v6555_v40, %v6554_v38 }
 0xd88   :  { %6548 = vst [vmem:[#allocation56_spill] sm:$0xff] %v6257_v26  ;;  %v6262_v34 = vpop.f32.mrf.mxu1  ;;  %v2406_v26 = vadd.f32 %v2398_v20, %v2235_v16  ;;  %v2404_v9 = vadd.f32 %v2396_v53, %v2233_v2  ;;  %v2407_v16 = vadd.f32 %v2399_v47, %v2236_v5  ;;  %v6292_v20 = vpop.permute.xlu0 %3346  ;;  %v2405_v53 = vadd.f32 %v2397_v10, %v2234_v63  ;;  %v6552_v42 = vld [vmem:[#allocation48_spill] sm:$0xff] }
 0xd89   :  { %v6266_v24 = vpop.f32.mrf.mxu0  ;;  %v2410_v52 = vadd.f32 %v2402_v49, %v2239_v57  ;;  %v6304_v36 = vpop.permute.xlu1 %3351  ;;  %v2409_v19 = vadd.f32 %v2401_v60, %v2238_v55  ;;  %v2740_v15 = vmul.f32 %v6551_v29, %v6550_v32  ;;  %v2902_v17 = vmul.f32 %v6553_v7, %v6552_v42  ;;  %v6558_v57 = vld [vmem:[#allocation36_spill] sm:$0xff]  ;;  %v6565_v60 = vld [vmem:[#allocation15_spill] sm:$0xff] }
 0xd8a   :  { %v6273_v48 = vpop.f32.mrf.mxu1  ;;  %v2586_v1 = vadd.f32 %v2578_v8, %v2406_v26  ;;  %v2584_v26 = vadd.f32 %v2576_v61, %v2404_v9  ;;  %v2587_v56 = vadd.f32 %v2579_v27, %v2407_v16  ;;  %v2585_v18 = vadd.f32 %v2577_v25, %v2405_v53  ;;  %v6559_v8 = vld [vmem:[#allocation10_spill] sm:$0xff]  ;;  %v6561_v16 = vld [vmem:[#allocation51_spill] sm:$0xff]  ;;  %v6562_v61 = vld [vmem:[#allocation13_spill] sm:$0xff] }
 0xd8b   :  { %v6279_v51 = vpop.f32.mrf.mxu0  ;;  %v2590_v37 = vadd.f32 %v2582_v59, %v2410_v52  ;;  %v2581_v63 = vmul.f32 %v6557_v43, %v6556_v23  ;;  %v2743_v9 = vmul.f32 %v6559_v8, %v6558_v57  ;;  %v2905_v46 = vmul.f32 %v6561_v16, %v6560_v33  ;;  %v6563_v53 = vld [vmem:[#allocation38_spill] sm:$0xff]  ;;  %v6569_v32 = vld [vmem:[#allocation40_spill] sm:$0xff]  ;;  %v6570_v29 = vld [vmem:[#allocation11_spill] sm:$0xff] }
 0xd8c   :  { %v6286_v31 = vpop.f32.mrf.mxu1  ;;  %v2749_v5 = vadd.f32 %v2741_v6, %v2586_v1  ;;  %v6323_v12 = vpop.permute.xlu0 %3356  ;;  %v2747_v49 = vadd.f32 %v2739_v14, %v2584_v26  ;;  %v2746_v62 = vmul.f32 %v6563_v53, %v6562_v61  ;;  %v2591_v55 = vadd.f32 %v2583_v41, %v2411_v0  ;;  %v6564_v52 = vld [vmem:[#allocation54_spill] sm:$0xff]  ;;  %v6573_v43 = vld [vmem:[#allocation29_spill] sm:$0xff]  ;;  %v6578_v16 = vld [vmem:[#allocation32_spill] sm:$0xff] }
 0xd8d   :  { %v6302_v45 = vpop.f32.mrf.mxu0  ;;  %v3469_v54 = vpop.permute.xlu1 %3468  ;;  %v2750_v27 = vadd.f32 %v2742_v3, %v2587_v56  ;;  %v2903_v1 = vmul.f32 %v6565_v60, %v6564_v52  ;;  %v6567_v6 = vld [vmem:[#allocation42_spill] sm:$0xff]  ;;  %v2748_v4 = vadd.f32 %v2740_v15, %v2585_v18  ;;  %v2589_v42 = vadd.f32 %v2581_v63, %v2409_v19  ;;  %v6571_v3 = vld [vmem:[#allocation45_spill] sm:$0xff]  ;;  %v6574_v15 = vld [vmem:[#allocation19_spill] sm:$0xff] }
 0xd8e   :  { %v4274_v2 = vpop.f32.mrf.mxu1  ;;  %v2912_v10 = vadd.f32 %v2904_v58, %v2749_v5  ;;  %v3067_v59 = vmul.f32 %v6567_v6, %v6566_v35  ;;  %v2910_v21 = vadd.f32 %v2902_v17, %v2747_v49  ;;  %v6568_v58 = vld [vmem:[#allocation31_spill] sm:$0xff]  ;;  %v2744_v5 = vmul.f32 %v6570_v29, %v6569_v32  ;;  %v6572_v56 = vld [vmem:[#allocation21_spill] sm:$0xff]  ;;  %v6580_v53 = vld [vmem:[#allocation22_spill] sm:$0xff] }
 0xd8f   :  { %v6321_v13 = vpop.f32.mrf.mxu0  ;;  %v3214_v14 = vmul.f32 %v4274_v2, %v6568_v58  ;;  %v2753_v7 = vadd.f32 %v2745_v22, %v2590_v37  ;;  %v2751_v38 = vadd.f32 %v2743_v9, %v2588_v39  ;;  %v3065_v41 = vmul.f32 %v6572_v56, %v6571_v3  ;;  %v6575_v18 = vld [vmem:[#allocation17_spill] sm:$0xff]  ;;  %v6576_v22 = vld [vmem:[#allocation24_spill] sm:$0xff]  ;;  %v6577_v37 = vld [vmem:[#allocation47_spill] sm:$0xff] }
 0xd90   :  { %v3132_v50 = vpop.f32.mrf.mxu1  ;;  %v2913_v40 = vadd.f32 %v2905_v46, %v2750_v27  ;;  %v3075_v23 = vadd.f32 %v3067_v59, %v2912_v10  ;;  %v3474_v8 = vpop.permute.xlu0 %3473  ;;  %v2911_v17 = vadd.f32 %v2903_v1, %v2748_v4  ;;  %v2908_v2 = vmul.f32 %v6254_v11, %v6574_v15  ;;  %v6579_v61 = vld [vmem:[#allocation49_spill] sm:$0xff]  ;;  %v6581_v11 = vld [vmem:[#allocation27_spill] sm:$0xff]  ;;  %v6582_v52 = vld [vmem:[#allocation52_spill] sm:$0xff] }
 0xd91   :  { %v3282_v26 = vpop.f32.mrf.mxu0  ;;  %v3212_v57 = vmul.f32 %v6573_v43, %v3132_v50  ;;  %v2906_v49 = vmul.f32 %v6575_v18, %v6262_v34  ;;  %v2754_v33 = vadd.f32 %v2746_v62, %v2591_v55  ;;  %v3068_v39 = vmul.f32 %v6577_v37, %v6576_v22  ;;  %v3479_v50 = vpop.permute.xlu1 %3478  ;;  %v6583_v34 = vld [vmem:[#allocation55_spill] sm:$0xff]  ;;  %v6584_v62 = vld [vmem:[#allocation25_spill] sm:$0xff]  ;;  %v6587_v29 = vld [vmem:[#allocation18_spill] sm:$0xff] }
 0xd92   :  { %v4275_v44 = vpop.f32.mrf.mxu1  ;;  %v3222_v63 = vadd.f32 %v3214_v14, %v3075_v23  ;;  %v3073_v9 = vadd.f32 %v3065_v41, %v2910_v21  ;;  %v3066_v27 = vmul.f32 %v6580_v53, %v6579_v61  ;;  %v3071_v60 = vmul.f32 %v6582_v52, %v6581_v11  ;;  %v6585_v6 = vld [vmem:[#allocation53_spill] sm:$0xff]  ;;  %v6588_v23 = vld [vmem:[#allocation46_spill] sm:$0xff] }
 0xd93   :  { %v3215_v10 = vmul.f32 %v4275_v44, %v6578_v16  ;;  %v6354_v46 = vpop.f32.mrf.mxu0  ;;  %v3069_v55 = vmul.f32 %v6584_v62, %v6583_v34  ;;  %v2752_v1 = vadd.f32 %v2744_v5, %v2589_v42  ;;  %v3361_v59 = vmul.f32 %v6279_v51, %v6585_v6  ;;  %v6586_v44 = vld [vmem:[#allocation30_spill] sm:$0xff] }
 0xd94   :  { %v3135_v47 = vpop.f32.mrf.mxu1  ;;  %v3220_v21 = vadd.f32 %v3212_v57, %v3073_v9  ;;  %v3076_v4 = vadd.f32 %v3068_v39, %v2913_v40  ;;  %v2916_v14 = vadd.f32 %v2908_v2, %v2753_v7  ;;  %v2914_v32 = vadd.f32 %v2906_v49, %v2751_v38  ;;  %v3484_v22 = vpop.permute.xlu0 %3483  ;;  %v6589_v51 = vld [vmem:[#allocation26_spill] sm:$0xff]  ;;  %v6590_v57 = vld [vmem:[#allocation20_spill] sm:$0xff] }
 0xd95   :  { %v3213_v58 = vmul.f32 %v6586_v44, %v3135_v47  ;;  %v2907_v3 = vmul.f32 %v6587_v29, %v6286_v31  ;;  %v3074_v56 = vadd.f32 %v3066_v27, %v2911_v17  ;;  %v3359_v43 = vmul.f32 %v6588_v23, %v6302_v45  ;;  %v3295_v5 = vpop.f32.mrf.mxu0  ;;  %v6591_v31 = vld [vmem:[#allocation34_spill] sm:$0xff]  ;;  %v3489_v39 = vpop.permute.xlu1 %3488 }
 0xd96   :  { %v4278_v25 = vpop.f32.mrf.mxu1  ;;  %v3223_v15 = vadd.f32 %v3215_v10, %v3076_v4  ;;  %v3369_v42 = vadd.f32 %v3361_v59, %v3222_v63  ;;  %v3070_v40 = vmul.f32 %v6589_v51, %v6266_v24  ;;  %v2909_v47 = vmul.f32 %v6273_v48, %v6590_v57  ;;  %v6592_v9 = vld [vmem:[#allocation50_spill] sm:$0xff]  ;;  %v6593_v10 = vld [vmem:[#allocation39_spill] sm:$0xff]  ;;  %v6595_v59 = vld [vmem:[#allocation28_spill] sm:$0xff] }
 0xd97   :  { %v3362_v7 = vmul.f32 %v6321_v13, %v6259_v28  ;;  %v3221_v2 = vadd.f32 %v3213_v58, %v3074_v56  ;;  %v3367_v45 = vadd.f32 %v3359_v43, %v3220_v21  ;;  %v2915_v63 = vadd.f32 %v2907_v3, %v2752_v1  ;;  %v4291_v48 = vpop.f32.mrf.mxu0  ;;  %v6596_v21 = vld [vmem:[#allocation56_spill] sm:$0xff] }
 0xd98   :  { %v3148_v0 = vpop.f32.mrf.mxu1  ;;  %v3360_v16 = vmul.f32 %v6592_v9, %v3282_v26  ;;  %v3218_v24 = vmul.f32 %v4278_v25, %v6593_v10  ;;  %v2917_v27 = vadd.f32 %v2909_v47, %v2754_v33  ;;  %v3079_v11 = vadd.f32 %v3071_v60, %v2916_v14  ;;  %v3494_v6 = vpop.permute.xlu0 %3493  ;;  %v6597_v14 = vld [vmem:[#allocation43_spill] sm:$0xff] }
 0xd99   :  { %v3216_v38 = vmul.f32 %v6591_v31, %v3148_v0  ;;  %v3370_v28 = vadd.f32 %v3362_v7, %v3223_v15  ;;  %v3072_v4 = vmul.f32 %v6596_v21, %v6595_v59  ;;  %v3363_v44 = vmul.f32 %v6268_v30, %v3295_v5  ;;  %v3499_v3 = vpop.permute.xlu1 %3498 }
 0xd9a   :  { %v6349_v19 = vpop.f32.mrf.mxu1  ;;  %v3368_v25 = vadd.f32 %v3360_v16, %v3221_v2  ;;  %v3078_v33 = vadd.f32 %v3070_v40, %v2915_v63  ;;  %v3226_v58 = vadd.f32 %v3218_v24, %v3079_v11 }
 0xd9b   :  { %v3080_v56 = vadd.f32 %v3072_v4, %v2917_v27 }
 0xd9c   :  { %v3151_v35 = vpop.f32.mrf.mxu1 }
 0xd9e   :  { %v4298_v41 = vpop.f32.mrf.mxu1 }
 0xd9f   :  { %v3508_v18 = vmul.f32 %v4298_v41, %v3479_v50  ;;  %v3077_v50 = vadd.f32 %v3069_v55, %v2914_v32  ;;  %v3219_v32 = vmul.f32 %v6349_v19, %v6597_v14 }
 0xda0   :  { %v3426_v17 = vpop.f32.mrf.mxu1 }
 0xda1   :  { %v6376_v49 = vadd.f32 %v3508_v18, %v3369_v42  ;;  %v3506_v37 = vmul.f32 %v3469_v54, %v3426_v17  ;;  %v3224_v52 = vadd.f32 %v3216_v38, %v3077_v50  ;;  %v6594_v54 = vld [vmem:[#allocation37_spill] sm:$0xff]  ;;  %v3227_v19 = vadd.f32 %v3219_v32, %v3080_v56 }
 0xda2   :  { %v4299_v61 = vpop.f32.mrf.mxu1  ;;  %v3217_v34 = vmul.f32 %v6594_v54, %v3151_v35  ;;  %v3298_v35 = vpop.f32.mrf.mxu0 }
 0xda3   :  { %v6380_v53 = vadd.f32 %v3506_v37, %v3367_v45  ;;  %v3509_v13 = vmul.f32 %v4299_v61, %v3484_v22  ;;  %v3530_v0 = vsel %vm371_vm4, %v6376_v49, 0.0  ;;  %v3371_v23 = vadd.f32 %v3363_v44, %v3224_v52 }
 0xda4   :  { %v3429_v62 = vpop.f32.mrf.mxu1  ;;  %3531 = vadd.xlane.f32.xlu0 %v3530_v0  ;;  %v3225_v41 = vadd.f32 %v3217_v34, %v3078_v33  ;;  %v3364_v18 = vmul.f32 %v6292_v20, %v3298_v35 }
 0xda5   :  { %v6385_v26 = vadd.f32 %v3509_v13, %v3370_v28  ;;  %v3507_v55 = vmul.f32 %v3474_v8, %v3429_v62  ;;  %v3524_v1 = vsel %vm371_vm4, %v6380_v53, 0.0  ;;  %v3365_v8 = vmul.f32 %v6354_v46, %v6304_v36  ;;  %v3504_v36 = vpop.permute.xlu0 %3503 }
 0xda6   :  { %v4302_v60 = vpop.f32.mrf.mxu1  ;;  %3525 = vadd.xlane.f32.xlu1 %v3524_v1  ;;  %v3366_v46 = vmul.f32 %v4291_v48, %v6323_v12  ;;  %v3372_v57 = vadd.f32 %v3364_v18, %v3225_v41 }
 0xda7   :  { %v3515_v29 = vadd.f32 %v3507_v55, %v3368_v25  ;;  %v3512_v15 = vmul.f32 %v4302_v60, %v3499_v3  ;;  %v3533_v30 = vsel %vm371_vm4, %v6385_v26, 0.0  ;;  %v3373_v51 = vadd.f32 %v3365_v8, %v3226_v58 }
 0xda8   :  { %v3442_v43 = vpop.f32.mrf.mxu1  ;;  %v3374_v2 = vadd.f32 %v3366_v46, %v3227_v19 }
 0xda9   :  { %v3510_v42 = vmul.f32 %v3489_v39, %v3442_v43  ;;  %v3527_v5 = vsel %vm371_vm4, %v3515_v29, 0.0  ;;  %v3520_v7 = vadd.f32 %v3512_v15, %v3373_v51 }
 0xdaa   :  { %v4303_v22 = vpop.f32.mrf.mxu1  ;;  %3534 = vadd.xlane.f32.xlu1 %v3533_v30  ;;  %3528 = vadd.xlane.f32.xlu0 %v3527_v5 }
 0xdab   :  { %v3518_v40 = vadd.f32 %v3510_v42, %v3371_v23  ;;  %v3513_v31 = vmul.f32 %v4303_v22, %v3504_v36  ;;  %v3542_v39 = vsel %vm371_vm4, %v3520_v7, 0.0 }
 0xdac   :  { %v3445_v47 = vpop.f32.mrf.mxu1 }
 0xdad   :  { %v3511_v38 = vmul.f32 %v3494_v6, %v3445_v47  ;;  %v3536_v17 = vsel %vm371_vm4, %v3518_v40, 0.0  ;;  %v3521_v20 = vadd.f32 %v3513_v31, %v3374_v2 }
 0xdae   :  { %3537 = vadd.xlane.f32.xlu0 %v3536_v17 }
 0xdaf   :  { %v3519_v45 = vadd.f32 %v3511_v38, %v3372_v57  ;;  %v3545_v63 = vsel %vm371_vm4, %v3521_v20, 0.0 }
 0xdb1   :  { %v3539_v37 = vsel %vm371_vm4, %v3519_v45, 0.0 }
 0xdb2   :  { %3540 = vadd.xlane.f32.xlu1 %v3539_v37  ;;  %3543 = vadd.xlane.f32.xlu0 %v3542_v39  ;;  %v3924_v39 = vld [vmem:[%s6479_s6 + $0xa] ss:$0 sm:$0xff] }
 0xdb6   :  { %3546 = vadd.xlane.f32.xlu1 %v3545_v63 }
 0xe2d   :  { %v3532_v12 = vpop.xlane.xlu0 %3531 }
 0xe2e   :  { %v3550_v9 = vmul.f32 0.03125, %v3532_v12 }
 0xe2f   :  { %v3526_v16 = vpop.xlane.xlu1 %3525 }
 0xe30   :  { %v6406_v10 = vsub.f32 %v6376_v49, %v3550_v9  ;;  %v3548_v24 = vmul.f32 0.03125, %v3526_v16  ;;  %v3925_v16 = vld [vmem:[%s6479_s6 + $0xb] ss:$0 sm:$0xff]  ;;  %s4547_s6 = smov [#allocation5]  }
 0xe31   :  { %s3665_s5 = sshll.u32 %s4547_s6, 4  ;;  %s3666_s5 = int_to_ptr.vmem [resolvable:$true] %s3665_s5 }
 0xe32   :  { %v6409_v50 = vsub.f32 %v6380_v53, %v3548_v24  ;;  %v3566_v61 = vmul.f32 %v6406_v10, %v6406_v10  ;;  %s4515_s9 = scalar_lea.vmem %s3666_s5, 1024  ;;  %p4520_p6 = scmp.lt.s32.totalorder %s3666_s5, %s3666_s5 }
 0xe33   :  { %v3529_v48 = vpop.xlane.xlu0 %3528  ;;  %v3535_v28 = vpop.xlane.xlu1 %3534  ;;  %p4516_p5 = scmp.ne.s32.totalorder %s3666_s5, %s4515_s9  ;;  %p4521_p7 = scmp.lt.s32.totalorder %s4515_s9, %s4515_s9 }
 0xe34   :  { %v3549_v13 = vmul.f32 0.03125, %v3529_v48  ;;  %v3551_v0 = vmul.f32 0.03125, %v3535_v28  ;;  %v3578_v27 = vsel %vm371_vm4, %v3566_v61, 0.0  ;;  %v3564_v11 = vmul.f32 %v6409_v50, %v6409_v50 }
 0xe35   :  { %3579 = vadd.xlane.f32.xlu0 %v3578_v27  ;;  %p4522_p8 = por %p4521_p7, %p4520_p6 }
 0xe36   :  { %v6416_v52 = vsub.f32 %v3515_v29, %v3549_v13  ;;  %v6419_v49 = vsub.f32 %v6385_v26, %v3551_v0  ;;  %v3572_v34 = vsel %vm371_vm4, %v3564_v11, 0.0 }
 0xe37   :  { %v3538_v53 = vpop.xlane.xlu0 %3537  ;;  %p4523_p9 = pnand %p4522_p8, %p4516_p5 }
 0xe38   :  { %v3552_v54 = vmul.f32 0.03125, %v3538_v53  ;;  %v3567_v62 = vmul.f32 %v6419_v49, %v6419_v49  ;;  %v3565_v1 = vmul.f32 %v6416_v52, %v6416_v52 }
 0xe39   :  { %3573 = vadd.xlane.f32.xlu0 %v3572_v34 }
 0xe3a   :  { %v6424_v25 = vsub.f32 %v3518_v40, %v3552_v54  ;;  %v3581_v55 = vsel %vm371_vm4, %v3567_v62, 0.0  ;;  %v3575_v58 = vsel %vm371_vm4, %v3565_v1, 0.0 }
 0xe3b   :  { %v3544_v6 = vpop.xlane.xlu0 %3543  ;;  %3582 = vadd.xlane.f32.xlu1 %v3581_v55  ;;  %v3541_v59 = vpop.xlane.xlu1 %3540 }
 0xe3c   :  { %v3554_v26 = vmul.f32 0.03125, %v3544_v6  ;;  %v3553_v21 = vmul.f32 0.03125, %v3541_v59  ;;  %v3568_v4 = vmul.f32 %v6424_v25, %v6424_v25 }
 0xe3e   :  { %v6431_v44 = vsub.f32 %v3520_v7, %v3554_v26  ;;  %v6433_v33 = vsub.f32 %v3519_v45, %v3553_v21  ;;  %v3584_v60 = vsel %vm371_vm4, %v3568_v4, 0.0 }
 0xe3f   :  { %3585 = vadd.xlane.f32.xlu0 %v3584_v60  ;;  %3576 = vadd.xlane.f32.xlu1 %v3575_v58  ;;  %v3547_v35 = vpop.xlane.xlu1 %3546 }
 0xe40   :  { %v3555_v14 = vmul.f32 0.03125, %v3547_v35  ;;  %v3570_v32 = vmul.f32 %v6431_v44, %v6431_v44  ;;  %v3569_v29 = vmul.f32 %v6433_v33, %v6433_v33 }
 0xe42   :  { %v6441_v3 = vsub.f32 %v3521_v20, %v3555_v14  ;;  %v3590_v8 = vsel %vm371_vm4, %v3570_v32, 0.0  ;;  %v3587_v56 = vsel %vm371_vm4, %v3569_v29, 0.0 }
 0xe43   :  { %3591 = vadd.xlane.f32.xlu0 %v3590_v8  ;;  %3588 = vadd.xlane.f32.xlu1 %v3587_v56 }
 0xe44   :  { %v3571_v41 = vmul.f32 %v6441_v3, %v6441_v3 }
 0xe46   :  { %v3593_v23 = vsel %vm371_vm4, %v3571_v41, 0.0 }
 0xe47   :  { %3594 = vadd.xlane.f32.xlu1 %v3593_v23 }
 0xebe   :  { %v3580_v43 = vpop.xlane.xlu0 %3579 }
 0xebf   :  { %v3598_v15 = vmul.f32 0.03125, %v3580_v43 }
 0xec1   :  { %v3606_v42 = vadd.f32 1e-06, %v3598_v15 }
 0xec2   :  { %v3574_v30 = vpop.xlane.xlu0 %3573 }
 0xec3   :  { %4487 = vrsqrt.f32 %v3606_v42  ;;  %v3596_v5 = vmul.f32 0.03125, %v3574_v30 }
 0xec4   :  { %v3583_v18 = vpop.xlane.xlu1 %3582 }
 0xec5   :  { %v3604_v22 = vadd.f32 1e-06, %v3596_v5  ;;  %v3599_v19 = vmul.f32 0.03125, %v3583_v18 }
 0xec7   :  { %4489 = vrsqrt.f32 %v3604_v22  ;;  %v3607_v51 = vadd.f32 1e-06, %v3599_v19 }
 0xec8   :  { %v3586_v40 = vpop.xlane.xlu0 %3585  ;;  %v3577_v36 = vpop.xlane.xlu1 %3576 }
 0xec9   :  { %4491 = vrsqrt.f32 %v3607_v51  ;;  %v3600_v46 = vmul.f32 0.03125, %v3586_v40  ;;  %v3597_v57 = vmul.f32 0.03125, %v3577_v36 }
 0xecb   :  { %v3608_v47 = vadd.f32 1e-06, %v3600_v46  ;;  %v3605_v7 = vadd.f32 1e-06, %v3597_v57 }
 0xecc   :  { %v3592_v31 = vpop.xlane.xlu0 %3591  ;;  %v3589_v38 = vpop.xlane.xlu1 %3588 }
 0xecd   :  { %4493 = vrsqrt.f32 %v3608_v47  ;;  %v3602_v17 = vmul.f32 0.03125, %v3592_v31  ;;  %v3601_v2 = vmul.f32 0.03125, %v3589_v38 }
 0xece   :  { %4495 = vrsqrt.f32 %v3605_v7 }
 0xecf   :  { %v3610_v45 = vadd.f32 1e-06, %v3602_v17  ;;  %v3609_v20 = vadd.f32 1e-06, %v3601_v2 }
 0xed0   :  { %v4488_v37 = vpop.eup %4487  ;;  %v3595_v63 = vpop.xlane.xlu1 %3594 }
 0xed1   :  { %v3622_v12 = vmul.f32 %v4488_v37, %v6406_v10  ;;  %4497 = vrsqrt.f32 %v3610_v45  ;;  %v3603_v9 = vmul.f32 0.03125, %v3595_v63 }
 0xed2   :  { %4499 = vrsqrt.f32 %v3609_v20 }
 0xed3   :  { %v3634_v24 = vmul.f32 %v3924_v39, %v3622_v12  ;;  %v3611_v61 = vadd.f32 1e-06, %v3603_v9 }
 0xed4   :  { %v4490_v48 = vpop.eup %4489 }
 0xed5   :  { %v3646_v28 = vadd.f32 %v3925_v16, %v3634_v24  ;;  %v3620_v13 = vmul.f32 %v4490_v48, %v6409_v50  ;;  %4501 = vrsqrt.f32 %v3611_v61 }
 0xed6   :  { %v4492_v0 = vpop.eup %4491 }
 0xed7   :  { %3654 = vst.msk [vmem:[#allocation5 + $0x10] sm:$0xff] %vm371_vm4, %v3646_v28  ;;  %v3632_v27 = vmul.f32 %v3924_v39, %v3620_v13  ;;  %v3623_v10 = vmul.f32 %v4492_v0, %v6419_v49 }
 0xed9   :  { %v3644_v11 = vadd.f32 %v3925_v16, %v3632_v27  ;;  %v3635_v53 = vmul.f32 %v3924_v39, %v3623_v10 }
 0xeda   :  { %v4494_v54 = vpop.eup %4493 }
 0xedb   :  { %v4496_v34 = vpop.eup %4495  ;;  %3652 = vst.msk [vmem:[#allocation5] sm:$0xff] %vm371_vm4, %v3644_v11  ;;  %v3647_v62 = vadd.f32 %v3925_v16, %v3635_v53  ;;  %v3624_v55 = vmul.f32 %v4494_v54, %v6424_v25 }
 0xedc   :  { %v3621_v1 = vmul.f32 %v4496_v34, %v6416_v52 }
 0xedd   :  { %3655 = vst.msk [vmem:[#allocation5 + $0x18] sm:$0xff] %vm371_vm4, %v3647_v62  ;;  %v3636_v50 = vmul.f32 %v3924_v39, %v3624_v55 }
 0xede   :  { %v4498_v6 = vpop.eup %4497  ;;  %v3633_v59 = vmul.f32 %v3924_v39, %v3621_v1 }
 0xedf   :  { %v4500_v26 = vpop.eup %4499  ;;  %v3648_v21 = vadd.f32 %v3925_v16, %v3636_v50  ;;  %v3626_v49 = vmul.f32 %v4498_v6, %v6431_v44 }
 0xee0   :  { %v3645_v4 = vadd.f32 %v3925_v16, %v3633_v59  ;;  %v3625_v60 = vmul.f32 %v4500_v26, %v6433_v33 }
 0xee1   :  { %3656 = vst.msk [vmem:[#allocation5 + $0x20] sm:$0xff] %vm371_vm4, %v3648_v21  ;;  %v3638_v58 = vmul.f32 %v3924_v39, %v3626_v49 }
 0xee2   :  { %v4502_v35 = vpop.eup %4501  ;;  %3653 = vst.msk [vmem:[#allocation5 + $0x8] sm:$0xff] %vm371_vm4, %v3645_v4  ;;  %v3637_v25 = vmul.f32 %v3924_v39, %v3625_v60 }
 0xee3   :  { %v3650_v52 = vadd.f32 %v3925_v16, %v3638_v58  ;;  %v3627_v14 = vmul.f32 %v4502_v35, %v6441_v3 }
 0xee4   :  { %v3649_v32 = vadd.f32 %v3925_v16, %v3637_v25 }
 0xee5   :  { %3658 = vst.msk [vmem:[#allocation5 + $0x30] sm:$0xff] %vm371_vm4, %v3650_v52  ;;  %v3639_v29 = vmul.f32 %v3924_v39, %v3627_v14 }
 0xee6   :  { %3657 = vst.msk [vmem:[#allocation5 + $0x28] sm:$0xff] %vm371_vm4, %v3649_v32 }
 0xee7   :  { %v3651_v44 = vadd.f32 %v3925_v16, %v3639_v29 }
 0xee9   :  { %3659 = vst.msk [vmem:[#allocation5 + $0x38] sm:$0xff] %vm371_vm4, %v3651_v44 }
 0xeea   :  { %4526 = shalt.err (!%p4523_p9)
}
 0xeeb   :  { %s4548_s15 = smov 128   ;;  %s4549_s11 = smov 8  }
 0xeec   :  { %3671 = dma.vmem_to_hbm [thread:$0]  %s3666_s5, 1024, %s6487_s14, [#allocation3], %s4548_s15, %s4548_s15, %s4549_s11  }
 0xeed   :  { %4537 = dma.done.wait [#allocation3], 1024  }
 0xeee   :  { %4538 = vsyncadd [#allocation3], 4294966272 }
 0xeef   :  { %3675 = vsyncpa [#allocation3], 1 }
 0xef0   :  { %3676 = vsyncpa [#allocation4], 1 }

</bundles_post_ra>
